<compile_context>
chip_gen: v7x
topology: tpu7x:2x2x1
jax: 0.10.0
libtpu: 0.0.40
codegen_flags: <defaults>
</compile_context>

<pallas_src>
import jax
import jax.numpy as jnp
from jax import lax
from jax.experimental import pallas as pl
from jax.experimental.pallas import tpu as pltpu

EPS = 1e-5       # PyTorch BatchNorm1d default eps
OUT_PAD = 8      # padded width for the 3-channel output (sliced in wrapper)


def _augmentor_disp_kernel(x_ref,
                           w1_ref, g1_ref, be1_ref,
                           w2_ref, g2_ref, be2_ref,
                           w3_ref, g3_ref, be3_ref,
                           w4_ref, b4_ref,
                           out_ref):
    """Fused conv1(1x1)+bn+relu -> conv2+bn+relu -> conv3+bn+relu -> conv4."""

    def conv_bn_relu(h_bf16, w_ref, g_ref, be_ref):
        # 1x1 Conv1d == channel matmul on the MXU (bf16 in, f32 accumulate).
        # Conv bias omitted: exactly cancelled by the training-mode BN mean
        # subtraction that immediately follows.
        y = jnp.dot(h_bf16, w_ref[...], preferred_element_type=jnp.float32)

        # One reduction pass over a lane-concatenated [y, y*y] block gives
        # both BN statistics with a single cross-sublane reduction instead of
        # two full passes over the (M, C) f32 tile.
        c = y.shape[1]
        stats = jnp.mean(jnp.concatenate([y, y * y], axis=1),
                         axis=0, keepdims=True)             # (1, 2C) f32
        mean = stats[:, :c]
        mean_sq = stats[:, c:]
        # E[y^2]-E[y]^2 can cancel in f32 for channels with mean >> std; the
        # clamp keeps rsqrt finite (validated against the f32 reference).
        var = jnp.maximum(mean_sq - mean * mean, 0.0)

        # BN folded into a per-channel scale/shift so the wide (M, C) work is
        # one mul + one add; elementwise math stays f32 (v5e VPU has no bf16).
        scale = g_ref[...] * lax.rsqrt(var + EPS)            # (1, C)
        shift = be_ref[...] - mean * scale                   # (1, C)
        yn = jnp.maximum(y * scale + shift, 0.0)             # BN + ReLU (VPU)
        return yn.astype(jnp.bfloat16)                       # bf16 into next MXU

    h = x_ref[...]                                           # bf16 (M, C_in)
    h = conv_bn_relu(h, w1_ref, g1_ref, be1_ref)
    h = conv_bn_relu(h, w2_ref, g2_ref, be2_ref)
    h = conv_bn_relu(h, w3_ref, g3_ref, be3_ref)

    # Final 1x1 conv emitted lane-dense: contract h's channel axis against
    # w4's input axis directly -> (OUT_PAD, M) with points on the lane axis,
    # so stores are unmasked / lane-dense at realistic M.  No materialized
    # transpose; the MXU folds the operand orientation.
    out = lax.dot_general(w4_ref[...], h,
                          dimension_numbers=(((0,), (1,)), ((), ())),
                          preferred_element_type=jnp.float32)   # (OUT_PAD, M)
    out_ref[...] = out + b4_ref[...]                             # b4: (OUT_PAD, 1)


def prepare_params(params):
    """One-time (init-time) conversion of module parameters to kernel form.

    Hoisted out of the per-call path: bf16 weights (MXU native), final conv
    padded to OUT_PAD output channels, bias reshaped to (OUT_PAD, 1) for the
    lane-dense output layout.  b1/b2/b3 are dropped (cancelled by training-
    mode BN mean subtraction).
    """
    (w1, b1, g1, be1,
     w2, b2, g2, be2,
     w3, b3, g3, be3,
     w4, b4) = params
    del b1, b2, b3  # exactly cancelled by training-mode BN

    w1b = w1.astype(jnp.bfloat16)
    w2b = w2.astype(jnp.bfloat16)
    w3b = w3.astype(jnp.bfloat16)
    w4p = jnp.pad(w4, ((0, 0), (0, OUT_PAD - w4.shape[1]))).astype(jnp.bfloat16)
    b4p = jnp.transpose(
        jnp.pad(b4, ((0, 0), (0, OUT_PAD - b4.shape[1])))).astype(jnp.float32)

    return (w1b, g1, be1, w2b, g2, be2, w3b, g3, be3, w4p, b4p)


def augmentor_displacement(x, kparams):
    """x: (B, C_in, N) f32 (PyTorch NCW layout); kparams from prepare_params.

    Returns (B, 3, N) f32.
    """
    B, C_in, N = x.shape
    M = B * N
    # (B, C, N) -> (M, C): points on sublanes, channels on lanes, bf16 feed.
    # TODO(synk): for large M fold this transpose/cast into the kernel to
    # avoid an extra HBM round trip of the activation before the kernel runs.
    xm = jnp.transpose(x, (0, 2, 1)).reshape(M, C_in).astype(jnp.bfloat16)

    vmem_spec = pl.BlockSpec(memory_space=pltpu.MemorySpace.VMEM)
    out = pl.pallas_call(
        _augmentor_disp_kernel,
        out_shape=jax.ShapeDtypeStruct((OUT_PAD, M), jnp.float32),
        in_specs=[vmem_spec] * 12,
        out_specs=vmem_spec,
        compiler_params=pltpu.CompilerParams(
            vmem_limit_bytes=32 * 1024 * 1024),
    )(xm, *kparams)

    # strip output-channel padding, back to PyTorch layout (B, 3, N)
    return jnp.transpose(out[:3].reshape(3, B, N), (1, 0, 2))


def make_params(key, dim):
    """Deterministic synthetic parameters matching the module's shapes.

    Conv1d(i, o, 1) weight is (o, i, 1) in PyTorch; we store it as (i, o) so
    the kernel computes y = x @ W.  BatchNorm affine params are (1, C).
    """
    c_in = dim + 1024 + 64
    dims = [(c_in, 1024), (1024, 512), (512, 64), (64, 3)]
    keys = jax.random.split(key, len(dims))
    params = []
    for k, (ci, co) in zip(keys, dims):
        kw, kb = jax.random.split(k)
        w = jax.random.normal(kw, (ci, co), jnp.float32) * 0.02
        b = jax.random.normal(kb, (1, co), jnp.float32) * 0.01
        params.append((w, b))
    (w1, b1), (w2, b2), (w3, b3), (w4, b4) = params
    # BatchNorm affine params: gamma=1, beta=0 (PyTorch default init).
    g1, be1 = jnp.ones((1, 1024), jnp.float32), jnp.zeros((1, 1024), jnp.float32)
    g2, be2 = jnp.ones((1, 512), jnp.float32), jnp.zeros((1, 512), jnp.float32)
    g3, be3 = jnp.ones((1, 64), jnp.float32), jnp.zeros((1, 64), jnp.float32)
    return (w1, b1, g1, be1, w2, b2, g2, be2, w3, b3, g3, be3, w4, b4)


def reference_forward(x, params):
    """Pure-JAX f32 reference of the PyTorch forward (training-mode BN)."""
    (w1, b1, g1, be1, w2, b2, g2, be2, w3, b3, g3, be3, w4, b4) = params
    B, C, N = x.shape
    h = jnp.transpose(x, (0, 2, 1)).reshape(B * N, C)

    def block(h, w, b, g, be):
        y = h @ w + b
        mean = jnp.mean(y, axis=0, keepdims=True)
        var = jnp.mean((y - mean) ** 2, axis=0, keepdims=True)
        y = (y - mean) / jnp.sqrt(var + EPS) * g + be
        return jnp.maximum(y, 0.0)

    h = block(h, w1, b1, g1, be1)
    h = block(h, w2, b2, g2, be2)
    h = block(h, w3, b3, g3, be3)
    out = h @ w4 + b4
    return jnp.transpose(out.reshape(B, N, 3), (0, 2, 1))


def _bf16_quantize_params(params):
    """Round the conv weights to bf16 (as the kernel sees them) for comparison."""
    (w1, b1, g1, be1, w2, b2, g2, be2, w3, b3, g3, be3, w4, b4) = params
    q = lambda w: w.astype(jnp.bfloat16).astype(jnp.float32)
    return (q(w1), b1, g1, be1, q(w2), b2, g2, be2,
            q(w3), b3, g3, be3, q(w4), b4)


if __name__ == "__main__":
    dim = 64                       # Augmentor_Displacement(dim=64)
    B, N = 2, 8                    # small batch / number of points
    c_in = dim + 1024 + 64         # 1152 input channels

    key = jax.random.PRNGKey(0)
    kx, kp = jax.random.split(key)
    x = jax.random.normal(kx, (B, c_in, N), jnp.float32)
    params = make_params(kp, dim)

    # One-time parameter prep (hoisted out of the per-call hot path).
    kparams = jax.block_until_ready(prepare_params(params))

    out = augmentor_displacement(x, kparams)
    out = jax.block_until_ready(out)

    # Compare against the f32 reference evaluated on the same bf16-rounded
    # weights / input the kernel consumes (bf16 feed => looser tolerance).
    x_q = x.astype(jnp.bfloat16).astype(jnp.float32)
    ref = reference_forward(x_q, _bf16_quantize_params(params))

    assert out.shape == (B, 3, N)
    assert jnp.allclose(out, ref, atol=5e-2, rtol=5e-2)

    print("KERNEL_OK")
</pallas_src>

<mosaic_0001>
module attributes {stable_mosaic.version = 11 : i64} {
  func.func @_augmentor_disp_kernel(%arg0: memref<16x1152xbf16, #tpu.memory_space<vmem>>, %arg1: memref<1152x1024xbf16, #tpu.memory_space<vmem>>, %arg2: memref<1x1024xf32, #tpu.memory_space<vmem>>, %arg3: memref<1x1024xf32, #tpu.memory_space<vmem>>, %arg4: memref<1024x512xbf16, #tpu.memory_space<vmem>>, %arg5: memref<1x512xf32, #tpu.memory_space<vmem>>, %arg6: memref<1x512xf32, #tpu.memory_space<vmem>>, %arg7: memref<512x64xbf16, #tpu.memory_space<vmem>>, %arg8: memref<1x64xf32, #tpu.memory_space<vmem>>, %arg9: memref<1x64xf32, #tpu.memory_space<vmem>>, %arg10: memref<64x8xbf16, #tpu.memory_space<vmem>>, %arg11: memref<8x1xf32, #tpu.memory_space<vmem>>, %arg12: memref<8x16xf32, #tpu.memory_space<vmem>>) attributes {dimension_semantics = [], scalar_prefetch = 0 : i64, scratch_operands = 0 : i64, tpu.core_type = #tpu.core_type<tc>} {
    %c0 = arith.constant 0 : index
    %c0_0 = arith.constant 0 : index
    %0 = vector.load %arg0[%c0, %c0_0] : memref<16x1152xbf16, #tpu.memory_space<vmem>>, vector<16x1152xbf16>
    %c0_1 = arith.constant 0 : index
    %c0_2 = arith.constant 0 : index
    %1 = vector.load %arg1[%c0_1, %c0_2] : memref<1152x1024xbf16, #tpu.memory_space<vmem>>, vector<1152x1024xbf16>
    %cst = arith.constant dense<0.000000e+00> : vector<16x1024xf32>
    %2 = tpu.matmul %0, %1, %cst {dimension_numbers = #tpu.dot_dimension_numbers<[1], [0], [0], [1], [0, 0, 1, 1], [], []>} : vector<16x1152xbf16>, vector<1152x1024xbf16>, vector<16x1024xf32> -> vector<16x1024xf32>
    %3 = arith.mulf %2, %2 : vector<16x1024xf32>
    %4 = tpu.concatenate %2, %3 in 1 : vector<16x1024xf32>, vector<16x1024xf32> -> vector<16x2048xf32>
    %cst_3 = arith.constant dense<0.000000e+00> : vector<2048xf32>
    %5 = vector.multi_reduction <add>, %4, %cst_3 [0] : vector<16x2048xf32> to vector<2048xf32>
    %6 = vector.shape_cast %5 : vector<2048xf32> to vector<1x2048xf32>
    %cst_4 = arith.constant 1.600000e+01 : f32
    %7 = vector.broadcast %cst_4 : f32 to vector<1x2048xf32>
    %8 = arith.divf %6, %7 : vector<1x2048xf32>
    %9 = vector.extract_strided_slice %8 {offsets = [0, 0], sizes = [1, 1024], strides = [1, 1]} : vector<1x2048xf32> to vector<1x1024xf32>
    %10 = vector.extract_strided_slice %8 {offsets = [0, 1024], sizes = [1, 1024], strides = [1, 1]} : vector<1x2048xf32> to vector<1x1024xf32>
    %11 = arith.mulf %9, %9 : vector<1x1024xf32>
    %12 = arith.subf %10, %11 : vector<1x1024xf32>
    %cst_5 = arith.constant 0.000000e+00 : f32
    %13 = vector.broadcast %cst_5 : f32 to vector<1x1024xf32>
    %14 = arith.maximumf %12, %13 : vector<1x1024xf32>
    %c0_6 = arith.constant 0 : index
    %c0_7 = arith.constant 0 : index
    %15 = vector.load %arg2[%c0_6, %c0_7] : memref<1x1024xf32, #tpu.memory_space<vmem>>, vector<1x1024xf32>
    %cst_8 = arith.constant 9.99999974E-6 : f32
    %16 = vector.broadcast %cst_8 : f32 to vector<1x1024xf32>
    %17 = arith.addf %14, %16 : vector<1x1024xf32>
    %18 = math.rsqrt %17 : vector<1x1024xf32>
    %19 = arith.mulf %15, %18 : vector<1x1024xf32>
    %c0_9 = arith.constant 0 : index
    %c0_10 = arith.constant 0 : index
    %20 = vector.load %arg3[%c0_9, %c0_10] : memref<1x1024xf32, #tpu.memory_space<vmem>>, vector<1x1024xf32>
    %21 = arith.mulf %9, %19 : vector<1x1024xf32>
    %22 = arith.subf %20, %21 : vector<1x1024xf32>
    %23 = vector.broadcast %19 : vector<1x1024xf32> to vector<16x1024xf32>
    %24 = arith.mulf %2, %23 : vector<16x1024xf32>
    %25 = vector.broadcast %22 : vector<1x1024xf32> to vector<16x1024xf32>
    %26 = arith.addf %24, %25 : vector<16x1024xf32>
    %cst_11 = arith.constant 0.000000e+00 : f32
    %27 = vector.broadcast %cst_11 : f32 to vector<16x1024xf32>
    %28 = arith.maximumf %26, %27 : vector<16x1024xf32>
    %29 = arith.truncf %28 : vector<16x1024xf32> to vector<16x1024xbf16>
    %c0_12 = arith.constant 0 : index
    %c0_13 = arith.constant 0 : index
    %30 = vector.load %arg4[%c0_12, %c0_13] : memref<1024x512xbf16, #tpu.memory_space<vmem>>, vector<1024x512xbf16>
    %cst_14 = arith.constant dense<0.000000e+00> : vector<16x512xf32>
    %31 = tpu.matmul %29, %30, %cst_14 {dimension_numbers = #tpu.dot_dimension_numbers<[1], [0], [0], [1], [0, 0, 1, 1], [], []>} : vector<16x1024xbf16>, vector<1024x512xbf16>, vector<16x512xf32> -> vector<16x512xf32>
    %32 = arith.mulf %31, %31 : vector<16x512xf32>
    %33 = tpu.concatenate %31, %32 in 1 : vector<16x512xf32>, vector<16x512xf32> -> vector<16x1024xf32>
    %cst_15 = arith.constant dense<0.000000e+00> : vector<1024xf32>
    %34 = vector.multi_reduction <add>, %33, %cst_15 [0] : vector<16x1024xf32> to vector<1024xf32>
    %35 = vector.shape_cast %34 : vector<1024xf32> to vector<1x1024xf32>
    %cst_16 = arith.constant 1.600000e+01 : f32
    %36 = vector.broadcast %cst_16 : f32 to vector<1x1024xf32>
    %37 = arith.divf %35, %36 : vector<1x1024xf32>
    %38 = vector.extract_strided_slice %37 {offsets = [0, 0], sizes = [1, 512], strides = [1, 1]} : vector<1x1024xf32> to vector<1x512xf32>
    %39 = vector.extract_strided_slice %37 {offsets = [0, 512], sizes = [1, 512], strides = [1, 1]} : vector<1x1024xf32> to vector<1x512xf32>
    %40 = arith.mulf %38, %38 : vector<1x512xf32>
    %41 = arith.subf %39, %40 : vector<1x512xf32>
    %cst_17 = arith.constant 0.000000e+00 : f32
    %42 = vector.broadcast %cst_17 : f32 to vector<1x512xf32>
    %43 = arith.maximumf %41, %42 : vector<1x512xf32>
    %c0_18 = arith.constant 0 : index
    %c0_19 = arith.constant 0 : index
    %44 = vector.load %arg5[%c0_18, %c0_19] : memref<1x512xf32, #tpu.memory_space<vmem>>, vector<1x512xf32>
    %cst_20 = arith.constant 9.99999974E-6 : f32
    %45 = vector.broadcast %cst_20 : f32 to vector<1x512xf32>
    %46 = arith.addf %43, %45 : vector<1x512xf32>
    %47 = math.rsqrt %46 : vector<1x512xf32>
    %48 = arith.mulf %44, %47 : vector<1x512xf32>
    %c0_21 = arith.constant 0 : index
    %c0_22 = arith.constant 0 : index
    %49 = vector.load %arg6[%c0_21, %c0_22] : memref<1x512xf32, #tpu.memory_space<vmem>>, vector<1x512xf32>
    %50 = arith.mulf %38, %48 : vector<1x512xf32>
    %51 = arith.subf %49, %50 : vector<1x512xf32>
    %52 = vector.broadcast %48 : vector<1x512xf32> to vector<16x512xf32>
    %53 = arith.mulf %31, %52 : vector<16x512xf32>
    %54 = vector.broadcast %51 : vector<1x512xf32> to vector<16x512xf32>
    %55 = arith.addf %53, %54 : vector<16x512xf32>
    %cst_23 = arith.constant 0.000000e+00 : f32
    %56 = vector.broadcast %cst_23 : f32 to vector<16x512xf32>
    %57 = arith.maximumf %55, %56 : vector<16x512xf32>
    %58 = arith.truncf %57 : vector<16x512xf32> to vector<16x512xbf16>
    %c0_24 = arith.constant 0 : index
    %c0_25 = arith.constant 0 : index
    %59 = vector.load %arg7[%c0_24, %c0_25] : memref<512x64xbf16, #tpu.memory_space<vmem>>, vector<512x64xbf16>
    %cst_26 = arith.constant dense<0.000000e+00> : vector<16x64xf32>
    %60 = tpu.matmul %58, %59, %cst_26 {dimension_numbers = #tpu.dot_dimension_numbers<[1], [0], [0], [1], [0, 0, 1, 1], [], []>} : vector<16x512xbf16>, vector<512x64xbf16>, vector<16x64xf32> -> vector<16x64xf32>
    %61 = arith.mulf %60, %60 : vector<16x64xf32>
    %62 = tpu.concatenate %60, %61 in 1 : vector<16x64xf32>, vector<16x64xf32> -> vector<16x128xf32>
    %cst_27 = arith.constant dense<0.000000e+00> : vector<128xf32>
    %63 = vector.multi_reduction <add>, %62, %cst_27 [0] : vector<16x128xf32> to vector<128xf32>
    %64 = vector.shape_cast %63 : vector<128xf32> to vector<1x128xf32>
    %cst_28 = arith.constant 1.600000e+01 : f32
    %65 = vector.broadcast %cst_28 : f32 to vector<1x128xf32>
    %66 = arith.divf %64, %65 : vector<1x128xf32>
    %67 = vector.extract_strided_slice %66 {offsets = [0, 0], sizes = [1, 64], strides = [1, 1]} : vector<1x128xf32> to vector<1x64xf32>
    %68 = vector.extract_strided_slice %66 {offsets = [0, 64], sizes = [1, 64], strides = [1, 1]} : vector<1x128xf32> to vector<1x64xf32>
    %69 = arith.mulf %67, %67 : vector<1x64xf32>
    %70 = arith.subf %68, %69 : vector<1x64xf32>
    %cst_29 = arith.constant 0.000000e+00 : f32
    %71 = vector.broadcast %cst_29 : f32 to vector<1x64xf32>
    %72 = arith.maximumf %70, %71 : vector<1x64xf32>
    %c0_30 = arith.constant 0 : index
    %c0_31 = arith.constant 0 : index
    %73 = vector.load %arg8[%c0_30, %c0_31] : memref<1x64xf32, #tpu.memory_space<vmem>>, vector<1x64xf32>
    %cst_32 = arith.constant 9.99999974E-6 : f32
    %74 = vector.broadcast %cst_32 : f32 to vector<1x64xf32>
    %75 = arith.addf %72, %74 : vector<1x64xf32>
    %76 = math.rsqrt %75 : vector<1x64xf32>
    %77 = arith.mulf %73, %76 : vector<1x64xf32>
    %c0_33 = arith.constant 0 : index
    %c0_34 = arith.constant 0 : index
    %78 = vector.load %arg9[%c0_33, %c0_34] : memref<1x64xf32, #tpu.memory_space<vmem>>, vector<1x64xf32>
    %79 = arith.mulf %67, %77 : vector<1x64xf32>
    %80 = arith.subf %78, %79 : vector<1x64xf32>
    %81 = vector.broadcast %77 : vector<1x64xf32> to vector<16x64xf32>
    %82 = arith.mulf %60, %81 : vector<16x64xf32>
    %83 = vector.broadcast %80 : vector<1x64xf32> to vector<16x64xf32>
    %84 = arith.addf %82, %83 : vector<16x64xf32>
    %cst_35 = arith.constant 0.000000e+00 : f32
    %85 = vector.broadcast %cst_35 : f32 to vector<16x64xf32>
    %86 = arith.maximumf %84, %85 : vector<16x64xf32>
    %87 = arith.truncf %86 : vector<16x64xf32> to vector<16x64xbf16>
    %c0_36 = arith.constant 0 : index
    %c0_37 = arith.constant 0 : index
    %88 = vector.load %arg10[%c0_36, %c0_37] : memref<64x8xbf16, #tpu.memory_space<vmem>>, vector<64x8xbf16>
    %cst_38 = arith.constant dense<0.000000e+00> : vector<8x16xf32>
    %89 = tpu.matmul %88, %87, %cst_38 {dimension_numbers = #tpu.dot_dimension_numbers<[0], [1], [1], [0], [0, 1, 1, 0], [], []>} : vector<64x8xbf16>, vector<16x64xbf16>, vector<8x16xf32> -> vector<8x16xf32>
    %c0_39 = arith.constant 0 : index
    %c0_40 = arith.constant 0 : index
    %90 = vector.load %arg11[%c0_39, %c0_40] : memref<8x1xf32, #tpu.memory_space<vmem>>, vector<8x1xf32>
    %91 = vector.broadcast %90 : vector<8x1xf32> to vector<8x16xf32>
    %92 = arith.addf %89, %91 : vector<8x16xf32>
    %c0_41 = arith.constant 0 : index
    %c0_42 = arith.constant 0 : index
    %93 = vector.load %arg12[%c0_41, %c0_42] : memref<8x16xf32, #tpu.memory_space<vmem>>, vector<8x16xf32>
    tpu.vector_store %arg12[%c0_41, %c0_42], %92 {strides = array<i32>} : memref<8x16xf32, #tpu.memory_space<vmem>>, vector<8x16xf32>,
    return
  }
}

</mosaic_0001>

<bundles_post_ra>
// kernel: tpu_custom_call.1
= control target key start
LH: loop header
LB: loop body
LE: loop exit
PB: predicated region body
PF: predicated region fallthrough
CT: control target
= control target key end

     0   :  { %17 = vsyncpa [#allocation3], 0  ;;  %s10121_s0 = inlined_call_operand.hbm [shape: bf16[16,1152], index: 0, kind: input, shape index: {}]   ;;  %s10122_s1 = inlined_call_operand.hbm [shape: bf16[1152,1024], index: 1, kind: input, shape index: {}]   ;;  %s10123_s2 = inlined_call_operand.hbm [shape: f32[1,1024], index: 2, kind: input, shape index: {}]   ;;  %s10124_s3 = inlined_call_operand.hbm [shape: f32[1,1024], index: 3, kind: input, shape index: {}]   ;;  %s10125_s4 = inlined_call_operand.hbm [shape: bf16[1024,512], index: 4, kind: input, shape index: {}]   ;;  %s10126_s5 = inlined_call_operand.hbm [shape: f32[1,512], index: 5, kind: input, shape index: {}]   ;;  %s10127_s6 = inlined_call_operand.hbm [shape: f32[1,512], index: 6, kind: input, shape index: {}]   ;;  %s10128_s7 = inlined_call_operand.vmem [shape: bf16[512,64], index: 7, kind: input, shape index: {}]   ;;  %s10129_s8 = inlined_call_operand.hbm [shape: f32[1,64], index: 8, kind: input, shape index: {}]   ;;  %s10130_s9 = inlined_call_operand.hbm [shape: f32[1,64], index: 9, kind: input, shape index: {}]   ;;  %s10131_s10 = inlined_call_operand.vmem [shape: bf16[64,8], index: 10, kind: input, shape index: {}]   ;;  %s10132_s11 = inlined_call_operand.vmem [shape: f32[8,1], index: 11, kind: input, shape index: {}]   ;;  %s10133_s12 = inlined_call_operand.hbm [shape: f32[8,16], index: 12, kind: output, shape index: {}]  }
   0x1   :  { %18 = vsyncpa [#allocation6], 0 }
   0x2   :  { %19 = vsyncpa [#allocation9], 0 }
   0x3   :  { %20 = vsyncpa [#allocation12], 0 }
   0x4   :  { %21 = vsyncpa [#allocation15], 0 }
   0x5   :  { %22 = vsyncpa [#allocation4], 0  ;;  %s9356_s21 = smov [#allocation5]   ;;  %s9124_s25 = scalar_lea.hbm %s10122_s1, 73728 }
   0x6   :  { %s40_s22 = sshll.u32 %s9356_s21, 4  ;;  %p9125_p0 = scmp.ne.s32.totalorder %s10122_s1, %s9124_s25  ;;  %s41_s22 = int_to_ptr.vmem [resolvable:$true] %s40_s22 }
   0x7   :  { %p9128_p1 = scmp.lt.u32.totalorder %s9124_s25, %s10122_s1 }
   0x9   :  { %p9130_p2 = pnand %p9128_p1, %p9125_p0 }
   0xb   :  { %9133 = shalt.err (!%p9130_p2)
}
   0xc   :  { %s9134_s30 = scalar_lea.vmem %s41_s22, 73728  ;;  %p9139_p4 = scmp.lt.s32.totalorder %s41_s22, %s41_s22 }
   0xd   :  { %p9135_p3 = scmp.ne.s32.totalorder %s41_s22, %s9134_s30  ;;  %p9140_p5 = scmp.lt.s32.totalorder %s9134_s30, %s9134_s30 }
   0xf   :  { %p9141_p6 = por %p9140_p5, %p9139_p4 }
  0x11   :  { %p9142_p7 = pnand %p9141_p6, %p9135_p3 }
  0x13   :  { %9145 = shalt.err (!%p9142_p7)
}
  0x14   :  { %s9357_s13 = smov 512   ;;  %s9358_s14 = smov 32  }
  0x15   :  { %46 = dma.hbm_to_vmem [thread:$0]  %s10122_s1, 73728, %s41_s22, [#allocation6], %s9357_s13, %s9357_s13, %s9358_s14  }
  0x16   :  { %s9359_s17 = smov [#allocation8]   ;;  %s9360_s19 = smov [#allocation11]  }
  0x17   :  { %s63_s18 = sshll.u32 %s9359_s17, 4  ;;  %s85_s20 = sshll.u32 %s9360_s19, 4  ;;  %s64_s18 = int_to_ptr.vmem [resolvable:$true] %s63_s18  ;;  %s86_s20 = int_to_ptr.vmem [resolvable:$true] %s85_s20 }
  0x18   :  { %s9146_s24 = scalar_lea.hbm %s10124_s3, 128 }
  0x19   :  { %p9147_p8 = scmp.ne.s32.totalorder %s10124_s3, %s9146_s24  ;;  %p9150_p9 = scmp.lt.u32.totalorder %s9146_s24, %s10124_s3 }
  0x1b   :  { %p9152_p10 = pnand %p9150_p9, %p9147_p8 }
  0x1d   :  { %9155 = shalt.err (!%p9152_p10)
}
  0x1e   :  { %s9156_s1 = scalar_lea.vmem %s64_s18, 128  ;;  %p9161_p12 = scmp.lt.s32.totalorder %s64_s18, %s64_s18 }
  0x1f   :  { %p9157_p11 = scmp.ne.s32.totalorder %s64_s18, %s9156_s1  ;;  %p9162_p13 = scmp.lt.s32.totalorder %s9156_s1, %s9156_s1 }
  0x21   :  { %p9163_p0 = por %p9162_p13, %p9161_p12 }
  0x23   :  { %p9164_p1 = pnand %p9163_p0, %p9157_p11 }
  0x25   :  { %9167 = shalt.err (!%p9164_p1)
}
  0x26   :  { %66 = dma.hbm_to_vmem [thread:$0]  %s10124_s3, 128, %s64_s18, [#allocation9]  }
  0x27   :  { %s9168_s14 = scalar_lea.hbm %s10126_s5, 64 }
  0x28   :  { %p9169_p2 = scmp.ne.s32.totalorder %s10126_s5, %s9168_s14  ;;  %p9172_p3 = scmp.lt.u32.totalorder %s9168_s14, %s10126_s5 }
  0x2a   :  { %p9174_p4 = pnand %p9172_p3, %p9169_p2 }
  0x2c   :  { %9177 = shalt.err (!%p9174_p4)
}
  0x2d   :  { %s9178_s21 = scalar_lea.vmem %s86_s20, 64  ;;  %p9183_p6 = scmp.lt.s32.totalorder %s86_s20, %s86_s20 }
  0x2e   :  { %p9179_p5 = scmp.ne.s32.totalorder %s86_s20, %s9178_s21  ;;  %p9184_p7 = scmp.lt.s32.totalorder %s9178_s21, %s9178_s21 }
  0x30   :  { %p9185_p8 = por %p9184_p7, %p9183_p6 }
  0x32   :  { %p9186_p9 = pnand %p9185_p8, %p9179_p5 }
  0x34   :  { %9189 = shalt.err (!%p9186_p9)
}
  0x35   :  { %88 = dma.hbm_to_vmem [thread:$0]  %s10126_s5, 64, %s86_s20, [#allocation12]  }
  0x36   :  { %s9361_s23 = smov [#allocation14]   ;;  %s9362_s25 = smov [#allocation2]  }
  0x37   :  { %s107_s24 = sshll.u32 %s9361_s23, 4  ;;  %s28_s26 = sshll.u32 %s9362_s25, 4  ;;  %s108_s24 = int_to_ptr.vmem [resolvable:$true] %s107_s24  ;;  %s29_s26 = int_to_ptr.vmem [resolvable:$true] %s28_s26 }
  0x38   :  { %s9190_s1 = scalar_lea.hbm %s10129_s8, 16 }
  0x39   :  { %p9191_p10 = scmp.ne.s32.totalorder %s10129_s8, %s9190_s1  ;;  %p9194_p11 = scmp.lt.u32.totalorder %s9190_s1, %s10129_s8 }
  0x3b   :  { %p9196_p12 = pnand %p9194_p11, %p9191_p10 }
  0x3d   :  { %9199 = shalt.err (!%p9196_p12)
}
  0x3e   :  { %s9200_s5 = scalar_lea.vmem %s108_s24, 16  ;;  %s9204_s20 = scalar_lea.vmem %s108_s24, 32 }
  0x3f   :  { %p9201_p13 = scmp.ne.s32.totalorder %s108_s24, %s9200_s5  ;;  %p9205_p0 = scmp.lt.s32.totalorder %s108_s24, %s108_s24 }
  0x40   :  { %p9206_p1 = scmp.lt.s32.totalorder %s9204_s20, %s9200_s5 }
  0x42   :  { %p9207_p2 = por %p9206_p1, %p9205_p0 }
  0x44   :  { %p9208_p3 = pnand %p9207_p2, %p9201_p13 }
  0x46   :  { %9211 = shalt.err (!%p9208_p3)
}
  0x47   :  { %110 = dma.hbm_to_vmem [thread:$0]  %s10129_s8, 16, %s108_s24, [#allocation15]  }
  0x48   :  { %s9212_s19 = scalar_lea.hbm %s10121_s0, 1152 }
  0x49   :  { %p9213_p4 = scmp.ne.s32.totalorder %s10121_s0, %s9212_s19  ;;  %p9216_p5 = scmp.lt.u32.totalorder %s9212_s19, %s10121_s0 }
  0x4b   :  { %p9218_p6 = pnand %p9216_p5, %p9213_p4 }
  0x4d   :  { %9221 = shalt.err (!%p9218_p6)
}
  0x4e   :  { %s9222_s25 = scalar_lea.vmem %s29_s26, 1152  ;;  %p9227_p8 = scmp.lt.s32.totalorder %s29_s26, %s29_s26 }
  0x4f   :  { %p9223_p7 = scmp.ne.s32.totalorder %s29_s26, %s9222_s25  ;;  %p9228_p9 = scmp.lt.s32.totalorder %s9222_s25, %s9222_s25 }
  0x51   :  { %p9229_p10 = por %p9228_p9, %p9227_p8 }
  0x53   :  { %p9230_p11 = pnand %p9229_p10, %p9223_p7 }
  0x55   :  { %9233 = shalt.err (!%p9230_p11)
}
  0x56   :  { %s9363_s8 = smov 576   ;;  %s9364_s24 = smov 36  }
  0x57   :  { %34 = dma.hbm_to_vmem [thread:$0]  %s10121_s0, 1152, %s29_s26, [#allocation3], %s9363_s8, %s9363_s8, %s9364_s24  }
  0x58   :  { %s9365_s1 = smov [#allocation7]   ;;  %s9366_s29 = smov [#allocation10]  }
  0x59   :  { %s53_s22 = sshll.u32 %s9365_s1, 4  ;;  %s72_s30 = sshll.u32 %s9366_s29, 4  ;;  %s54_s22 = int_to_ptr.vmem [resolvable:$true] %s53_s22  ;;  %s73_s30 = int_to_ptr.vmem [resolvable:$true] %s72_s30 }
  0x5a   :  { %s9234_s20 = scalar_lea.hbm %s10123_s2, 128 }
  0x5b   :  { %p9235_p12 = scmp.ne.s32.totalorder %s10123_s2, %s9234_s20  ;;  %p9238_p13 = scmp.lt.u32.totalorder %s9234_s20, %s10123_s2 }
  0x5d   :  { %p9240_p0 = pnand %p9238_p13, %p9235_p12 }
  0x5f   :  { %9243 = shalt.err (!%p9240_p0)
}
  0x60   :  { %s9244_s0 = scalar_lea.vmem %s54_s22, 128  ;;  %p9249_p2 = scmp.lt.s32.totalorder %s54_s22, %s54_s22 }
  0x61   :  { %p9245_p1 = scmp.ne.s32.totalorder %s54_s22, %s9244_s0  ;;  %p9250_p3 = scmp.lt.s32.totalorder %s9244_s0, %s9244_s0 }
  0x63   :  { %p9251_p4 = por %p9250_p3, %p9249_p2 }
  0x65   :  { %p9252_p5 = pnand %p9251_p4, %p9245_p1 }
  0x67   :  { %9255 = shalt.err (!%p9252_p5)
}
  0x68   :  { %56 = dma.hbm_to_vmem [thread:$0]  %s10123_s2, 128, %s54_s22, [#allocation6]  }
  0x69   :  { %s9256_s18 = scalar_lea.hbm %s10125_s4, 32768 }
  0x6a   :  { %p9257_p6 = scmp.ne.s32.totalorder %s10125_s4, %s9256_s18  ;;  %p9260_p7 = scmp.lt.u32.totalorder %s9256_s18, %s10125_s4 }
  0x6c   :  { %p9262_p8 = pnand %p9260_p7, %p9257_p6 }
  0x6e   :  { %9265 = shalt.err (!%p9262_p8)
}
  0x6f   :  { %s9266_s27 = scalar_lea.vmem %s73_s30, 32768  ;;  %p9271_p10 = scmp.lt.s32.totalorder %s73_s30, %s73_s30 }
  0x70   :  { %p9267_p9 = scmp.ne.s32.totalorder %s73_s30, %s9266_s27  ;;  %p9272_p11 = scmp.lt.s32.totalorder %s9266_s27, %s9266_s27 }
  0x72   :  { %p9273_p12 = por %p9272_p11, %p9271_p10 }
  0x74   :  { %p9274_p13 = pnand %p9273_p12, %p9267_p9 }
  0x76   :  { %9277 = shalt.err (!%p9274_p13)
}
  0x77   :  { %s9367_s2 = smov 256   ;;  %s9368_s28 = smov 16  }
  0x78   :  { %78 = dma.hbm_to_vmem [thread:$0]  %s10125_s4, 32768, %s73_s30, [#allocation9], %s9367_s2, %s9367_s2, %s9368_s28  }
  0x79   :  { %s9369_s29 = smov [#allocation13]   ;;  %s9370_s5 = smov [#allocation16]  }
  0x7a   :  { %s95_s13 = sshll.u32 %s9369_s29, 4  ;;  %s117_s20 = sshll.u32 %s9370_s5, 4  ;;  %s96_s13 = int_to_ptr.vmem [resolvable:$true] %s95_s13  ;;  %s118_s20 = int_to_ptr.vmem [resolvable:$true] %s117_s20 }
  0x7b   :  { %s9278_s16 = scalar_lea.hbm %s10127_s6, 64 }
  0x7c   :  { %p9279_p0 = scmp.ne.s32.totalorder %s10127_s6, %s9278_s16  ;;  %p9282_p1 = scmp.lt.u32.totalorder %s9278_s16, %s10127_s6 }
  0x7e   :  { %p9284_p2 = pnand %p9282_p1, %p9279_p0 }
  0x80   :  { %9287 = shalt.err (!%p9284_p2)
}
  0x81   :  { %s9288_s4 = scalar_lea.vmem %s96_s13, 64  ;;  %p9293_p4 = scmp.lt.s32.totalorder %s96_s13, %s96_s13 }
  0x82   :  { %p9289_p3 = scmp.ne.s32.totalorder %s96_s13, %s9288_s4  ;;  %p9294_p5 = scmp.lt.s32.totalorder %s9288_s4, %s9288_s4 }
  0x84   :  { %p9295_p6 = por %p9294_p5, %p9293_p4 }
  0x86   :  { %p9296_p7 = pnand %p9295_p6, %p9289_p3 }
  0x88   :  { %9299 = shalt.err (!%p9296_p7)
}
  0x89   :  { %98 = dma.hbm_to_vmem [thread:$0]  %s10127_s6, 64, %s96_s13, [#allocation12]  }
  0x8a   :  { %s9300_s23 = scalar_lea.hbm %s10130_s9, 16 }
  0x8b   :  { %p9301_p8 = scmp.ne.s32.totalorder %s10130_s9, %s9300_s23  ;;  %p9304_p9 = scmp.lt.u32.totalorder %s9300_s23, %s10130_s9 }
  0x8d   :  { %p9306_p10 = pnand %p9304_p9, %p9301_p8 }
  0x8f   :  { %9309 = shalt.err (!%p9306_p10)
}
  0x90   :  { %s9310_s2 = scalar_lea.vmem %s118_s20, 16  ;;  %s9314_s28 = scalar_lea.vmem %s118_s20, 32 }
  0x91   :  { %p9311_p11 = scmp.ne.s32.totalorder %s118_s20, %s9310_s2  ;;  %p9315_p12 = scmp.lt.s32.totalorder %s118_s20, %s118_s20 }
  0x92   :  { %p9316_p13 = scmp.lt.s32.totalorder %s9314_s28, %s9310_s2 }
  0x94   :  { %p9317_p0 = por %p9316_p13, %p9315_p12 }
  0x96   :  { %p9318_p1 = pnand %p9317_p0, %p9311_p11 }
  0x98   :  { %9321 = shalt.err (!%p9318_p1)
}
  0x99   :  { %120 = dma.hbm_to_vmem [thread:$0]  %s10130_s9, 16, %s118_s20, [#allocation15]  }
  0x9a   :  { %9344 = dma.done.wait [#allocation3], 1152  }
  0x9b   :  { %9345 = vsyncadd [#allocation3], 4294966144 }
  0x9c   :  { %9346 = dma.done.wait [#allocation6], 73856  }
  0x9d   :  { %9347 = vsyncadd [#allocation6], 4294893440 }
  0x9e   :  { %9348 = dma.done.wait [#allocation9], 32896  }
  0x9f   :  { %9349 = vsyncadd [#allocation9], 4294934400 }
  0xa0   :  { %9350 = dma.done.wait [#allocation12], 128  }
  0xa1   :  { %9351 = vsyncadd [#allocation12], 4294967168 }
  0xa2   :  { %9352 = dma.done.wait [#allocation15], 32  }
  0xa3   :  { %9353 = vsyncadd [#allocation15], 4294967264  ;;  %v163_v0 = vld [vmem:[#allocation5] sm:$0xff]  ;;  %v164_v2 = vld [vmem:[#allocation5 + $0x8] sm:$0xff]  ;;  %vm7432_vm0 = vcmask 523264   ;;  %vm9375_vm1 = vmmov 0  }
  0xa4   :  { %v167_v1 = vld [vmem:[#allocation5 + $0x20] sm:$0xff]  ;;  %v168_v4 = vld [vmem:[#allocation5 + $0x28] sm:$0xff]  ;;  %vm7594_vm2 = vcmask 130048  }
  0xa5   :  { %v7625_v3 = vcombine.high %v163_v0, %v167_v1  ;;  %v7624_v5 = vcombine.low %v163_v0, %v167_v1  ;;  %v171_v6 = vld [vmem:[#allocation5 + $0x40] sm:$0xff]  ;;  %v7627_v8 = vcombine.high %v164_v2, %v168_v4  ;;  %v7626_v9 = vcombine.low %v164_v2, %v168_v4  ;;  %v172_v11 = vld [vmem:[#allocation5 + $0x48] sm:$0xff] }
  0xa6   :  { %v175_v7 = vld [vmem:[#allocation5 + $0x60] sm:$0xff]  ;;  %v176_v12 = vld [vmem:[#allocation5 + $0x68] sm:$0xff] }
  0xa7   :  { %v7633_v10 = vcombine.high %v171_v6, %v175_v7  ;;  %v179_v13 = vld [vmem:[#allocation5 + $0x80] sm:$0xff]  ;;  %3665 = vmatprep.subr.bf16.mxu0 %v7625_v3  ;;  %v7635_v14 = vcombine.high %v172_v11, %v176_v12  ;;  %v180_v16 = vld [vmem:[#allocation5 + $0x88] sm:$0xff]  ;;  %3880 = vmatprep.subr.bf16.mxu1 %v7627_v8  ;;  %v7632_v18 = vcombine.low %v171_v6, %v175_v7 }
  0xa8   :  { %v183_v15 = vld [vmem:[#allocation5 + $0xa0] sm:$0xff]  ;;  %v184_v17 = vld [vmem:[#allocation5 + $0xa8] sm:$0xff]  ;;  %3666 = vmatpush1.bf16.msra.mxu0 %v7624_v5  ;;  %3881 = vmatpush1.bf16.msra.mxu1 %v7626_v9  ;;  %v7634_v19 = vcombine.low %v172_v11, %v176_v12 }
  0xa9   :  { %3667 = vmatprep.subr.bf16.mxu0 %v7633_v10  ;;  %v7641_v20 = vcombine.high %v179_v13, %v183_v15  ;;  %3882 = vmatprep.subr.bf16.mxu1 %v7635_v14  ;;  %v7643_v21 = vcombine.high %v180_v16, %v184_v17  ;;  %v187_v22 = vld [vmem:[#allocation5 + $0xc0] sm:$0xff]  ;;  %v188_v24 = vld [vmem:[#allocation5 + $0xc8] sm:$0xff]  ;;  %v7640_v26 = vcombine.low %v179_v13, %v183_v15 }
  0xaa   :  { %v191_v23 = vld [vmem:[#allocation5 + $0xe0] sm:$0xff]  ;;  %v192_v25 = vld [vmem:[#allocation5 + $0xe8] sm:$0xff]  ;;  %v7642_v27 = vcombine.low %v180_v16, %v184_v17 }
  0xab   :  { %v7649_v28 = vcombine.high %v187_v22, %v191_v23  ;;  %v7651_v29 = vcombine.high %v188_v24, %v192_v25  ;;  %v195_v30 = vld [vmem:[#allocation5 + $0x100] sm:$0xff]  ;;  %v196_v32 = vld [vmem:[#allocation5 + $0x108] sm:$0xff]  ;;  %v7648_v34 = vcombine.low %v187_v22, %v191_v23  ;;  %v7650_v35 = vcombine.low %v188_v24, %v192_v25 }
  0xac   :  { %3668 = vmatpush1.bf16.msra.mxu0 %v7632_v18  ;;  %3883 = vmatpush1.bf16.msra.mxu1 %v7634_v19  ;;  %v199_v31 = vld [vmem:[#allocation5 + $0x120] sm:$0xff]  ;;  %v200_v33 = vld [vmem:[#allocation5 + $0x128] sm:$0xff] }
  0xad   :  { %3669 = vmatprep.subr.bf16.mxu0 %v7641_v20  ;;  %3884 = vmatprep.subr.bf16.mxu1 %v7643_v21  ;;  %v7657_v36 = vcombine.high %v195_v30, %v199_v31  ;;  %v7659_v37 = vcombine.high %v196_v32, %v200_v33  ;;  %v203_v38 = vld [vmem:[#allocation5 + $0x140] sm:$0xff]  ;;  %v204_v40 = vld [vmem:[#allocation5 + $0x148] sm:$0xff]  ;;  %v7656_v42 = vcombine.low %v195_v30, %v199_v31 }
  0xae   :  { %v207_v39 = vld [vmem:[#allocation5 + $0x160] sm:$0xff]  ;;  %v208_v41 = vld [vmem:[#allocation5 + $0x168] sm:$0xff]  ;;  %v7658_v43 = vcombine.low %v196_v32, %v200_v33 }
  0xaf   :  { %v7665_v44 = vcombine.high %v203_v38, %v207_v39  ;;  %v7667_v45 = vcombine.high %v204_v40, %v208_v41  ;;  %v211_v46 = vld [vmem:[#allocation5 + $0x180] sm:$0xff]  ;;  %v212_v48 = vld [vmem:[#allocation5 + $0x188] sm:$0xff]  ;;  %v7664_v50 = vcombine.low %v203_v38, %v207_v39  ;;  %v7666_v51 = vcombine.low %v204_v40, %v208_v41 }
  0xb0   :  { %3670 = vmatpush1.bf16.msra.mxu0 %v7640_v26  ;;  %3885 = vmatpush1.bf16.msra.mxu1 %v7642_v27  ;;  %v215_v47 = vld [vmem:[#allocation5 + $0x1a0] sm:$0xff]  ;;  %v216_v49 = vld [vmem:[#allocation5 + $0x1a8] sm:$0xff] }
  0xb1   :  { %3671 = vmatprep.subr.bf16.mxu0 %v7649_v28  ;;  %3886 = vmatprep.subr.bf16.mxu1 %v7651_v29  ;;  %v7673_v52 = vcombine.high %v211_v46, %v215_v47  ;;  %v7675_v53 = vcombine.high %v212_v48, %v216_v49  ;;  %v219_v54 = vld [vmem:[#allocation5 + $0x1c0] sm:$0xff]  ;;  %v220_v57 = vld [vmem:[#allocation5 + $0x1c8] sm:$0xff]  ;;  %v7672_v59 = vcombine.low %v211_v46, %v215_v47 }
  0xb2   :  { %v223_v55 = vld [vmem:[#allocation5 + $0x1e0] sm:$0xff]  ;;  %v224_v58 = vld [vmem:[#allocation5 + $0x1e8] sm:$0xff]  ;;  %v7674_v60 = vcombine.low %v212_v48, %v216_v49 }
  0xb3   :  { %v8656_v56 = vld [vmem:[#allocation2 + $0x4] ss:$36 sps:$4 sm:$0xff]   ;;  %v7681_v61 = vcombine.high %v219_v54, %v223_v55  ;;  %v7683_v62 = vcombine.high %v220_v57, %v224_v58  ;;  %v228_v1 = vld [vmem:[#allocation5 + $0x208] sm:$0xff]  ;;  %v7680_v3 = vcombine.low %v219_v54, %v223_v55  ;;  %v7682_v4 = vcombine.low %v220_v57, %v224_v58 }
  0xb4   :  { %3672 = vmatpush1.bf16.msra.mxu0 %v7648_v34  ;;  %3887 = vmatpush1.bf16.msra.mxu1 %v7650_v35  ;;  %v227_v63 = vld [vmem:[#allocation5 + $0x200] sm:$0xff]  ;;  %v232_v2 = vld [vmem:[#allocation5 + $0x228] sm:$0xff] }
  0xb5   :  { %3673 = vmatprep.subr.bf16.mxu0 %v7657_v36  ;;  %3888 = vmatprep.subr.bf16.mxu1 %v7659_v37  ;;  %v231_v0 = vld [vmem:[#allocation5 + $0x220] sm:$0xff]  ;;  %v7691_v6 = vcombine.high %v228_v1, %v232_v2  ;;  %v236_v9 = vld [vmem:[#allocation5 + $0x248] sm:$0xff]  ;;  %v7690_v12 = vcombine.low %v228_v1, %v232_v2 }
  0xb6   :  { %3697 = vmatprep.mubr.bf16.mxu0 %v8656_v56  ;;  %3912 = vmatprep.mubr.bf16.mxu1 %v8656_v56  ;;  %v7689_v5 = vcombine.high %v227_v63, %v231_v0  ;;  %v235_v7 = vld [vmem:[#allocation5 + $0x240] sm:$0xff]  ;;  %v240_v10 = vld [vmem:[#allocation5 + $0x268] sm:$0xff]  ;;  %v7688_v11 = vcombine.low %v227_v63, %v231_v0 }
  0xb7   :  { %v239_v8 = vld [vmem:[#allocation5 + $0x260] sm:$0xff]  ;;  %v7699_v14 = vcombine.high %v236_v9, %v240_v10  ;;  %v244_v17 = vld [vmem:[#allocation5 + $0x288] sm:$0xff]  ;;  %v7698_v20 = vcombine.low %v236_v9, %v240_v10  ;;  %v8658_v9 = vld [vmem:[#allocation2] ss:$36 sps:$4 sm:$0xff]  }
  0xb8   :  { %3674 = vmatpush1.bf16.msra.mxu0 %v7656_v42  ;;  %3889 = vmatpush1.bf16.msra.mxu1 %v7658_v43  ;;  %v7697_v13 = vcombine.high %v235_v7, %v239_v8  ;;  %v243_v15 = vld [vmem:[#allocation5 + $0x280] sm:$0xff]  ;;  %v248_v18 = vld [vmem:[#allocation5 + $0x2a8] sm:$0xff]  ;;  %v7696_v19 = vcombine.low %v235_v7, %v239_v8 }
  0xb9   :  { %3675 = vmatprep.subr.bf16.mxu0 %v7665_v44  ;;  %3890 = vmatprep.subr.bf16.mxu1 %v7667_v45  ;;  %v247_v16 = vld [vmem:[#allocation5 + $0x2a0] sm:$0xff]  ;;  %v7707_v22 = vcombine.high %v244_v17, %v248_v18  ;;  %v252_v25 = vld [vmem:[#allocation5 + $0x2c8] sm:$0xff]  ;;  %v7706_v28 = vcombine.low %v244_v17, %v248_v18 }
  0xba   :  { %v7705_v21 = vcombine.high %v243_v15, %v247_v16  ;;  %v251_v23 = vld [vmem:[#allocation5 + $0x2c0] sm:$0xff]  ;;  %v256_v26 = vld [vmem:[#allocation5 + $0x2e8] sm:$0xff]  ;;  %v7704_v27 = vcombine.low %v243_v15, %v247_v16 }
  0xbb   :  { %v255_v24 = vld [vmem:[#allocation5 + $0x2e0] sm:$0xff]  ;;  %v7715_v30 = vcombine.high %v252_v25, %v256_v26  ;;  %v260_v33 = vld [vmem:[#allocation5 + $0x308] sm:$0xff]  ;;  %v7714_v36 = vcombine.low %v252_v25, %v256_v26 }
  0xbc   :  { %3676 = vmatpush1.bf16.msra.mxu0 %v7664_v50  ;;  %3891 = vmatpush1.bf16.msra.mxu1 %v7666_v51  ;;  %v7713_v29 = vcombine.high %v251_v23, %v255_v24  ;;  %v259_v31 = vld [vmem:[#allocation5 + $0x300] sm:$0xff]  ;;  %v264_v34 = vld [vmem:[#allocation5 + $0x328] sm:$0xff]  ;;  %v7712_v35 = vcombine.low %v251_v23, %v255_v24 }
  0xbd   :  { %3677 = vmatprep.subr.bf16.mxu0 %v7673_v52  ;;  %3892 = vmatprep.subr.bf16.mxu1 %v7675_v53  ;;  %v263_v32 = vld [vmem:[#allocation5 + $0x320] sm:$0xff]  ;;  %v7723_v38 = vcombine.high %v260_v33, %v264_v34  ;;  %v268_v41 = vld [vmem:[#allocation5 + $0x348] sm:$0xff]  ;;  %v7722_v44 = vcombine.low %v260_v33, %v264_v34 }
  0xbe   :  { %v7721_v37 = vcombine.high %v259_v31, %v263_v32  ;;  %v267_v39 = vld [vmem:[#allocation5 + $0x340] sm:$0xff]  ;;  %v272_v42 = vld [vmem:[#allocation5 + $0x368] sm:$0xff]  ;;  %v7720_v43 = vcombine.low %v259_v31, %v263_v32 }
  0xbf   :  { %v271_v40 = vld [vmem:[#allocation5 + $0x360] sm:$0xff]  ;;  %v7731_v46 = vcombine.high %v268_v41, %v272_v42  ;;  %v276_v49 = vld [vmem:[#allocation5 + $0x388] sm:$0xff]  ;;  %v7730_v52 = vcombine.low %v268_v41, %v272_v42 }
  0xc0   :  { %3678 = vmatpush1.bf16.msra.mxu0 %v7672_v59  ;;  %3893 = vmatpush1.bf16.msra.mxu1 %v7674_v60  ;;  %v7729_v45 = vcombine.high %v267_v39, %v271_v40  ;;  %v275_v47 = vld [vmem:[#allocation5 + $0x380] sm:$0xff]  ;;  %v280_v50 = vld [vmem:[#allocation5 + $0x3a8] sm:$0xff]  ;;  %v7728_v51 = vcombine.low %v267_v39, %v271_v40 }
  0xc1   :  { %3679 = vmatprep.subr.bf16.mxu0 %v7681_v61  ;;  %3894 = vmatprep.subr.bf16.mxu1 %v7683_v62  ;;  %v279_v48 = vld [vmem:[#allocation5 + $0x3a0] sm:$0xff]  ;;  %v7739_v54 = vcombine.high %v276_v49, %v280_v50  ;;  %v284_v57 = vld [vmem:[#allocation5 + $0x3c8] sm:$0xff]  ;;  %v7738_v60 = vcombine.low %v276_v49, %v280_v50 }
  0xc2   :  { %v7737_v53 = vcombine.high %v275_v47, %v279_v48  ;;  %v283_v55 = vld [vmem:[#allocation5 + $0x3c0] sm:$0xff]  ;;  %v288_v58 = vld [vmem:[#allocation5 + $0x3e8] sm:$0xff]  ;;  %v7736_v59 = vcombine.low %v275_v47, %v279_v48 }
  0xc3   :  { %v287_v56 = vld [vmem:[#allocation5 + $0x3e0] sm:$0xff]  ;;  %v7747_v62 = vcombine.high %v284_v57, %v288_v58  ;;  %v292_v1 = vld [vmem:[#allocation5 + $0x408] sm:$0xff] }
  0xc4   :  { %3680 = vmatpush1.bf16.msra.mxu0 %v7680_v3  ;;  %3895 = vmatpush1.bf16.msra.mxu1 %v7682_v4  ;;  %v7745_v61 = vcombine.high %v283_v55, %v287_v56  ;;  %v291_v63 = vld [vmem:[#allocation5 + $0x400] sm:$0xff]  ;;  %v296_v2 = vld [vmem:[#allocation5 + $0x428] sm:$0xff]  ;;  %v7744_v3 = vcombine.low %v283_v55, %v287_v56  ;;  %v7746_v4 = vcombine.low %v284_v57, %v288_v58 }
  0xc5   :  { %3681 = vmatprep.subr.bf16.mxu0 %v7689_v5  ;;  %3896 = vmatprep.subr.bf16.mxu1 %v7691_v6  ;;  %v295_v0 = vld [vmem:[#allocation5 + $0x420] sm:$0xff]  ;;  %v7755_v6 = vcombine.high %v292_v1, %v296_v2  ;;  %v300_v10 = vld [vmem:[#allocation5 + $0x448] sm:$0xff] }
  0xc6   :  { %v7753_v5 = vcombine.high %v291_v63, %v295_v0  ;;  %v299_v7 = vld [vmem:[#allocation5 + $0x440] sm:$0xff]  ;;  %v324_v34 = vld [vmem:[#allocation5 + $0x508] sm:$0xff] }
  0xc7   :  { %v303_v8 = vld [vmem:[#allocation5 + $0x460] sm:$0xff]  ;;  %v332_v42 = vld [vmem:[#allocation5 + $0x548] sm:$0xff] }
  0xc8   :  { %3682 = vmatpush1.bf16.msra.mxu0 %v7688_v11  ;;  %3897 = vmatpush1.bf16.msra.mxu1 %v7690_v12  ;;  %v304_v11 = vld [vmem:[#allocation5 + $0x468] sm:$0xff]  ;;  %v7752_v12 = vcombine.low %v291_v63, %v295_v0  ;;  %v307_v15 = vld [vmem:[#allocation5 + $0x480] sm:$0xff] }
  0xc9   :  { %3683 = vmatprep.subr.bf16.mxu0 %v7697_v13  ;;  %3898 = vmatprep.subr.bf16.mxu1 %v7699_v14  ;;  %v7754_v13 = vcombine.low %v292_v1, %v296_v2  ;;  %v7761_v14 = vcombine.high %v299_v7, %v303_v8  ;;  %v7763_v16 = vcombine.high %v300_v10, %v304_v11  ;;  %v311_v17 = vld [vmem:[#allocation5 + $0x4a0] sm:$0xff]  ;;  %v340_v50 = vld [vmem:[#allocation5 + $0x588] sm:$0xff] }
  0xca   :  { %v8659_v18 = vld [vmem:[#allocation2 + $0xc] ss:$36 sps:$4 sm:$0xff]   ;;  %v7769_v23 = vcombine.high %v307_v15, %v311_v17 }
  0xcb   :  { %v315_v24 = vld [vmem:[#allocation5 + $0x4c0] sm:$0xff]  ;;  %v348_v58 = vld [vmem:[#allocation5 + $0x5c8] sm:$0xff] }
  0xcc   :  { %3684 = vmatpush1.bf16.msra.mxu0 %v7696_v19  ;;  %3899 = vmatpush1.bf16.msra.mxu1 %v7698_v20  ;;  %v308_v19 = vld [vmem:[#allocation5 + $0x488] sm:$0xff]  ;;  %v319_v25 = vld [vmem:[#allocation5 + $0x4e0] sm:$0xff] }
  0xcd   :  { %3685 = vmatprep.subr.bf16.mxu0 %v7705_v21  ;;  %3900 = vmatprep.subr.bf16.mxu1 %v7707_v22  ;;  %v312_v20 = vld [vmem:[#allocation5 + $0x4a8] sm:$0xff]  ;;  %v7760_v21 = vcombine.low %v299_v7, %v303_v8  ;;  %v7762_v22 = vcombine.low %v300_v10, %v304_v11  ;;  %v7777_v31 = vcombine.high %v315_v24, %v319_v25  ;;  %v323_v32 = vld [vmem:[#allocation5 + $0x500] sm:$0xff] }
  0xce   :  { %v7771_v26 = vcombine.high %v308_v19, %v312_v20  ;;  %v327_v33 = vld [vmem:[#allocation5 + $0x520] sm:$0xff]  ;;  %v356_v2 = vld [vmem:[#allocation5 + $0x608] sm:$0xff] }
  0xcf   :  { %v7785_v39 = vcombine.high %v323_v32, %v327_v33  ;;  %v331_v40 = vld [vmem:[#allocation5 + $0x540] sm:$0xff]  ;;  %v364_v10 = vld [vmem:[#allocation5 + $0x648] sm:$0xff] }
  0xd0   :  { %3686 = vmatpush1.bf16.msra.mxu0 %v7704_v27  ;;  %3901 = vmatpush1.bf16.msra.mxu1 %v7706_v28  ;;  %v316_v27 = vld [vmem:[#allocation5 + $0x4c8] sm:$0xff]  ;;  %v335_v41 = vld [vmem:[#allocation5 + $0x560] sm:$0xff] }
  0xd1   :  { %3687 = vmatprep.subr.bf16.mxu0 %v7713_v29  ;;  %3902 = vmatprep.subr.bf16.mxu1 %v7715_v30  ;;  %v320_v28 = vld [vmem:[#allocation5 + $0x4e8] sm:$0xff]  ;;  %v7768_v29 = vcombine.low %v307_v15, %v311_v17  ;;  %v7770_v30 = vcombine.low %v308_v19, %v312_v20  ;;  %v7793_v47 = vcombine.high %v331_v40, %v335_v41  ;;  %v339_v48 = vld [vmem:[#allocation5 + $0x580] sm:$0xff] }
  0xd2   :  { %v343_v49 = vld [vmem:[#allocation5 + $0x5a0] sm:$0xff]  ;;  %v376_v20 = vld [vmem:[#allocation5 + $0x6a8] sm:$0xff] }
  0xd3   :  { %v7801_v55 = vcombine.high %v339_v48, %v343_v49  ;;  %v347_v56 = vld [vmem:[#allocation5 + $0x5c0] sm:$0xff] }
  0xd4   :  { %3688 = vmatpush1.bf16.msra.mxu0 %v7712_v35  ;;  %3903 = vmatpush1.bf16.msra.mxu1 %v7714_v36  ;;  %v7779_v35 = vcombine.high %v316_v27, %v320_v28  ;;  %v328_v36 = vld [vmem:[#allocation5 + $0x528] sm:$0xff]  ;;  %v351_v57 = vld [vmem:[#allocation5 + $0x5e0] sm:$0xff] }
  0xd5   :  { %3689 = vmatprep.subr.bf16.mxu0 %v7721_v37  ;;  %3904 = vmatprep.subr.bf16.mxu1 %v7723_v38  ;;  %v7776_v37 = vcombine.low %v315_v24, %v319_v25  ;;  %v7778_v38 = vcombine.low %v316_v27, %v320_v28  ;;  %v7809_v63 = vcombine.high %v347_v56, %v351_v57  ;;  %v355_v0 = vld [vmem:[#allocation5 + $0x600] sm:$0xff]  ;;  %v384_v28 = vld [vmem:[#allocation5 + $0x6e8] sm:$0xff] }
  0xd6   :  { %v359_v1 = vld [vmem:[#allocation5 + $0x620] sm:$0xff] }
  0xd7   :  { %v7817_v7 = vcombine.high %v355_v0, %v359_v1  ;;  %v363_v8 = vld [vmem:[#allocation5 + $0x640] sm:$0xff] }
  0xd8   :  { %3690 = vmatpush1.bf16.msra.mxu0 %v7720_v43  ;;  %3905 = vmatpush1.bf16.msra.mxu1 %v7722_v44  ;;  %v7787_v43 = vcombine.high %v324_v34, %v328_v36  ;;  %v336_v44 = vld [vmem:[#allocation5 + $0x568] sm:$0xff]  ;;  %v375_v17 = vld [vmem:[#allocation5 + $0x6a0] sm:$0xff] }
  0xd9   :  { %3691 = vmatprep.subr.bf16.mxu0 %v7729_v45  ;;  %3906 = vmatprep.subr.bf16.mxu1 %v7731_v46  ;;  %v7784_v45 = vcombine.low %v323_v32, %v327_v33  ;;  %v7786_v46 = vcombine.low %v324_v34, %v328_v36  ;;  %v379_v24 = vld [vmem:[#allocation5 + $0x6c0] sm:$0xff]  ;;  %v388_v34 = vld [vmem:[#allocation5 + $0x708] sm:$0xff] }
  0xda   :  { %v383_v25 = vld [vmem:[#allocation5 + $0x6e0] sm:$0xff]  ;;  %v392_v36 = vld [vmem:[#allocation5 + $0x728] sm:$0xff] }
  0xdb   :  { %v387_v32 = vld [vmem:[#allocation5 + $0x700] sm:$0xff] }
  0xdc   :  { %3692 = vmatpush1.bf16.msra.mxu0 %v7728_v51  ;;  %3907 = vmatpush1.bf16.msra.mxu1 %v7730_v52  ;;  %v7795_v51 = vcombine.high %v332_v42, %v336_v44  ;;  %v344_v52 = vld [vmem:[#allocation5 + $0x5a8] sm:$0xff]  ;;  %v391_v33 = vld [vmem:[#allocation5 + $0x720] sm:$0xff] }
  0xdd   :  { %3693 = vmatprep.subr.bf16.mxu0 %v7737_v53  ;;  %3908 = vmatprep.subr.bf16.mxu1 %v7739_v54  ;;  %v7792_v53 = vcombine.low %v331_v40, %v335_v41  ;;  %v7794_v54 = vcombine.low %v332_v42, %v336_v44  ;;  %v395_v40 = vld [vmem:[#allocation5 + $0x740] sm:$0xff]  ;;  %v396_v42 = vld [vmem:[#allocation5 + $0x748] sm:$0xff] }
  0xde   :  { %v399_v41 = vld [vmem:[#allocation5 + $0x760] sm:$0xff]  ;;  %v400_v44 = vld [vmem:[#allocation5 + $0x768] sm:$0xff] }
  0xe0   :  { %3694 = vmatpush1.bf16.msra.mxu0 %v7736_v59  ;;  %3909 = vmatpush1.bf16.msra.mxu1 %v7738_v60  ;;  %v7803_v59 = vcombine.high %v340_v50, %v344_v52  ;;  %v352_v60 = vld [vmem:[#allocation5 + $0x5e8] sm:$0xff] }
  0xe1   :  { %3695 = vmatprep.subr.bf16.mxu0 %v7745_v61  ;;  %3910 = vmatprep.subr.bf16.mxu1 %v7747_v62  ;;  %v7800_v61 = vcombine.low %v339_v48, %v343_v49  ;;  %v7802_v62 = vcombine.low %v340_v50, %v344_v52  ;;  %v403_v48 = vld [vmem:[#allocation5 + $0x780] sm:$0xff]  ;;  %v404_v50 = vld [vmem:[#allocation5 + $0x788] sm:$0xff] }
  0xe2   :  { %v407_v49 = vld [vmem:[#allocation5 + $0x7a0] sm:$0xff]  ;;  %v408_v52 = vld [vmem:[#allocation5 + $0x7a8] sm:$0xff] }
  0xe4   :  { %3696 = vmatpush1.bf16.msra.mxu0 %v7744_v3  ;;  %3911 = vmatpush1.bf16.msra.mxu1 %v7746_v4  ;;  %v7811_v3 = vcombine.high %v348_v58, %v352_v60  ;;  %v360_v4 = vld [vmem:[#allocation5 + $0x628] sm:$0xff] }
  0xe5   :  { %3708 = vmatprep.subr.bf16.mxu0 %v7753_v5  ;;  %3923 = vmatprep.subr.bf16.mxu1 %v7755_v6  ;;  %v7808_v5 = vcombine.low %v347_v56, %v351_v57  ;;  %v7810_v6 = vcombine.low %v348_v58, %v352_v60  ;;  %v7819_v11 = vcombine.high %v356_v2, %v360_v4  ;;  %v411_v56 = vld [vmem:[#allocation5 + $0x7c0] sm:$0xff]  ;;  %v412_v58 = vld [vmem:[#allocation5 + $0x7c8] sm:$0xff] }
  0xe6   :  { %v415_v57 = vld [vmem:[#allocation5 + $0x7e0] sm:$0xff]  ;;  %v416_v60 = vld [vmem:[#allocation5 + $0x7e8] sm:$0xff] }
  0xe7   :  { %3698 = vmatmul.mubr.bf16.vlgmr.msra.gmra.mrb[0].mxu0 %v8658_v9  ;;  %3913 = vmatmul.mubr.bf16.vlgmr.msra.gmra.mrb[0].mxu1 %v8658_v9  ;;  %v367_v9 = vld [vmem:[#allocation5 + $0x660] sm:$0xff] }
  0xe8   :  { %3709 = vmatpush1.bf16.msra.mxu0 %v7752_v12  ;;  %3924 = vmatpush1.bf16.msra.mxu1 %v7754_v13  ;;  %v368_v12 = vld [vmem:[#allocation5 + $0x668] sm:$0xff]  ;;  %v7816_v13 = vcombine.low %v355_v0, %v359_v1  ;;  %v7825_v15 = vcombine.high %v363_v8, %v367_v9  ;;  %v419_v0 = vld [vmem:[#allocation5 + $0x800] sm:$0xff] }
  0xe9   :  { %3710 = vmatprep.subr.bf16.mxu0 %v7761_v14  ;;  %3925 = vmatprep.subr.bf16.mxu1 %v7763_v16  ;;  %v7818_v14 = vcombine.low %v356_v2, %v360_v4  ;;  %v371_v16 = vld [vmem:[#allocation5 + $0x680] sm:$0xff]  ;;  %v7827_v19 = vcombine.high %v364_v10, %v368_v12  ;;  %v420_v2 = vld [vmem:[#allocation5 + $0x808] sm:$0xff] }
  0xea   :  { %3740 = vmatprep.mubr.bf16.mxu0 %v8659_v18  ;;  %3955 = vmatprep.mubr.bf16.mxu1 %v8659_v18  ;;  %v372_v18 = vld [vmem:[#allocation5 + $0x688] sm:$0xff]  ;;  %v423_v1 = vld [vmem:[#allocation5 + $0x820] sm:$0xff] }
  0xeb   :  { %v7835_v27 = vcombine.high %v372_v18, %v376_v20  ;;  %v424_v4 = vld [vmem:[#allocation5 + $0x828] sm:$0xff] }
  0xec   :  { %3711 = vmatpush1.bf16.msra.mxu0 %v7760_v21  ;;  %3926 = vmatpush1.bf16.msra.mxu1 %v7762_v22  ;;  %v7824_v21 = vcombine.low %v363_v8, %v367_v9  ;;  %v7826_v22 = vcombine.low %v364_v10, %v368_v12  ;;  %v8661_v8 = vld [vmem:[#allocation2 + $0x8] ss:$36 sps:$4 sm:$0xff]   ;;  %v7883_v12 = vcombine.high %v420_v2, %v424_v4 }
  0xed   :  { %3712 = vmatprep.subr.bf16.mxu0 %v7769_v23  ;;  %3927 = vmatprep.subr.bf16.mxu1 %v7771_v26  ;;  %v7833_v23 = vcombine.high %v371_v16, %v375_v17  ;;  %v380_v26 = vld [vmem:[#allocation5 + $0x6c8] sm:$0xff]  ;;  %v427_v9 = vld [vmem:[#allocation5 + $0x840] sm:$0xff] }
  0xee   :  { %v431_v10 = vld [vmem:[#allocation5 + $0x860] sm:$0xff] }
  0xf0   :  { %3713 = vmatpush1.bf16.msra.mxu0 %v7768_v29  ;;  %3928 = vmatpush1.bf16.msra.mxu1 %v7770_v30  ;;  %v7832_v29 = vcombine.low %v371_v16, %v375_v17  ;;  %v7834_v30 = vcombine.low %v372_v18, %v376_v20  ;;  %v7889_v16 = vcombine.high %v427_v9, %v431_v10  ;;  %v435_v17 = vld [vmem:[#allocation5 + $0x880] sm:$0xff]  ;;  %v436_v20 = vld [vmem:[#allocation5 + $0x888] sm:$0xff] }
  0xf1   :  { %3714 = vmatprep.subr.bf16.mxu0 %v7777_v31  ;;  %3929 = vmatprep.subr.bf16.mxu1 %v7779_v35  ;;  %v7841_v31 = vcombine.high %v379_v24, %v383_v25  ;;  %v7843_v35 = vcombine.high %v380_v26, %v384_v28  ;;  %v439_v18 = vld [vmem:[#allocation5 + $0x8a0] sm:$0xff] }
  0xf4   :  { %3715 = vmatpush1.bf16.msra.mxu0 %v7776_v37  ;;  %3930 = vmatpush1.bf16.msra.mxu1 %v7778_v38  ;;  %v7840_v37 = vcombine.low %v379_v24, %v383_v25  ;;  %v7842_v38 = vcombine.low %v380_v26, %v384_v28  ;;  %v7897_v25 = vcombine.high %v435_v17, %v439_v18  ;;  %v443_v26 = vld [vmem:[#allocation5 + $0x8c0] sm:$0xff]  ;;  %v444_v28 = vld [vmem:[#allocation5 + $0x8c8] sm:$0xff] }
  0xf5   :  { %3716 = vmatprep.subr.bf16.mxu0 %v7785_v39  ;;  %3931 = vmatprep.subr.bf16.mxu1 %v7787_v43  ;;  %v7849_v39 = vcombine.high %v387_v32, %v391_v33  ;;  %v7851_v43 = vcombine.high %v388_v34, %v392_v36 }
  0xf8   :  { %3717 = vmatpush1.bf16.msra.mxu0 %v7784_v45  ;;  %3932 = vmatpush1.bf16.msra.mxu1 %v7786_v46  ;;  %v7848_v45 = vcombine.low %v387_v32, %v391_v33  ;;  %v7850_v46 = vcombine.low %v388_v34, %v392_v36  ;;  %v451_v34 = vld [vmem:[#allocation5 + $0x900] sm:$0xff]  ;;  %v452_v36 = vld [vmem:[#allocation5 + $0x908] sm:$0xff] }
  0xf9   :  { %3718 = vmatprep.subr.bf16.mxu0 %v7793_v47  ;;  %3933 = vmatprep.subr.bf16.mxu1 %v7795_v51  ;;  %v7857_v47 = vcombine.high %v395_v40, %v399_v41  ;;  %v7859_v51 = vcombine.high %v396_v42, %v400_v44 }
  0xfc   :  { %3719 = vmatpush1.bf16.msra.mxu0 %v7792_v53  ;;  %3934 = vmatpush1.bf16.msra.mxu1 %v7794_v54  ;;  %v7856_v53 = vcombine.low %v395_v40, %v399_v41  ;;  %v7858_v54 = vcombine.low %v396_v42, %v400_v44  ;;  %v459_v42 = vld [vmem:[#allocation5 + $0x940] sm:$0xff]  ;;  %v460_v44 = vld [vmem:[#allocation5 + $0x948] sm:$0xff] }
  0xfd   :  { %3720 = vmatprep.subr.bf16.mxu0 %v7801_v55  ;;  %3935 = vmatprep.subr.bf16.mxu1 %v7803_v59  ;;  %v7865_v55 = vcombine.high %v403_v48, %v407_v49  ;;  %v7867_v59 = vcombine.high %v404_v50, %v408_v52 }
 0x100   :  { %3721 = vmatpush1.bf16.msra.mxu0 %v7800_v61  ;;  %3936 = vmatpush1.bf16.msra.mxu1 %v7802_v62  ;;  %v7864_v61 = vcombine.low %v403_v48, %v407_v49  ;;  %v7866_v62 = vcombine.low %v404_v50, %v408_v52  ;;  %v467_v50 = vld [vmem:[#allocation5 + $0x980] sm:$0xff]  ;;  %v468_v52 = vld [vmem:[#allocation5 + $0x988] sm:$0xff] }
 0x101   :  { %3722 = vmatprep.subr.bf16.mxu0 %v7809_v63  ;;  %3937 = vmatprep.subr.bf16.mxu1 %v7811_v3  ;;  %v7873_v63 = vcombine.high %v411_v56, %v415_v57  ;;  %v7875_v3 = vcombine.high %v412_v58, %v416_v60 }
 0x104   :  { %3723 = vmatpush1.bf16.msra.mxu0 %v7808_v5  ;;  %3938 = vmatpush1.bf16.msra.mxu1 %v7810_v6  ;;  %v7872_v5 = vcombine.low %v411_v56, %v415_v57  ;;  %v7874_v6 = vcombine.low %v412_v58, %v416_v60  ;;  %v475_v58 = vld [vmem:[#allocation5 + $0x9c0] sm:$0xff]  ;;  %v476_v60 = vld [vmem:[#allocation5 + $0x9c8] sm:$0xff] }
 0x105   :  { %3724 = vmatprep.subr.bf16.mxu0 %v7817_v7  ;;  %3939 = vmatprep.subr.bf16.mxu1 %v7819_v11  ;;  %v7881_v7 = vcombine.high %v419_v0, %v423_v1  ;;  %v428_v11 = vld [vmem:[#allocation5 + $0x848] sm:$0xff] }
 0x108   :  { %3725 = vmatpush1.bf16.msra.mxu0 %v7816_v13  ;;  %3940 = vmatpush1.bf16.msra.mxu1 %v7818_v14  ;;  %v432_v13 = vld [vmem:[#allocation5 + $0x868] sm:$0xff]  ;;  %v7880_v14 = vcombine.low %v419_v0, %v423_v1 }
 0x109   :  { %3726 = vmatprep.subr.bf16.mxu0 %v7825_v15  ;;  %3941 = vmatprep.subr.bf16.mxu1 %v7827_v19  ;;  %v7882_v15 = vcombine.low %v420_v2, %v424_v4  ;;  %v7891_v19 = vcombine.high %v428_v11, %v432_v13  ;;  %v7890_v24 = vcombine.low %v428_v11, %v432_v13  ;;  %v483_v2 = vld [vmem:[#allocation5 + $0xa00] sm:$0xff]  ;;  %v484_v4 = vld [vmem:[#allocation5 + $0xa08] sm:$0xff] }
 0x10a   :  { %v495_v11 = vld [vmem:[#allocation5 + $0xa60] sm:$0xff] }
 0x10c   :  { %3727 = vmatpush1.bf16.msra.mxu0 %v7824_v21  ;;  %3942 = vmatpush1.bf16.msra.mxu1 %v7826_v22  ;;  %v440_v21 = vld [vmem:[#allocation5 + $0x8a8] sm:$0xff] }
 0x10d   :  { %3728 = vmatprep.subr.bf16.mxu0 %v7833_v23  ;;  %3943 = vmatprep.subr.bf16.mxu1 %v7835_v27  ;;  %v8662_v22 = vld [vmem:[#allocation2 + $0x14] ss:$36 sps:$4 sm:$0xff]   ;;  %v7888_v23 = vcombine.low %v427_v9, %v431_v10  ;;  %v447_v27 = vld [vmem:[#allocation5 + $0x8e0] sm:$0xff]  ;;  %v7898_v32 = vcombine.low %v436_v20, %v440_v21 }
 0x10e   :  { %v7905_v33 = vcombine.high %v443_v26, %v447_v27  ;;  %v491_v10 = vld [vmem:[#allocation5 + $0xa40] sm:$0xff] }
 0x110   :  { %3729 = vmatpush1.bf16.msra.mxu0 %v7832_v29  ;;  %3944 = vmatpush1.bf16.msra.mxu1 %v7834_v30  ;;  %v7899_v29 = vcombine.high %v436_v20, %v440_v21  ;;  %v448_v30 = vld [vmem:[#allocation5 + $0x8e8] sm:$0xff] }
 0x111   :  { %3730 = vmatprep.subr.bf16.mxu0 %v7841_v31  ;;  %3945 = vmatprep.subr.bf16.mxu1 %v7843_v35  ;;  %v7896_v31 = vcombine.low %v435_v17, %v439_v18  ;;  %v455_v35 = vld [vmem:[#allocation5 + $0x920] sm:$0xff]  ;;  %v7906_v40 = vcombine.low %v444_v28, %v448_v30  ;;  %v7953_v17 = vcombine.high %v491_v10, %v495_v11  ;;  %v500_v21 = vld [vmem:[#allocation5 + $0xa88] sm:$0xff] }
 0x112   :  { %v7913_v41 = vcombine.high %v451_v34, %v455_v35  ;;  %v499_v18 = vld [vmem:[#allocation5 + $0xa80] sm:$0xff] }
 0x114   :  { %3731 = vmatpush1.bf16.msra.mxu0 %v7840_v37  ;;  %3946 = vmatpush1.bf16.msra.mxu1 %v7842_v38  ;;  %v7907_v37 = vcombine.high %v444_v28, %v448_v30  ;;  %v456_v38 = vld [vmem:[#allocation5 + $0x928] sm:$0xff]  ;;  %v511_v28 = vld [vmem:[#allocation5 + $0xae0] sm:$0xff] }
 0x115   :  { %3732 = vmatprep.subr.bf16.mxu0 %v7849_v39  ;;  %3947 = vmatprep.subr.bf16.mxu1 %v7851_v43  ;;  %v7904_v39 = vcombine.low %v443_v26, %v447_v27  ;;  %v463_v43 = vld [vmem:[#allocation5 + $0x960] sm:$0xff]  ;;  %v7914_v48 = vcombine.low %v452_v36, %v456_v38 }
 0x116   :  { %v7921_v49 = vcombine.high %v459_v42, %v463_v43  ;;  %v507_v27 = vld [vmem:[#allocation5 + $0xac0] sm:$0xff] }
 0x118   :  { %3733 = vmatpush1.bf16.msra.mxu0 %v7848_v45  ;;  %3948 = vmatpush1.bf16.msra.mxu1 %v7850_v46  ;;  %v7915_v45 = vcombine.high %v452_v36, %v456_v38  ;;  %v464_v46 = vld [vmem:[#allocation5 + $0x968] sm:$0xff]  ;;  %v519_v36 = vld [vmem:[#allocation5 + $0xb20] sm:$0xff] }
 0x119   :  { %3734 = vmatprep.subr.bf16.mxu0 %v7857_v47  ;;  %3949 = vmatprep.subr.bf16.mxu1 %v7859_v51  ;;  %v7912_v47 = vcombine.low %v451_v34, %v455_v35  ;;  %v471_v51 = vld [vmem:[#allocation5 + $0x9a0] sm:$0xff]  ;;  %v7922_v56 = vcombine.low %v460_v44, %v464_v46  ;;  %v7969_v34 = vcombine.high %v507_v27, %v511_v28 }
 0x11a   :  { %v7929_v57 = vcombine.high %v467_v50, %v471_v51  ;;  %v515_v35 = vld [vmem:[#allocation5 + $0xb00] sm:$0xff] }
 0x11c   :  { %3735 = vmatpush1.bf16.msra.mxu0 %v7856_v53  ;;  %3950 = vmatpush1.bf16.msra.mxu1 %v7858_v54  ;;  %v7923_v53 = vcombine.high %v460_v44, %v464_v46  ;;  %v472_v54 = vld [vmem:[#allocation5 + $0x9a8] sm:$0xff]  ;;  %v527_v44 = vld [vmem:[#allocation5 + $0xb60] sm:$0xff] }
 0x11d   :  { %3736 = vmatprep.subr.bf16.mxu0 %v7865_v55  ;;  %3951 = vmatprep.subr.bf16.mxu1 %v7867_v59  ;;  %v7920_v55 = vcombine.low %v459_v42, %v463_v43  ;;  %v479_v59 = vld [vmem:[#allocation5 + $0x9e0] sm:$0xff]  ;;  %v7930_v0 = vcombine.low %v468_v52, %v472_v54  ;;  %v7977_v42 = vcombine.high %v515_v35, %v519_v36 }
 0x11e   :  { %v7937_v1 = vcombine.high %v475_v58, %v479_v59  ;;  %v523_v43 = vld [vmem:[#allocation5 + $0xb40] sm:$0xff] }
 0x120   :  { %3737 = vmatpush1.bf16.msra.mxu0 %v7864_v61  ;;  %3952 = vmatpush1.bf16.msra.mxu1 %v7866_v62  ;;  %v7931_v61 = vcombine.high %v468_v52, %v472_v54  ;;  %v480_v62 = vld [vmem:[#allocation5 + $0x9e8] sm:$0xff]  ;;  %v535_v52 = vld [vmem:[#allocation5 + $0xba0] sm:$0xff] }
 0x121   :  { %3738 = vmatprep.subr.bf16.mxu0 %v7873_v63  ;;  %3953 = vmatprep.subr.bf16.mxu1 %v7875_v3  ;;  %v7928_v63 = vcombine.low %v467_v50, %v471_v51  ;;  %v487_v3 = vld [vmem:[#allocation5 + $0xa20] sm:$0xff]  ;;  %v7985_v50 = vcombine.high %v523_v43, %v527_v44 }
 0x122   :  { %v7945_v9 = vcombine.high %v483_v2, %v487_v3  ;;  %v531_v51 = vld [vmem:[#allocation5 + $0xb80] sm:$0xff] }
 0x124   :  { %3739 = vmatpush1.bf16.msra.mxu0 %v7872_v5  ;;  %3954 = vmatpush1.bf16.msra.mxu1 %v7874_v6  ;;  %v7939_v5 = vcombine.high %v476_v60, %v480_v62  ;;  %v488_v6 = vld [vmem:[#allocation5 + $0xa28] sm:$0xff] }
 0x125   :  { %3751 = vmatprep.subr.bf16.mxu0 %v7881_v7  ;;  %3966 = vmatprep.subr.bf16.mxu1 %v7883_v12  ;;  %v7936_v7 = vcombine.low %v475_v58, %v479_v59  ;;  %v492_v12 = vld [vmem:[#allocation5 + $0xa48] sm:$0xff]  ;;  %v7947_v13 = vcombine.high %v484_v4, %v488_v6  ;;  %v7993_v58 = vcombine.high %v531_v51, %v535_v52  ;;  %v539_v59 = vld [vmem:[#allocation5 + $0xbc0] sm:$0xff] }
 0x127   :  { %3741 = vmatmul.mubr.bf16.vlgmr.msra.gmra.mrb[0].mxu0 %v8661_v8  ;;  %3956 = vmatmul.mubr.bf16.vlgmr.msra.gmra.mrb[0].mxu1 %v8661_v8  ;;  %v7938_v8 = vcombine.low %v476_v60, %v480_v62  ;;  %v543_v60 = vld [vmem:[#allocation5 + $0xbe0] sm:$0xff] }
 0x128   :  { %3752 = vmatpush1.bf16.msra.mxu0 %v7880_v14  ;;  %3967 = vmatpush1.bf16.msra.mxu1 %v7882_v15  ;;  %v496_v14 = vld [vmem:[#allocation5 + $0xa68] sm:$0xff]  ;;  %v7944_v15 = vcombine.low %v483_v2, %v487_v3  ;;  %v8001_v2 = vcombine.high %v539_v59, %v543_v60  ;;  %v547_v3 = vld [vmem:[#allocation5 + $0xc00] sm:$0xff] }
 0x129   :  { %3753 = vmatprep.subr.bf16.mxu0 %v7889_v16  ;;  %3968 = vmatprep.subr.bf16.mxu1 %v7891_v19  ;;  %v7946_v16 = vcombine.low %v484_v4, %v488_v6  ;;  %v503_v19 = vld [vmem:[#allocation5 + $0xaa0] sm:$0xff]  ;;  %v7955_v20 = vcombine.high %v492_v12, %v496_v14 }
 0x12a   :  { %3783 = vmatprep.mubr.bf16.mxu0 %v8662_v22  ;;  %3998 = vmatprep.mubr.bf16.mxu1 %v8662_v22  ;;  %v504_v22 = vld [vmem:[#allocation5 + $0xaa8] sm:$0xff]  ;;  %v7961_v26 = vcombine.high %v499_v18, %v503_v19  ;;  %v551_v4 = vld [vmem:[#allocation5 + $0xc20] sm:$0xff] }
 0x12b   :  { %v7963_v30 = vcombine.high %v500_v21, %v504_v22 }
 0x12c   :  { %3754 = vmatpush1.bf16.msra.mxu0 %v7888_v23  ;;  %3969 = vmatpush1.bf16.msra.mxu1 %v7890_v24  ;;  %v10134_v23 = vmov 0   ;;  %v7952_v24 = vcombine.low %v491_v10, %v495_v11  ;;  %v8009_v10 = vcombine.high %v547_v3, %v551_v4  ;;  %v8664_v11 = vld [vmem:[#allocation2 + $0x10] ss:$36 sps:$4 sm:$0xff]  }
 0x12d   :  { %3755 = vmatprep.subr.bf16.mxu0 %v7897_v25  ;;  %3970 = vmatprep.subr.bf16.mxu1 %v7899_v29  ;;  %v7954_v25 = vcombine.low %v492_v12, %v496_v14  ;;  %v508_v29 = vld [vmem:[#allocation5 + $0xac8] sm:$0xff]  ;;  %v555_v12 = vld [vmem:[#allocation5 + $0xc40] sm:$0xff] }
 0x12e   :  { %8654 = vset.pattern.permute.xlu1 %v10134_v23  ;;  %v556_v14 = vld [vmem:[#allocation5 + $0xc48] sm:$0xff] }
 0x130   :  { %3756 = vmatpush1.bf16.msra.mxu0 %v7896_v31  ;;  %3971 = vmatpush1.bf16.msra.mxu1 %v7898_v32  ;;  %v512_v31 = vld [vmem:[#allocation5 + $0xae8] sm:$0xff]  ;;  %v7960_v32 = vcombine.low %v499_v18, %v503_v19  ;;  %v563_v18 = vld [vmem:[#allocation5 + $0xc80] sm:$0xff] }
 0x131   :  { %3757 = vmatprep.subr.bf16.mxu0 %v7905_v33  ;;  %3972 = vmatprep.subr.bf16.mxu1 %v7907_v37  ;;  %v7962_v33 = vcombine.low %v500_v21, %v504_v22  ;;  %v516_v37 = vld [vmem:[#allocation5 + $0xb08] sm:$0xff]  ;;  %v7971_v38 = vcombine.high %v508_v29, %v512_v31  ;;  %v567_v21 = vld [vmem:[#allocation5 + $0xca0] sm:$0xff] }
 0x132   :  { %v564_v22 = vld [vmem:[#allocation5 + $0xc88] sm:$0xff] }
 0x134   :  { %3758 = vmatpush1.bf16.msra.mxu0 %v7904_v39  ;;  %3973 = vmatpush1.bf16.msra.mxu1 %v7906_v40  ;;  %v520_v39 = vld [vmem:[#allocation5 + $0xb28] sm:$0xff]  ;;  %v7968_v40 = vcombine.low %v507_v27, %v511_v28 }
 0x135   :  { %3759 = vmatprep.subr.bf16.mxu0 %v7913_v41  ;;  %3974 = vmatprep.subr.bf16.mxu1 %v7915_v45  ;;  %v7970_v41 = vcombine.low %v508_v29, %v512_v31  ;;  %v524_v45 = vld [vmem:[#allocation5 + $0xb48] sm:$0xff]  ;;  %v7979_v46 = vcombine.high %v516_v37, %v520_v39  ;;  %v8025_v29 = vcombine.high %v563_v18, %v567_v21  ;;  %v575_v31 = vld [vmem:[#allocation5 + $0xce0] sm:$0xff] }
 0x138   :  { %3760 = vmatpush1.bf16.msra.mxu0 %v7912_v47  ;;  %3975 = vmatpush1.bf16.msra.mxu1 %v7914_v48  ;;  %v528_v47 = vld [vmem:[#allocation5 + $0xb68] sm:$0xff]  ;;  %v7976_v48 = vcombine.low %v515_v35, %v519_v36  ;;  %v8024_v35 = vcombine.low %v563_v18, %v567_v21 }
 0x139   :  { %3761 = vmatprep.subr.bf16.mxu0 %v7921_v49  ;;  %3976 = vmatprep.subr.bf16.mxu1 %v7923_v53  ;;  %v7978_v49 = vcombine.low %v516_v37, %v520_v39  ;;  %v532_v53 = vld [vmem:[#allocation5 + $0xb88] sm:$0xff]  ;;  %v7987_v54 = vcombine.high %v524_v45, %v528_v47  ;;  %v583_v39 = vld [vmem:[#allocation5 + $0xd20] sm:$0xff] }
 0x13a   :  { %v624_v18 = vld [vmem:[#allocation5 + $0xe68] sm:$0xff] }
 0x13c   :  { %3762 = vmatpush1.bf16.msra.mxu0 %v7920_v55  ;;  %3977 = vmatpush1.bf16.msra.mxu1 %v7922_v56  ;;  %v536_v55 = vld [vmem:[#allocation5 + $0xba8] sm:$0xff]  ;;  %v7984_v56 = vcombine.low %v523_v43, %v527_v44 }
 0x13d   :  { %3763 = vmatprep.subr.bf16.mxu0 %v7929_v57  ;;  %3978 = vmatprep.subr.bf16.mxu1 %v7931_v61  ;;  %v7986_v57 = vcombine.low %v524_v45, %v528_v47  ;;  %v540_v61 = vld [vmem:[#allocation5 + $0xbc8] sm:$0xff]  ;;  %v7995_v62 = vcombine.high %v532_v53, %v536_v55  ;;  %v591_v47 = vld [vmem:[#allocation5 + $0xd60] sm:$0xff] }
 0x140   :  { %3764 = vmatpush1.bf16.msra.mxu0 %v7928_v63  ;;  %3979 = vmatpush1.bf16.msra.mxu1 %v7930_v0  ;;  %v544_v63 = vld [vmem:[#allocation5 + $0xbe8] sm:$0xff]  ;;  %v7992_v0 = vcombine.low %v531_v51, %v535_v52 }
 0x141   :  { %3765 = vmatprep.subr.bf16.mxu0 %v7937_v1  ;;  %3980 = vmatprep.subr.bf16.mxu1 %v7939_v5  ;;  %v7994_v1 = vcombine.low %v532_v53, %v536_v55  ;;  %v548_v5 = vld [vmem:[#allocation5 + $0xc08] sm:$0xff]  ;;  %v8003_v6 = vcombine.high %v540_v61, %v544_v63  ;;  %v599_v55 = vld [vmem:[#allocation5 + $0xda0] sm:$0xff] }
 0x144   :  { %3766 = vmatpush1.bf16.msra.mxu0 %v7936_v7  ;;  %3981 = vmatpush1.bf16.msra.mxu1 %v7938_v8  ;;  %v552_v7 = vld [vmem:[#allocation5 + $0xc28] sm:$0xff]  ;;  %v8000_v8 = vcombine.low %v539_v59, %v543_v60 }
 0x145   :  { %3767 = vmatprep.subr.bf16.mxu0 %v7945_v9  ;;  %3982 = vmatprep.subr.bf16.mxu1 %v7947_v13  ;;  %v8002_v9 = vcombine.low %v540_v61, %v544_v63  ;;  %v559_v13 = vld [vmem:[#allocation5 + $0xc60] sm:$0xff]  ;;  %v8010_v19 = vcombine.low %v548_v5, %v552_v7 }
 0x146   :  { %v8016_v27 = vcombine.low %v555_v12, %v559_v13  ;;  %v607_v63 = vld [vmem:[#allocation5 + $0xde0] sm:$0xff] }
 0x148   :  { %3768 = vmatpush1.bf16.msra.mxu0 %v7944_v15  ;;  %3983 = vmatpush1.bf16.msra.mxu1 %v7946_v16  ;;  %v8011_v15 = vcombine.high %v548_v5, %v552_v7  ;;  %v560_v16 = vld [vmem:[#allocation5 + $0xc68] sm:$0xff]  ;;  %v615_v7 = vld [vmem:[#allocation5 + $0xe20] sm:$0xff] }
 0x149   :  { %3769 = vmatprep.subr.bf16.mxu0 %v7953_v17  ;;  %3984 = vmatprep.subr.bf16.mxu1 %v7955_v20  ;;  %v8008_v17 = vcombine.low %v547_v3, %v551_v4  ;;  %v8017_v20 = vcombine.high %v555_v12, %v559_v13  ;;  %v8018_v28 = vcombine.low %v556_v14, %v560_v16 }
 0x14c   :  { %3770 = vmatpush1.bf16.msra.mxu0 %v7952_v24  ;;  %3985 = vmatpush1.bf16.msra.mxu1 %v7954_v25  ;;  %v568_v24 = vld [vmem:[#allocation5 + $0xca8] sm:$0xff]  ;;  %v8019_v25 = vcombine.high %v556_v14, %v560_v16  ;;  %v619_v14 = vld [vmem:[#allocation5 + $0xe40] sm:$0xff] }
 0x14d   :  { %3771 = vmatprep.subr.bf16.mxu0 %v7961_v26  ;;  %3986 = vmatprep.subr.bf16.mxu1 %v7963_v30  ;;  %v8665_v26 = vld [vmem:[#allocation2 + $0x1c] ss:$36 sps:$4 sm:$0xff]   ;;  %v571_v30 = vld [vmem:[#allocation5 + $0xcc0] sm:$0xff]  ;;  %v8026_v36 = vcombine.low %v564_v22, %v568_v24  ;;  %v620_v16 = vld [vmem:[#allocation5 + $0xe48] sm:$0xff] }
 0x14e   :  { %v8033_v37 = vcombine.high %v571_v30, %v575_v31  ;;  %v8032_v43 = vcombine.low %v571_v30, %v575_v31  ;;  %v635_v31 = vld [vmem:[#allocation5 + $0xec0] sm:$0xff] }
 0x150   :  { %3772 = vmatpush1.bf16.msra.mxu0 %v7960_v32  ;;  %3987 = vmatpush1.bf16.msra.mxu1 %v7962_v33  ;;  %v572_v32 = vld [vmem:[#allocation5 + $0xcc8] sm:$0xff]  ;;  %v8027_v33 = vcombine.high %v564_v22, %v568_v24  ;;  %v627_v22 = vld [vmem:[#allocation5 + $0xe80] sm:$0xff] }
 0x151   :  { %3773 = vmatprep.subr.bf16.mxu0 %v7969_v34  ;;  %3988 = vmatprep.subr.bf16.mxu1 %v7971_v38  ;;  %v576_v34 = vld [vmem:[#allocation5 + $0xce8] sm:$0xff]  ;;  %v579_v38 = vld [vmem:[#allocation5 + $0xd00] sm:$0xff] }
 0x152   :  { %v8034_v44 = vcombine.low %v572_v32, %v576_v34  ;;  %v8041_v45 = vcombine.high %v579_v38, %v583_v39  ;;  %v8040_v51 = vcombine.low %v579_v38, %v583_v39  ;;  %v631_v24 = vld [vmem:[#allocation5 + $0xea0] sm:$0xff] }
 0x153   :  { %v8089_v30 = vcombine.high %v627_v22, %v631_v24  ;;  %v643_v39 = vld [vmem:[#allocation5 + $0xf00] sm:$0xff] }
 0x154   :  { %3774 = vmatpush1.bf16.msra.mxu0 %v7968_v40  ;;  %3989 = vmatpush1.bf16.msra.mxu1 %v7970_v41  ;;  %v580_v40 = vld [vmem:[#allocation5 + $0xd08] sm:$0xff]  ;;  %v8035_v41 = vcombine.high %v572_v32, %v576_v34  ;;  %v639_v32 = vld [vmem:[#allocation5 + $0xee0] sm:$0xff] }
 0x155   :  { %3775 = vmatprep.subr.bf16.mxu0 %v7977_v42  ;;  %3990 = vmatprep.subr.bf16.mxu1 %v7979_v46  ;;  %v584_v42 = vld [vmem:[#allocation5 + $0xd28] sm:$0xff]  ;;  %v587_v46 = vld [vmem:[#allocation5 + $0xd40] sm:$0xff]  ;;  %v8097_v38 = vcombine.high %v635_v31, %v639_v32 }
 0x156   :  { %v8042_v52 = vcombine.low %v580_v40, %v584_v42  ;;  %v8049_v53 = vcombine.high %v587_v46, %v591_v47  ;;  %v8048_v59 = vcombine.low %v587_v46, %v591_v47 }
 0x158   :  { %3776 = vmatpush1.bf16.msra.mxu0 %v7976_v48  ;;  %3991 = vmatpush1.bf16.msra.mxu1 %v7978_v49  ;;  %v588_v48 = vld [vmem:[#allocation5 + $0xd48] sm:$0xff]  ;;  %v8043_v49 = vcombine.high %v580_v40, %v584_v42  ;;  %v647_v40 = vld [vmem:[#allocation5 + $0xf20] sm:$0xff] }
 0x159   :  { %3777 = vmatprep.subr.bf16.mxu0 %v7985_v50  ;;  %3992 = vmatprep.subr.bf16.mxu1 %v7987_v54  ;;  %v592_v50 = vld [vmem:[#allocation5 + $0xd68] sm:$0xff]  ;;  %v595_v54 = vld [vmem:[#allocation5 + $0xd80] sm:$0xff]  ;;  %v8105_v46 = vcombine.high %v643_v39, %v647_v40 }
 0x15a   :  { %v8050_v60 = vcombine.low %v588_v48, %v592_v50  ;;  %v8057_v61 = vcombine.high %v595_v54, %v599_v55  ;;  %v8056_v3 = vcombine.low %v595_v54, %v599_v55 }
 0x15c   :  { %3778 = vmatpush1.bf16.msra.mxu0 %v7984_v56  ;;  %3993 = vmatpush1.bf16.msra.mxu1 %v7986_v57  ;;  %v596_v56 = vld [vmem:[#allocation5 + $0xd88] sm:$0xff]  ;;  %v8051_v57 = vcombine.high %v588_v48, %v592_v50  ;;  %v651_v48 = vld [vmem:[#allocation5 + $0xf40] sm:$0xff] }
 0x15d   :  { %3779 = vmatprep.subr.bf16.mxu0 %v7993_v58  ;;  %3994 = vmatprep.subr.bf16.mxu1 %v7995_v62  ;;  %v600_v58 = vld [vmem:[#allocation5 + $0xda8] sm:$0xff]  ;;  %v603_v62 = vld [vmem:[#allocation5 + $0xdc0] sm:$0xff] }
 0x15e   :  { %v8058_v4 = vcombine.low %v596_v56, %v600_v58  ;;  %v8065_v5 = vcombine.high %v603_v62, %v607_v63  ;;  %v652_v50 = vld [vmem:[#allocation5 + $0xf48] sm:$0xff] }
 0x160   :  { %3780 = vmatpush1.bf16.msra.mxu0 %v7992_v0  ;;  %3995 = vmatpush1.bf16.msra.mxu1 %v7994_v1  ;;  %v604_v0 = vld [vmem:[#allocation5 + $0xdc8] sm:$0xff]  ;;  %v8059_v1 = vcombine.high %v596_v56, %v600_v58  ;;  %v659_v56 = vld [vmem:[#allocation5 + $0xf80] sm:$0xff] }
 0x161   :  { %3781 = vmatprep.subr.bf16.mxu0 %v8001_v2  ;;  %3996 = vmatprep.subr.bf16.mxu1 %v8003_v6  ;;  %v608_v2 = vld [vmem:[#allocation5 + $0xde8] sm:$0xff]  ;;  %v611_v6 = vld [vmem:[#allocation5 + $0xe00] sm:$0xff] }
 0x162   :  { %v8066_v12 = vcombine.low %v604_v0, %v608_v2  ;;  %v8073_v13 = vcombine.high %v611_v6, %v615_v7  ;;  %v660_v58 = vld [vmem:[#allocation5 + $0xf88] sm:$0xff] }
 0x164   :  { %3782 = vmatpush1.bf16.msra.mxu0 %v8000_v8  ;;  %3997 = vmatpush1.bf16.msra.mxu1 %v8002_v9  ;;  %v612_v8 = vld [vmem:[#allocation5 + $0xe08] sm:$0xff]  ;;  %v8067_v9 = vcombine.high %v604_v0, %v608_v2  ;;  %v667_v0 = vld [vmem:[#allocation5 + $0xfc0] sm:$0xff] }
 0x165   :  { %3794 = vmatprep.subr.bf16.mxu0 %v8009_v10  ;;  %4009 = vmatprep.subr.bf16.mxu1 %v8011_v15  ;;  %v616_v10 = vld [vmem:[#allocation5 + $0xe28] sm:$0xff]  ;;  %v623_v15 = vld [vmem:[#allocation5 + $0xe60] sm:$0xff] }
 0x166   :  { %v8081_v21 = vcombine.high %v619_v14, %v623_v15  ;;  %v668_v2 = vld [vmem:[#allocation5 + $0xfc8] sm:$0xff] }
 0x167   :  { %3784 = vmatmul.mubr.bf16.vlgmr.msra.gmra.mrb[0].mxu0 %v8664_v11  ;;  %3999 = vmatmul.mubr.bf16.vlgmr.msra.gmra.mrb[0].mxu1 %v8664_v11  ;;  %v8064_v11 = vcombine.low %v603_v62, %v607_v63 }
 0x168   :  { %3795 = vmatpush1.bf16.msra.mxu0 %v8008_v17  ;;  %4010 = vmatpush1.bf16.msra.mxu1 %v8010_v19  ;;  %v8075_v17 = vcombine.high %v612_v8, %v616_v10  ;;  %v8072_v19 = vcombine.low %v611_v6, %v615_v7 }
 0x169   :  { %3796 = vmatprep.subr.bf16.mxu0 %v8017_v20  ;;  %4011 = vmatprep.subr.bf16.mxu1 %v8019_v25  ;;  %v8074_v20 = vcombine.low %v612_v8, %v616_v10  ;;  %v628_v25 = vld [vmem:[#allocation5 + $0xe88] sm:$0xff]  ;;  %v675_v8 = vld [vmem:[#allocation5 + $0x1000] sm:$0xff] }
 0x16a   :  { %3826 = vmatprep.mubr.bf16.mxu0 %v8665_v26  ;;  %4041 = vmatprep.mubr.bf16.mxu1 %v8665_v26  ;;  %v8083_v26 = vcombine.high %v620_v16, %v624_v18  ;;  %v676_v10 = vld [vmem:[#allocation5 + $0x1008] sm:$0xff] }
 0x16c   :  { %3797 = vmatpush1.bf16.msra.mxu0 %v8016_v27  ;;  %4012 = vmatpush1.bf16.msra.mxu1 %v8018_v28  ;;  %v632_v27 = vld [vmem:[#allocation5 + $0xea8] sm:$0xff]  ;;  %v8080_v28 = vcombine.low %v619_v14, %v623_v15 }
 0x16d   :  { %3798 = vmatprep.subr.bf16.mxu0 %v8025_v29  ;;  %4013 = vmatprep.subr.bf16.mxu1 %v8027_v33  ;;  %v8082_v29 = vcombine.low %v620_v16, %v624_v18  ;;  %v636_v33 = vld [vmem:[#allocation5 + $0xec8] sm:$0xff]  ;;  %v8091_v34 = vcombine.high %v628_v25, %v632_v27  ;;  %v683_v16 = vld [vmem:[#allocation5 + $0x1040] sm:$0xff]  ;;  %v8667_v18 = vld [vmem:[#allocation2 + $0x18] ss:$36 sps:$4 sm:$0xff]  }
 0x170   :  { %3799 = vmatpush1.bf16.msra.mxu0 %v8024_v35  ;;  %4014 = vmatpush1.bf16.msra.mxu1 %v8026_v36  ;;  %v640_v35 = vld [vmem:[#allocation5 + $0xee8] sm:$0xff]  ;;  %v8088_v36 = vcombine.low %v627_v22, %v631_v24 }
 0x171   :  { %3800 = vmatprep.subr.bf16.mxu0 %v8033_v37  ;;  %4015 = vmatprep.subr.bf16.mxu1 %v8035_v41  ;;  %v8090_v37 = vcombine.low %v628_v25, %v632_v27  ;;  %v644_v41 = vld [vmem:[#allocation5 + $0xf08] sm:$0xff]  ;;  %v8099_v42 = vcombine.high %v636_v33, %v640_v35  ;;  %v695_v27 = vld [vmem:[#allocation5 + $0x10a0] sm:$0xff] }
 0x174   :  { %3801 = vmatpush1.bf16.msra.mxu0 %v8032_v43  ;;  %4016 = vmatpush1.bf16.msra.mxu1 %v8034_v44  ;;  %v648_v43 = vld [vmem:[#allocation5 + $0xf28] sm:$0xff]  ;;  %v8096_v44 = vcombine.low %v635_v31, %v639_v32 }
 0x175   :  { %3802 = vmatprep.subr.bf16.mxu0 %v8041_v45  ;;  %4017 = vmatprep.subr.bf16.mxu1 %v8043_v49  ;;  %v8098_v45 = vcombine.low %v636_v33, %v640_v35  ;;  %v8107_v47 = vcombine.high %v644_v41, %v648_v43  ;;  %v655_v49 = vld [vmem:[#allocation5 + $0xf60] sm:$0xff] }
 0x176   :  { %v8113_v54 = vcombine.high %v651_v48, %v655_v49  ;;  %v703_v35 = vld [vmem:[#allocation5 + $0x10e0] sm:$0xff] }
 0x178   :  { %3803 = vmatpush1.bf16.msra.mxu0 %v8040_v51  ;;  %4018 = vmatpush1.bf16.msra.mxu1 %v8042_v52  ;;  %v656_v51 = vld [vmem:[#allocation5 + $0xf68] sm:$0xff]  ;;  %v8104_v52 = vcombine.low %v643_v39, %v647_v40 }
 0x179   :  { %3804 = vmatprep.subr.bf16.mxu0 %v8049_v53  ;;  %4019 = vmatprep.subr.bf16.mxu1 %v8051_v57  ;;  %v8106_v53 = vcombine.low %v644_v41, %v648_v43  ;;  %v8115_v55 = vcombine.high %v652_v50, %v656_v51  ;;  %v663_v57 = vld [vmem:[#allocation5 + $0xfa0] sm:$0xff] }
 0x17a   :  { %v8121_v62 = vcombine.high %v659_v56, %v663_v57  ;;  %v711_v43 = vld [vmem:[#allocation5 + $0x1120] sm:$0xff] }
 0x17c   :  { %3805 = vmatpush1.bf16.msra.mxu0 %v8048_v59  ;;  %4020 = vmatpush1.bf16.msra.mxu1 %v8050_v60  ;;  %v664_v59 = vld [vmem:[#allocation5 + $0xfa8] sm:$0xff]  ;;  %v8112_v60 = vcombine.low %v651_v48, %v655_v49 }
 0x17d   :  { %3806 = vmatprep.subr.bf16.mxu0 %v8057_v61  ;;  %4021 = vmatprep.subr.bf16.mxu1 %v8059_v1  ;;  %v8114_v61 = vcombine.low %v652_v50, %v656_v51  ;;  %v8123_v63 = vcombine.high %v660_v58, %v664_v59  ;;  %v671_v1 = vld [vmem:[#allocation5 + $0xfe0] sm:$0xff] }
 0x17e   :  { %v8129_v6 = vcombine.high %v667_v0, %v671_v1  ;;  %v715_v50 = vld [vmem:[#allocation5 + $0x1140] sm:$0xff] }
 0x17f   :  { %v719_v51 = vld [vmem:[#allocation5 + $0x1160] sm:$0xff] }
 0x180   :  { %3807 = vmatpush1.bf16.msra.mxu0 %v8056_v3  ;;  %4022 = vmatpush1.bf16.msra.mxu1 %v8058_v4  ;;  %v672_v3 = vld [vmem:[#allocation5 + $0xfe8] sm:$0xff]  ;;  %v8120_v4 = vcombine.low %v659_v56, %v663_v57  ;;  %v8177_v56 = vcombine.high %v715_v50, %v719_v51 }
 0x181   :  { %3808 = vmatprep.subr.bf16.mxu0 %v8065_v5  ;;  %4023 = vmatprep.subr.bf16.mxu1 %v8067_v9  ;;  %v8122_v5 = vcombine.low %v660_v58, %v664_v59  ;;  %v8131_v7 = vcombine.high %v668_v2, %v672_v3  ;;  %v679_v9 = vld [vmem:[#allocation5 + $0x1020] sm:$0xff] }
 0x182   :  { %v8137_v14 = vcombine.high %v675_v8, %v679_v9  ;;  %v723_v58 = vld [vmem:[#allocation5 + $0x1180] sm:$0xff] }
 0x183   :  { %v727_v59 = vld [vmem:[#allocation5 + $0x11a0] sm:$0xff] }
 0x184   :  { %3809 = vmatpush1.bf16.msra.mxu0 %v8064_v11  ;;  %4024 = vmatpush1.bf16.msra.mxu1 %v8066_v12  ;;  %v680_v11 = vld [vmem:[#allocation5 + $0x1028] sm:$0xff]  ;;  %v8128_v12 = vcombine.low %v667_v0, %v671_v1  ;;  %v8185_v0 = vcombine.high %v723_v58, %v727_v59 }
 0x185   :  { %3810 = vmatprep.subr.bf16.mxu0 %v8073_v13  ;;  %4025 = vmatprep.subr.bf16.mxu1 %v8075_v17  ;;  %v8130_v13 = vcombine.low %v668_v2, %v672_v3  ;;  %v8139_v15 = vcombine.high %v676_v10, %v680_v11  ;;  %v687_v17 = vld [vmem:[#allocation5 + $0x1060] sm:$0xff]  ;;  %v8138_v22 = vcombine.low %v676_v10, %v680_v11  ;;  %v165_v10 = vld [vmem:[#allocation5 + $0x10] sm:$0xff] }
 0x186   :  { %v8145_v24 = vcombine.high %v683_v16, %v687_v17  ;;  %v731_v2 = vld [vmem:[#allocation5 + $0x11c0] sm:$0xff]  ;;  %v169_v11 = vld [vmem:[#allocation5 + $0x30] sm:$0xff] }
 0x187   :  { %v735_v3 = vld [vmem:[#allocation5 + $0x11e0] sm:$0xff] }
 0x188   :  { %3811 = vmatpush1.bf16.msra.mxu0 %v8072_v19  ;;  %4026 = vmatpush1.bf16.msra.mxu1 %v8074_v20  ;;  %v684_v19 = vld [vmem:[#allocation5 + $0x1048] sm:$0xff] }
 0x189   :  { %3812 = vmatprep.subr.bf16.mxu0 %v8081_v21  ;;  %4027 = vmatprep.subr.bf16.mxu1 %v8083_v26  ;;  %v688_v20 = vld [vmem:[#allocation5 + $0x1068] sm:$0xff]  ;;  %v8136_v21 = vcombine.low %v675_v8, %v679_v9  ;;  %v691_v26 = vld [vmem:[#allocation5 + $0x1080] sm:$0xff]  ;;  %v8193_v8 = vcombine.high %v731_v2, %v735_v3 }
 0x18a   :  { %v8147_v25 = vcombine.high %v684_v19, %v688_v20  ;;  %v8146_v31 = vcombine.low %v684_v19, %v688_v20  ;;  %v8153_v32 = vcombine.high %v691_v26, %v695_v27  ;;  %v177_v19 = vld [vmem:[#allocation5 + $0x70] sm:$0xff]  ;;  %v8668_v20 = vld [vmem:[#allocation2 + $0x20] ss:$36 sps:$4 sm:$0xff]  }
 0x18c   :  { %3813 = vmatpush1.bf16.msra.mxu0 %v8080_v28  ;;  %4028 = vmatpush1.bf16.msra.mxu1 %v8082_v29  ;;  %v692_v28 = vld [vmem:[#allocation5 + $0x1088] sm:$0xff] }
 0x18d   :  { %3814 = vmatprep.subr.bf16.mxu0 %v8089_v30  ;;  %4029 = vmatprep.subr.bf16.mxu1 %v8091_v34  ;;  %v696_v29 = vld [vmem:[#allocation5 + $0x10a8] sm:$0xff]  ;;  %v8144_v30 = vcombine.low %v683_v16, %v687_v17  ;;  %v699_v34 = vld [vmem:[#allocation5 + $0x10c0] sm:$0xff]  ;;  %v7629_v16 = vcombine.high %v165_v10, %v169_v11 }
 0x18e   :  { %v8155_v33 = vcombine.high %v692_v28, %v696_v29  ;;  %v8154_v39 = vcombine.low %v692_v28, %v696_v29  ;;  %v8161_v40 = vcombine.high %v699_v34, %v703_v35  ;;  %v181_v28 = vld [vmem:[#allocation5 + $0x90] sm:$0xff] }
 0x18f   :  { %v185_v29 = vld [vmem:[#allocation5 + $0xb0] sm:$0xff] }
 0x190   :  { %3815 = vmatpush1.bf16.msra.mxu0 %v8088_v36  ;;  %4030 = vmatpush1.bf16.msra.mxu1 %v8090_v37  ;;  %v700_v36 = vld [vmem:[#allocation5 + $0x10c8] sm:$0xff] }
 0x191   :  { %3816 = vmatprep.subr.bf16.mxu0 %v8097_v38  ;;  %4031 = vmatprep.subr.bf16.mxu1 %v8099_v42  ;;  %v704_v37 = vld [vmem:[#allocation5 + $0x10e8] sm:$0xff]  ;;  %v8152_v38 = vcombine.low %v691_v26, %v695_v27  ;;  %v707_v42 = vld [vmem:[#allocation5 + $0x1100] sm:$0xff] }
 0x192   :  { %v8163_v41 = vcombine.high %v700_v36, %v704_v37  ;;  %v8169_v48 = vcombine.high %v707_v42, %v711_v43 }
 0x194   :  { %3817 = vmatpush1.bf16.msra.mxu0 %v8096_v44  ;;  %4032 = vmatpush1.bf16.msra.mxu1 %v8098_v45  ;;  %v708_v44 = vld [vmem:[#allocation5 + $0x1108] sm:$0xff] }
 0x195   :  { %3818 = vmatprep.subr.bf16.mxu0 %v8105_v46  ;;  %4033 = vmatprep.subr.bf16.mxu1 %v8107_v47  ;;  %v712_v45 = vld [vmem:[#allocation5 + $0x1128] sm:$0xff]  ;;  %v8160_v46 = vcombine.low %v699_v34, %v703_v35  ;;  %v8162_v47 = vcombine.low %v700_v36, %v704_v37  ;;  %v7645_v34 = vcombine.high %v181_v28, %v185_v29  ;;  %v189_v36 = vld [vmem:[#allocation5 + $0xd0] sm:$0xff] }
 0x196   :  { %v8171_v49 = vcombine.high %v708_v44, %v712_v45  ;;  %v193_v37 = vld [vmem:[#allocation5 + $0xf0] sm:$0xff] }
 0x198   :  { %3819 = vmatpush1.bf16.msra.mxu0 %v8104_v52  ;;  %4034 = vmatpush1.bf16.msra.mxu1 %v8106_v53  ;;  %v716_v52 = vld [vmem:[#allocation5 + $0x1148] sm:$0xff] }
 0x199   :  { %3820 = vmatprep.subr.bf16.mxu0 %v8113_v54  ;;  %4035 = vmatprep.subr.bf16.mxu1 %v8115_v55  ;;  %v720_v53 = vld [vmem:[#allocation5 + $0x1168] sm:$0xff]  ;;  %v8168_v54 = vcombine.low %v707_v42, %v711_v43  ;;  %v8170_v55 = vcombine.low %v708_v44, %v712_v45  ;;  %v7653_v43 = vcombine.high %v189_v36, %v193_v37  ;;  %v197_v45 = vld [vmem:[#allocation5 + $0x110] sm:$0xff] }
 0x19a   :  { %v8179_v57 = vcombine.high %v716_v52, %v720_v53 }
 0x19c   :  { %3821 = vmatpush1.bf16.msra.mxu0 %v8112_v60  ;;  %4036 = vmatpush1.bf16.msra.mxu1 %v8114_v61  ;;  %v724_v60 = vld [vmem:[#allocation5 + $0x1188] sm:$0xff] }
 0x19d   :  { %3822 = vmatprep.subr.bf16.mxu0 %v8121_v62  ;;  %4037 = vmatprep.subr.bf16.mxu1 %v8123_v63  ;;  %v728_v61 = vld [vmem:[#allocation5 + $0x11a8] sm:$0xff]  ;;  %v8176_v62 = vcombine.low %v715_v50, %v719_v51  ;;  %v8178_v63 = vcombine.low %v716_v52, %v720_v53  ;;  %v205_v53 = vld [vmem:[#allocation5 + $0x150] sm:$0xff] }
 0x19e   :  { %v8187_v1 = vcombine.high %v724_v60, %v728_v61 }
 0x1a0   :  { %3823 = vmatpush1.bf16.msra.mxu0 %v8120_v4  ;;  %4038 = vmatpush1.bf16.msra.mxu1 %v8122_v5  ;;  %v732_v4 = vld [vmem:[#allocation5 + $0x11c8] sm:$0xff] }
 0x1a1   :  { %3824 = vmatprep.subr.bf16.mxu0 %v8129_v6  ;;  %4039 = vmatprep.subr.bf16.mxu1 %v8131_v7  ;;  %v736_v5 = vld [vmem:[#allocation5 + $0x11e8] sm:$0xff]  ;;  %v8184_v6 = vcombine.low %v723_v58, %v727_v59  ;;  %v8186_v7 = vcombine.low %v724_v60, %v728_v61  ;;  %v213_v61 = vld [vmem:[#allocation5 + $0x190] sm:$0xff] }
 0x1a2   :  { %v8195_v9 = vcombine.high %v732_v4, %v736_v5 }
 0x1a4   :  { %3825 = vmatpush1.bf16.msra.mxu0 %v8128_v12  ;;  %4040 = vmatpush1.bf16.msra.mxu1 %v8130_v13  ;;  %v166_v12 = vld [vmem:[#allocation5 + $0x18] sm:$0xff] }
 0x1a5   :  { %3837 = vmatprep.subr.bf16.mxu0 %v8137_v14  ;;  %4052 = vmatprep.subr.bf16.mxu1 %v8139_v15  ;;  %v170_v13 = vld [vmem:[#allocation5 + $0x38] sm:$0xff]  ;;  %v8192_v14 = vcombine.low %v731_v2, %v735_v3  ;;  %v8194_v15 = vcombine.low %v732_v4, %v736_v5  ;;  %v221_v5 = vld [vmem:[#allocation5 + $0x1d0] sm:$0xff] }
 0x1a6   :  { %v7631_v17 = vcombine.high %v166_v12, %v170_v13 }
 0x1a7   :  { %3827 = vmatmul.mubr.bf16.vlgmr.msra.gmra.mrb[0].mxu0 %v8667_v18  ;;  %4042 = vmatmul.mubr.bf16.vlgmr.msra.gmra.mrb[0].mxu1 %v8667_v18  ;;  %v173_v18 = vld [vmem:[#allocation5 + $0x50] sm:$0xff] }
 0x1a8   :  { %3838 = vmatpush1.bf16.msra.mxu0 %v8136_v21  ;;  %4053 = vmatpush1.bf16.msra.mxu1 %v8138_v22  ;;  %v174_v21 = vld [vmem:[#allocation5 + $0x58] sm:$0xff]  ;;  %v7637_v26 = vcombine.high %v173_v18, %v177_v19 }
 0x1a9   :  { %3839 = vmatprep.subr.bf16.mxu0 %v8145_v24  ;;  %4054 = vmatprep.subr.bf16.mxu1 %v8147_v25  ;;  %v178_v22 = vld [vmem:[#allocation5 + $0x78] sm:$0xff]  ;;  %v7628_v24 = vcombine.low %v165_v10, %v169_v11  ;;  %v7630_v25 = vcombine.low %v166_v12, %v170_v13  ;;  %v229_v13 = vld [vmem:[#allocation5 + $0x210] sm:$0xff] }
 0x1aa   :  { %3869 = vmatprep.mubr.bf16.mxu0 %v10134_v23  ;;  %4084 = vmatprep.mubr.bf16.mxu1 %v10134_v23  ;;  %v7639_v27 = vcombine.high %v174_v21, %v178_v22 }
 0x1ac   :  { %3840 = vmatpush1.bf16.msra.mxu0 %v8144_v30  ;;  %4055 = vmatpush1.bf16.msra.mxu1 %v8146_v31  ;;  %v182_v30 = vld [vmem:[#allocation5 + $0x98] sm:$0xff] }
 0x1ad   :  { %3841 = vmatprep.subr.bf16.mxu0 %v8153_v32  ;;  %4056 = vmatprep.subr.bf16.mxu1 %v8155_v33  ;;  %v186_v31 = vld [vmem:[#allocation5 + $0xb8] sm:$0xff]  ;;  %v7636_v32 = vcombine.low %v173_v18, %v177_v19  ;;  %v7638_v33 = vcombine.low %v174_v21, %v178_v22  ;;  %v237_v21 = vld [vmem:[#allocation5 + $0x250] sm:$0xff] }
 0x1ae   :  { %v7647_v35 = vcombine.high %v182_v30, %v186_v31  ;;  %v7646_v42 = vcombine.low %v182_v30, %v186_v31  ;;  %v241_v22 = vld [vmem:[#allocation5 + $0x270] sm:$0xff] }
 0x1af   :  { %v245_v30 = vld [vmem:[#allocation5 + $0x290] sm:$0xff] }
 0x1b0   :  { %3842 = vmatpush1.bf16.msra.mxu0 %v8152_v38  ;;  %4057 = vmatpush1.bf16.msra.mxu1 %v8154_v39  ;;  %v9115_v38 = vld [vmem:[#allocation2 + $0x4] ss:$36 sps:$4 sm:$0xff]   ;;  %v249_v31 = vld [vmem:[#allocation5 + $0x2b0] sm:$0xff] }
 0x1b1   :  { %3843 = vmatprep.subr.bf16.mxu0 %v8161_v40  ;;  %4058 = vmatprep.subr.bf16.mxu1 %v8163_v41  ;;  %v190_v39 = vld [vmem:[#allocation5 + $0xd8] sm:$0xff]  ;;  %v7644_v41 = vcombine.low %v181_v28, %v185_v29  ;;  %v7701_v28 = vcombine.high %v237_v21, %v241_v22 }
 0x1b2   :  { %v194_v40 = vld [vmem:[#allocation5 + $0xf8] sm:$0xff] }
 0x1b3   :  { %v7655_v44 = vcombine.high %v190_v39, %v194_v40  ;;  %v7654_v50 = vcombine.low %v190_v39, %v194_v40  ;;  %v257_v39 = vld [vmem:[#allocation5 + $0x2f0] sm:$0xff]  ;;  %v254_v40 = vld [vmem:[#allocation5 + $0x2d8] sm:$0xff] }
 0x1b4   :  { %3844 = vmatpush1.bf16.msra.mxu0 %v8160_v46  ;;  %4059 = vmatpush1.bf16.msra.mxu1 %v8162_v47  ;;  %v201_v46 = vld [vmem:[#allocation5 + $0x130] sm:$0xff]  ;;  %v198_v47 = vld [vmem:[#allocation5 + $0x118] sm:$0xff] }
 0x1b5   :  { %3845 = vmatprep.subr.bf16.mxu0 %v8169_v48  ;;  %4060 = vmatprep.subr.bf16.mxu1 %v8171_v49  ;;  %v202_v48 = vld [vmem:[#allocation5 + $0x138] sm:$0xff]  ;;  %v7652_v49 = vcombine.low %v189_v36, %v193_v37  ;;  %v7661_v51 = vcombine.high %v197_v45, %v201_v46  ;;  %v7709_v36 = vcombine.high %v245_v30, %v249_v31 }
 0x1b6   :  { %v7663_v52 = vcombine.high %v198_v47, %v202_v48  ;;  %v7662_v58 = vcombine.low %v198_v47, %v202_v48  ;;  %v265_v47 = vld [vmem:[#allocation5 + $0x330] sm:$0xff]  ;;  %v262_v48 = vld [vmem:[#allocation5 + $0x318] sm:$0xff] }
 0x1b8   :  { %3846 = vmatpush1.bf16.msra.mxu0 %v8168_v54  ;;  %4061 = vmatpush1.bf16.msra.mxu1 %v8170_v55  ;;  %v209_v54 = vld [vmem:[#allocation5 + $0x170] sm:$0xff]  ;;  %v206_v55 = vld [vmem:[#allocation5 + $0x158] sm:$0xff] }
 0x1b9   :  { %3847 = vmatprep.subr.bf16.mxu0 %v8177_v56  ;;  %4062 = vmatprep.subr.bf16.mxu1 %v8179_v57  ;;  %v210_v56 = vld [vmem:[#allocation5 + $0x178] sm:$0xff]  ;;  %v7660_v57 = vcombine.low %v197_v45, %v201_v46  ;;  %v7669_v59 = vcombine.high %v205_v53, %v209_v54  ;;  %v261_v46 = vld [vmem:[#allocation5 + $0x310] sm:$0xff] }
 0x1ba   :  { %v7671_v60 = vcombine.high %v206_v55, %v210_v56  ;;  %v7670_v2 = vcombine.low %v206_v55, %v210_v56  ;;  %v273_v55 = vld [vmem:[#allocation5 + $0x370] sm:$0xff]  ;;  %v270_v56 = vld [vmem:[#allocation5 + $0x358] sm:$0xff] }
 0x1bc   :  { %3848 = vmatpush1.bf16.msra.mxu0 %v8176_v62  ;;  %4063 = vmatpush1.bf16.msra.mxu1 %v8178_v63  ;;  %v217_v62 = vld [vmem:[#allocation5 + $0x1b0] sm:$0xff]  ;;  %v214_v63 = vld [vmem:[#allocation5 + $0x198] sm:$0xff] }
 0x1bd   :  { %3849 = vmatprep.subr.bf16.mxu0 %v8185_v0  ;;  %4064 = vmatprep.subr.bf16.mxu1 %v8187_v1  ;;  %v218_v0 = vld [vmem:[#allocation5 + $0x1b8] sm:$0xff]  ;;  %v7668_v1 = vcombine.low %v205_v53, %v209_v54  ;;  %v7677_v3 = vcombine.high %v213_v61, %v217_v62  ;;  %v269_v54 = vld [vmem:[#allocation5 + $0x350] sm:$0xff] }
 0x1be   :  { %v7679_v4 = vcombine.high %v214_v63, %v218_v0  ;;  %v7678_v10 = vcombine.low %v214_v63, %v218_v0  ;;  %v281_v63 = vld [vmem:[#allocation5 + $0x3b0] sm:$0xff]  ;;  %v278_v0 = vld [vmem:[#allocation5 + $0x398] sm:$0xff] }
 0x1c0   :  { %3850 = vmatpush1.bf16.msra.mxu0 %v8184_v6  ;;  %4065 = vmatpush1.bf16.msra.mxu1 %v8186_v7  ;;  %v225_v6 = vld [vmem:[#allocation5 + $0x1f0] sm:$0xff]  ;;  %v222_v7 = vld [vmem:[#allocation5 + $0x1d8] sm:$0xff] }
 0x1c1   :  { %3851 = vmatprep.subr.bf16.mxu0 %v8193_v8  ;;  %4066 = vmatprep.subr.bf16.mxu1 %v8195_v9  ;;  %v226_v8 = vld [vmem:[#allocation5 + $0x1f8] sm:$0xff]  ;;  %v7676_v9 = vcombine.low %v213_v61, %v217_v62  ;;  %v7685_v11 = vcombine.high %v221_v5, %v225_v6  ;;  %v277_v62 = vld [vmem:[#allocation5 + $0x390] sm:$0xff] }
 0x1c2   :  { %v7687_v12 = vcombine.high %v222_v7, %v226_v8  ;;  %v7686_v18 = vcombine.low %v222_v7, %v226_v8  ;;  %v289_v7 = vld [vmem:[#allocation5 + $0x3f0] sm:$0xff]  ;;  %v286_v8 = vld [vmem:[#allocation5 + $0x3d8] sm:$0xff] }
 0x1c4   :  { %3852 = vmatpush1.bf16.msra.mxu0 %v8192_v14  ;;  %4067 = vmatpush1.bf16.msra.mxu1 %v8194_v15  ;;  %v233_v14 = vld [vmem:[#allocation5 + $0x230] sm:$0xff]  ;;  %v230_v15 = vld [vmem:[#allocation5 + $0x218] sm:$0xff] }
 0x1c5   :  { %4095 = vmatprep.subr.bf16.mxu0 %v7629_v16  ;;  %4310 = vmatprep.subr.bf16.mxu1 %v7631_v17  ;;  %v234_v16 = vld [vmem:[#allocation5 + $0x238] sm:$0xff]  ;;  %v7684_v17 = vcombine.low %v221_v5, %v225_v6  ;;  %v7693_v19 = vcombine.high %v229_v13, %v233_v14  ;;  %v285_v6 = vld [vmem:[#allocation5 + $0x3d0] sm:$0xff] }
 0x1c7   :  { %3870 = vmatmul.mubr.bf16.vlgmr.msra.gmra.mrb[0].mxu0 %v8668_v20  ;;  %4085 = vmatmul.mubr.bf16.vlgmr.msra.gmra.mrb[0].mxu1 %v8668_v20  ;;  %v7695_v20 = vcombine.high %v230_v15, %v234_v16 }
 0x1c8   :  { %4096 = vmatpush1.bf16.msra.mxu0 %v7628_v24  ;;  %4311 = vmatpush1.bf16.msra.mxu1 %v7630_v25  ;;  %v238_v24 = vld [vmem:[#allocation5 + $0x258] sm:$0xff] }
 0x1c9   :  { %4097 = vmatprep.subr.bf16.mxu0 %v7637_v26  ;;  %4312 = vmatprep.subr.bf16.mxu1 %v7639_v27  ;;  %v242_v25 = vld [vmem:[#allocation5 + $0x278] sm:$0xff]  ;;  %v7692_v26 = vcombine.low %v229_v13, %v233_v14  ;;  %v7694_v27 = vcombine.low %v230_v15, %v234_v16  ;;  %v293_v14 = vld [vmem:[#allocation5 + $0x410] sm:$0xff] }
 0x1ca   :  { %4127 = vmatprep.mubr.bf16.mxu0 %v9115_v38  ;;  %4342 = vmatprep.mubr.bf16.mxu1 %v9115_v38  ;;  %v7703_v29 = vcombine.high %v238_v24, %v242_v25  ;;  %v253_v38 = vld [vmem:[#allocation5 + $0x2d0] sm:$0xff]  ;;  %v294_v16 = vld [vmem:[#allocation5 + $0x418] sm:$0xff] }
 0x1cb   :  { %v297_v15 = vld [vmem:[#allocation5 + $0x430] sm:$0xff] }
 0x1cc   :  { %4098 = vmatpush1.bf16.msra.mxu0 %v7636_v32  ;;  %4313 = vmatpush1.bf16.msra.mxu1 %v7638_v33  ;;  %v246_v32 = vld [vmem:[#allocation5 + $0x298] sm:$0xff] }
 0x1cd   :  { %4099 = vmatprep.subr.bf16.mxu0 %v7645_v34  ;;  %4314 = vmatprep.subr.bf16.mxu1 %v7647_v35  ;;  %v250_v33 = vld [vmem:[#allocation5 + $0x2b8] sm:$0xff]  ;;  %v7700_v34 = vcombine.low %v237_v21, %v241_v22  ;;  %v7702_v35 = vcombine.low %v238_v24, %v242_v25  ;;  %v301_v22 = vld [vmem:[#allocation5 + $0x450] sm:$0xff] }
 0x1ce   :  { %v7711_v37 = vcombine.high %v246_v32, %v250_v33  ;;  %v305_v24 = vld [vmem:[#allocation5 + $0x470] sm:$0xff]  ;;  %v302_v25 = vld [vmem:[#allocation5 + $0x458] sm:$0xff] }
 0x1d0   :  { %4100 = vmatpush1.bf16.msra.mxu0 %v7644_v41  ;;  %4315 = vmatpush1.bf16.msra.mxu1 %v7646_v42  ;;  %v258_v41 = vld [vmem:[#allocation5 + $0x2f8] sm:$0xff]  ;;  %v7708_v42 = vcombine.low %v245_v30, %v249_v31  ;;  %v309_v31 = vld [vmem:[#allocation5 + $0x490] sm:$0xff] }
 0x1d1   :  { %4101 = vmatprep.subr.bf16.mxu0 %v7653_v43  ;;  %4316 = vmatprep.subr.bf16.mxu1 %v7655_v44  ;;  %v7710_v43 = vcombine.low %v246_v32, %v250_v33  ;;  %v7717_v44 = vcombine.high %v253_v38, %v257_v39  ;;  %v7719_v45 = vcombine.high %v254_v40, %v258_v41  ;;  %v313_v32 = vld [vmem:[#allocation5 + $0x4b0] sm:$0xff]  ;;  %v9116_v33 = vld [vmem:[#allocation2] ss:$36 sps:$4 sm:$0xff]  }
 0x1d4   :  { %4102 = vmatpush1.bf16.msra.mxu0 %v7652_v49  ;;  %4317 = vmatpush1.bf16.msra.mxu1 %v7654_v50  ;;  %v266_v49 = vld [vmem:[#allocation5 + $0x338] sm:$0xff]  ;;  %v7716_v50 = vcombine.low %v253_v38, %v257_v39  ;;  %v7773_v38 = vcombine.high %v309_v31, %v313_v32 }
 0x1d5   :  { %4103 = vmatprep.subr.bf16.mxu0 %v7661_v51  ;;  %4318 = vmatprep.subr.bf16.mxu1 %v7663_v52  ;;  %v7718_v51 = vcombine.low %v254_v40, %v258_v41  ;;  %v7725_v52 = vcombine.high %v261_v46, %v265_v47  ;;  %v7727_v53 = vcombine.high %v262_v48, %v266_v49  ;;  %v317_v40 = vld [vmem:[#allocation5 + $0x4d0] sm:$0xff] }
 0x1d6   :  { %v321_v41 = vld [vmem:[#allocation5 + $0x4f0] sm:$0xff] }
 0x1d8   :  { %4104 = vmatpush1.bf16.msra.mxu0 %v7660_v57  ;;  %4319 = vmatpush1.bf16.msra.mxu1 %v7662_v58  ;;  %v274_v57 = vld [vmem:[#allocation5 + $0x378] sm:$0xff]  ;;  %v7724_v58 = vcombine.low %v261_v46, %v265_v47  ;;  %v7781_v47 = vcombine.high %v317_v40, %v321_v41 }
 0x1d9   :  { %4105 = vmatprep.subr.bf16.mxu0 %v7669_v59  ;;  %4320 = vmatprep.subr.bf16.mxu1 %v7671_v60  ;;  %v7726_v59 = vcombine.low %v262_v48, %v266_v49  ;;  %v7733_v60 = vcombine.high %v269_v54, %v273_v55  ;;  %v7735_v61 = vcombine.high %v270_v56, %v274_v57  ;;  %v325_v49 = vld [vmem:[#allocation5 + $0x510] sm:$0xff] }
 0x1dc   :  { %4106 = vmatpush1.bf16.msra.mxu0 %v7668_v1  ;;  %4321 = vmatpush1.bf16.msra.mxu1 %v7670_v2  ;;  %v282_v1 = vld [vmem:[#allocation5 + $0x3b8] sm:$0xff]  ;;  %v7732_v2 = vcombine.low %v269_v54, %v273_v55 }
 0x1dd   :  { %4107 = vmatprep.subr.bf16.mxu0 %v7677_v3  ;;  %4322 = vmatprep.subr.bf16.mxu1 %v7679_v4  ;;  %v7734_v3 = vcombine.low %v270_v56, %v274_v57  ;;  %v7741_v4 = vcombine.high %v277_v62, %v281_v63  ;;  %v7743_v5 = vcombine.high %v278_v0, %v282_v1  ;;  %v333_v57 = vld [vmem:[#allocation5 + $0x550] sm:$0xff] }
 0x1e0   :  { %4108 = vmatpush1.bf16.msra.mxu0 %v7676_v9  ;;  %4323 = vmatpush1.bf16.msra.mxu1 %v7678_v10  ;;  %v290_v9 = vld [vmem:[#allocation5 + $0x3f8] sm:$0xff]  ;;  %v7740_v10 = vcombine.low %v277_v62, %v281_v63 }
 0x1e1   :  { %4109 = vmatprep.subr.bf16.mxu0 %v7685_v11  ;;  %4324 = vmatprep.subr.bf16.mxu1 %v7687_v12  ;;  %v7742_v11 = vcombine.low %v278_v0, %v282_v1  ;;  %v7749_v12 = vcombine.high %v285_v6, %v289_v7  ;;  %v7751_v13 = vcombine.high %v286_v8, %v290_v9  ;;  %v341_v1 = vld [vmem:[#allocation5 + $0x590] sm:$0xff] }
 0x1e4   :  { %4110 = vmatpush1.bf16.msra.mxu0 %v7684_v17  ;;  %4325 = vmatpush1.bf16.msra.mxu1 %v7686_v18  ;;  %v298_v17 = vld [vmem:[#allocation5 + $0x438] sm:$0xff]  ;;  %v7748_v18 = vcombine.low %v285_v6, %v289_v7 }
 0x1e5   :  { %4111 = vmatprep.subr.bf16.mxu0 %v7693_v19  ;;  %4326 = vmatprep.subr.bf16.mxu1 %v7695_v20  ;;  %v7750_v19 = vcombine.low %v286_v8, %v290_v9  ;;  %v7757_v20 = vcombine.high %v293_v14, %v297_v15  ;;  %v7759_v21 = vcombine.high %v294_v16, %v298_v17  ;;  %v349_v9 = vld [vmem:[#allocation5 + $0x5d0] sm:$0xff] }
 0x1e8   :  { %4112 = vmatpush1.bf16.msra.mxu0 %v7692_v26  ;;  %4327 = vmatpush1.bf16.msra.mxu1 %v7694_v27  ;;  %v306_v26 = vld [vmem:[#allocation5 + $0x478] sm:$0xff]  ;;  %v7756_v27 = vcombine.low %v293_v14, %v297_v15 }
 0x1e9   :  { %4113 = vmatprep.subr.bf16.mxu0 %v7701_v28  ;;  %4328 = vmatprep.subr.bf16.mxu1 %v7703_v29  ;;  %v7758_v28 = vcombine.low %v294_v16, %v298_v17  ;;  %v7765_v29 = vcombine.high %v301_v22, %v305_v24  ;;  %v7767_v30 = vcombine.high %v302_v25, %v306_v26  ;;  %v357_v17 = vld [vmem:[#allocation5 + $0x610] sm:$0xff] }
 0x1ec   :  { %4114 = vmatpush1.bf16.msra.mxu0 %v7700_v34  ;;  %4329 = vmatpush1.bf16.msra.mxu1 %v7702_v35  ;;  %v310_v34 = vld [vmem:[#allocation5 + $0x498] sm:$0xff] }
 0x1ed   :  { %4115 = vmatprep.subr.bf16.mxu0 %v7709_v36  ;;  %4330 = vmatprep.subr.bf16.mxu1 %v7711_v37  ;;  %v314_v35 = vld [vmem:[#allocation5 + $0x4b8] sm:$0xff]  ;;  %v7764_v36 = vcombine.low %v301_v22, %v305_v24  ;;  %v7766_v37 = vcombine.low %v302_v25, %v306_v26  ;;  %v365_v26 = vld [vmem:[#allocation5 + $0x650] sm:$0xff] }
 0x1ee   :  { %v7775_v39 = vcombine.high %v310_v34, %v314_v35  ;;  %v7774_v46 = vcombine.low %v310_v34, %v314_v35  ;;  %v373_v34 = vld [vmem:[#allocation5 + $0x690] sm:$0xff] }
 0x1ef   :  { %v377_v35 = vld [vmem:[#allocation5 + $0x6b0] sm:$0xff] }
 0x1f0   :  { %4116 = vmatpush1.bf16.msra.mxu0 %v7708_v42  ;;  %4331 = vmatpush1.bf16.msra.mxu1 %v7710_v43  ;;  %v9117_v42 = vld [vmem:[#allocation2 + $0xc] ss:$36 sps:$4 sm:$0xff]   ;;  %v318_v43 = vld [vmem:[#allocation5 + $0x4d8] sm:$0xff] }
 0x1f1   :  { %4117 = vmatprep.subr.bf16.mxu0 %v7717_v44  ;;  %4332 = vmatprep.subr.bf16.mxu1 %v7719_v45  ;;  %v322_v44 = vld [vmem:[#allocation5 + $0x4f8] sm:$0xff]  ;;  %v7772_v45 = vcombine.low %v309_v31, %v313_v32 }
 0x1f2   :  { %v7783_v48 = vcombine.high %v318_v43, %v322_v44  ;;  %v7782_v54 = vcombine.low %v318_v43, %v322_v44  ;;  %v385_v43 = vld [vmem:[#allocation5 + $0x6f0] sm:$0xff]  ;;  %v382_v44 = vld [vmem:[#allocation5 + $0x6d8] sm:$0xff] }
 0x1f4   :  { %4118 = vmatpush1.bf16.msra.mxu0 %v7716_v50  ;;  %4333 = vmatpush1.bf16.msra.mxu1 %v7718_v51  ;;  %v329_v50 = vld [vmem:[#allocation5 + $0x530] sm:$0xff]  ;;  %v326_v51 = vld [vmem:[#allocation5 + $0x518] sm:$0xff] }
 0x1f5   :  { %4119 = vmatprep.subr.bf16.mxu0 %v7725_v52  ;;  %4334 = vmatprep.subr.bf16.mxu1 %v7727_v53  ;;  %v330_v52 = vld [vmem:[#allocation5 + $0x538] sm:$0xff]  ;;  %v7780_v53 = vcombine.low %v317_v40, %v321_v41  ;;  %v7789_v55 = vcombine.high %v325_v49, %v329_v50  ;;  %v7837_v40 = vcombine.high %v373_v34, %v377_v35 }
 0x1f6   :  { %v7791_v56 = vcombine.high %v326_v51, %v330_v52  ;;  %v7790_v62 = vcombine.low %v326_v51, %v330_v52  ;;  %v393_v51 = vld [vmem:[#allocation5 + $0x730] sm:$0xff]  ;;  %v390_v52 = vld [vmem:[#allocation5 + $0x718] sm:$0xff] }
 0x1f8   :  { %4120 = vmatpush1.bf16.msra.mxu0 %v7724_v58  ;;  %4335 = vmatpush1.bf16.msra.mxu1 %v7726_v59  ;;  %v337_v58 = vld [vmem:[#allocation5 + $0x570] sm:$0xff]  ;;  %v334_v59 = vld [vmem:[#allocation5 + $0x558] sm:$0xff] }
 0x1f9   :  { %4121 = vmatprep.subr.bf16.mxu0 %v7733_v60  ;;  %4336 = vmatprep.subr.bf16.mxu1 %v7735_v61  ;;  %v338_v60 = vld [vmem:[#allocation5 + $0x578] sm:$0xff]  ;;  %v7788_v61 = vcombine.low %v325_v49, %v329_v50  ;;  %v7797_v63 = vcombine.high %v333_v57, %v337_v58  ;;  %v389_v50 = vld [vmem:[#allocation5 + $0x710] sm:$0xff] }
 0x1fa   :  { %v7799_v0 = vcombine.high %v334_v59, %v338_v60  ;;  %v7798_v6 = vcombine.low %v334_v59, %v338_v60  ;;  %v401_v59 = vld [vmem:[#allocation5 + $0x770] sm:$0xff]  ;;  %v398_v60 = vld [vmem:[#allocation5 + $0x758] sm:$0xff] }
 0x1fc   :  { %4122 = vmatpush1.bf16.msra.mxu0 %v7732_v2  ;;  %4337 = vmatpush1.bf16.msra.mxu1 %v7734_v3  ;;  %v345_v2 = vld [vmem:[#allocation5 + $0x5b0] sm:$0xff]  ;;  %v342_v3 = vld [vmem:[#allocation5 + $0x598] sm:$0xff] }
 0x1fd   :  { %4123 = vmatprep.subr.bf16.mxu0 %v7741_v4  ;;  %4338 = vmatprep.subr.bf16.mxu1 %v7743_v5  ;;  %v346_v4 = vld [vmem:[#allocation5 + $0x5b8] sm:$0xff]  ;;  %v7796_v5 = vcombine.low %v333_v57, %v337_v58  ;;  %v7805_v7 = vcombine.high %v341_v1, %v345_v2  ;;  %v397_v58 = vld [vmem:[#allocation5 + $0x750] sm:$0xff] }
 0x1fe   :  { %v7807_v8 = vcombine.high %v342_v3, %v346_v4  ;;  %v7806_v14 = vcombine.low %v342_v3, %v346_v4  ;;  %v409_v3 = vld [vmem:[#allocation5 + $0x7b0] sm:$0xff]  ;;  %v406_v4 = vld [vmem:[#allocation5 + $0x798] sm:$0xff] }
 0x200   :  { %4124 = vmatpush1.bf16.msra.mxu0 %v7740_v10  ;;  %4339 = vmatpush1.bf16.msra.mxu1 %v7742_v11  ;;  %v353_v10 = vld [vmem:[#allocation5 + $0x5f0] sm:$0xff]  ;;  %v350_v11 = vld [vmem:[#allocation5 + $0x5d8] sm:$0xff] }
 0x201   :  { %4125 = vmatprep.subr.bf16.mxu0 %v7749_v12  ;;  %4340 = vmatprep.subr.bf16.mxu1 %v7751_v13  ;;  %v354_v12 = vld [vmem:[#allocation5 + $0x5f8] sm:$0xff]  ;;  %v7804_v13 = vcombine.low %v341_v1, %v345_v2  ;;  %v7813_v15 = vcombine.high %v349_v9, %v353_v10  ;;  %v405_v2 = vld [vmem:[#allocation5 + $0x790] sm:$0xff] }
 0x202   :  { %v7815_v16 = vcombine.high %v350_v11, %v354_v12  ;;  %v7814_v22 = vcombine.low %v350_v11, %v354_v12  ;;  %v417_v11 = vld [vmem:[#allocation5 + $0x7f0] sm:$0xff]  ;;  %v414_v12 = vld [vmem:[#allocation5 + $0x7d8] sm:$0xff] }
 0x204   :  { %4126 = vmatpush1.bf16.msra.mxu0 %v7748_v18  ;;  %4341 = vmatpush1.bf16.msra.mxu1 %v7750_v19  ;;  %v361_v18 = vld [vmem:[#allocation5 + $0x630] sm:$0xff]  ;;  %v358_v19 = vld [vmem:[#allocation5 + $0x618] sm:$0xff] }
 0x205   :  { %4138 = vmatprep.subr.bf16.mxu0 %v7757_v20  ;;  %4353 = vmatprep.subr.bf16.mxu1 %v7759_v21  ;;  %v362_v20 = vld [vmem:[#allocation5 + $0x638] sm:$0xff]  ;;  %v7812_v21 = vcombine.low %v349_v9, %v353_v10  ;;  %v7821_v24 = vcombine.high %v357_v17, %v361_v18  ;;  %v413_v10 = vld [vmem:[#allocation5 + $0x7d0] sm:$0xff] }
 0x206   :  { %v7823_v25 = vcombine.high %v358_v19, %v362_v20  ;;  %v7822_v31 = vcombine.low %v358_v19, %v362_v20  ;;  %v425_v19 = vld [vmem:[#allocation5 + $0x830] sm:$0xff]  ;;  %v422_v20 = vld [vmem:[#allocation5 + $0x818] sm:$0xff] }
 0x207   :  { %4128 = vmatmul.mubr.bf16.vlgmr.msra.gmra.mrb[4].mxu0 %v9116_v33  ;;  %4343 = vmatmul.mubr.bf16.vlgmr.msra.gmra.mrb[4].mxu1 %v9116_v33 }
 0x208   :  { %4139 = vmatpush1.bf16.msra.mxu0 %v7756_v27  ;;  %4354 = vmatpush1.bf16.msra.mxu1 %v7758_v28  ;;  %v369_v27 = vld [vmem:[#allocation5 + $0x670] sm:$0xff]  ;;  %v366_v28 = vld [vmem:[#allocation5 + $0x658] sm:$0xff] }
 0x209   :  { %4140 = vmatprep.subr.bf16.mxu0 %v7765_v29  ;;  %4355 = vmatprep.subr.bf16.mxu1 %v7767_v30  ;;  %v370_v29 = vld [vmem:[#allocation5 + $0x678] sm:$0xff]  ;;  %v7820_v30 = vcombine.low %v357_v17, %v361_v18  ;;  %v7829_v32 = vcombine.high %v365_v26, %v369_v27  ;;  %v421_v18 = vld [vmem:[#allocation5 + $0x810] sm:$0xff] }
 0x20a   :  { %4170 = vmatprep.mubr.bf16.mxu0 %v9117_v42  ;;  %4385 = vmatprep.mubr.bf16.mxu1 %v9117_v42  ;;  %v7831_v33 = vcombine.high %v366_v28, %v370_v29  ;;  %v381_v42 = vld [vmem:[#allocation5 + $0x6d0] sm:$0xff] }
 0x20c   :  { %4141 = vmatpush1.bf16.msra.mxu0 %v7764_v36  ;;  %4356 = vmatpush1.bf16.msra.mxu1 %v7766_v37  ;;  %v374_v36 = vld [vmem:[#allocation5 + $0x698] sm:$0xff] }
 0x20d   :  { %4142 = vmatprep.subr.bf16.mxu0 %v7773_v38  ;;  %4357 = vmatprep.subr.bf16.mxu1 %v7775_v39  ;;  %v378_v37 = vld [vmem:[#allocation5 + $0x6b8] sm:$0xff]  ;;  %v7828_v38 = vcombine.low %v365_v26, %v369_v27  ;;  %v7830_v39 = vcombine.low %v366_v28, %v370_v29  ;;  %v429_v27 = vld [vmem:[#allocation5 + $0x850] sm:$0xff] }
 0x20e   :  { %v7839_v41 = vcombine.high %v374_v36, %v378_v37  ;;  %v433_v28 = vld [vmem:[#allocation5 + $0x870] sm:$0xff]  ;;  %v430_v29 = vld [vmem:[#allocation5 + $0x858] sm:$0xff] }
 0x210   :  { %4143 = vmatpush1.bf16.msra.mxu0 %v7772_v45  ;;  %4358 = vmatpush1.bf16.msra.mxu1 %v7774_v46  ;;  %v386_v45 = vld [vmem:[#allocation5 + $0x6f8] sm:$0xff]  ;;  %v7836_v46 = vcombine.low %v373_v34, %v377_v35  ;;  %v437_v35 = vld [vmem:[#allocation5 + $0x890] sm:$0xff] }
 0x211   :  { %4144 = vmatprep.subr.bf16.mxu0 %v7781_v47  ;;  %4359 = vmatprep.subr.bf16.mxu1 %v7783_v48  ;;  %v7838_v47 = vcombine.low %v374_v36, %v378_v37  ;;  %v7845_v48 = vcombine.high %v381_v42, %v385_v43  ;;  %v7847_v49 = vcombine.high %v382_v44, %v386_v45  ;;  %v441_v36 = vld [vmem:[#allocation5 + $0x8b0] sm:$0xff]  ;;  %v9118_v37 = vld [vmem:[#allocation2 + $0x8] ss:$36 sps:$4 sm:$0xff]  }
 0x214   :  { %4145 = vmatpush1.bf16.msra.mxu0 %v7780_v53  ;;  %4360 = vmatpush1.bf16.msra.mxu1 %v7782_v54  ;;  %v394_v53 = vld [vmem:[#allocation5 + $0x738] sm:$0xff]  ;;  %v7844_v54 = vcombine.low %v381_v42, %v385_v43  ;;  %v7901_v42 = vcombine.high %v437_v35, %v441_v36 }
 0x215   :  { %4146 = vmatprep.subr.bf16.mxu0 %v7789_v55  ;;  %4361 = vmatprep.subr.bf16.mxu1 %v7791_v56  ;;  %v7846_v55 = vcombine.low %v382_v44, %v386_v45  ;;  %v7853_v56 = vcombine.high %v389_v50, %v393_v51  ;;  %v7855_v57 = vcombine.high %v390_v52, %v394_v53  ;;  %v445_v44 = vld [vmem:[#allocation5 + $0x8d0] sm:$0xff] }
 0x216   :  { %v449_v45 = vld [vmem:[#allocation5 + $0x8f0] sm:$0xff] }
 0x218   :  { %4147 = vmatpush1.bf16.msra.mxu0 %v7788_v61  ;;  %4362 = vmatpush1.bf16.msra.mxu1 %v7790_v62  ;;  %v402_v61 = vld [vmem:[#allocation5 + $0x778] sm:$0xff]  ;;  %v7852_v62 = vcombine.low %v389_v50, %v393_v51  ;;  %v7909_v51 = vcombine.high %v445_v44, %v449_v45 }
 0x219   :  { %4148 = vmatprep.subr.bf16.mxu0 %v7797_v63  ;;  %4363 = vmatprep.subr.bf16.mxu1 %v7799_v0  ;;  %v7854_v63 = vcombine.low %v390_v52, %v394_v53  ;;  %v7861_v0 = vcombine.high %v397_v58, %v401_v59  ;;  %v7863_v1 = vcombine.high %v398_v60, %v402_v61  ;;  %v453_v53 = vld [vmem:[#allocation5 + $0x910] sm:$0xff] }
 0x21c   :  { %4149 = vmatpush1.bf16.msra.mxu0 %v7796_v5  ;;  %4364 = vmatpush1.bf16.msra.mxu1 %v7798_v6  ;;  %v410_v5 = vld [vmem:[#allocation5 + $0x7b8] sm:$0xff]  ;;  %v7860_v6 = vcombine.low %v397_v58, %v401_v59 }
 0x21d   :  { %4150 = vmatprep.subr.bf16.mxu0 %v7805_v7  ;;  %4365 = vmatprep.subr.bf16.mxu1 %v7807_v8  ;;  %v7862_v7 = vcombine.low %v398_v60, %v402_v61  ;;  %v7869_v8 = vcombine.high %v405_v2, %v409_v3  ;;  %v7871_v9 = vcombine.high %v406_v4, %v410_v5  ;;  %v461_v61 = vld [vmem:[#allocation5 + $0x950] sm:$0xff] }
 0x220   :  { %4151 = vmatpush1.bf16.msra.mxu0 %v7804_v13  ;;  %4366 = vmatpush1.bf16.msra.mxu1 %v7806_v14  ;;  %v418_v13 = vld [vmem:[#allocation5 + $0x7f8] sm:$0xff]  ;;  %v7868_v14 = vcombine.low %v405_v2, %v409_v3 }
 0x221   :  { %4152 = vmatprep.subr.bf16.mxu0 %v7813_v15  ;;  %4367 = vmatprep.subr.bf16.mxu1 %v7815_v16  ;;  %v7870_v15 = vcombine.low %v406_v4, %v410_v5  ;;  %v7877_v16 = vcombine.high %v413_v10, %v417_v11  ;;  %v7879_v17 = vcombine.high %v414_v12, %v418_v13  ;;  %v469_v5 = vld [vmem:[#allocation5 + $0x990] sm:$0xff] }
 0x224   :  { %4153 = vmatpush1.bf16.msra.mxu0 %v7812_v21  ;;  %4368 = vmatpush1.bf16.msra.mxu1 %v7814_v22  ;;  %v426_v21 = vld [vmem:[#allocation5 + $0x838] sm:$0xff]  ;;  %v7876_v22 = vcombine.low %v413_v10, %v417_v11 }
 0x225   :  { %4154 = vmatprep.subr.bf16.mxu0 %v7821_v24  ;;  %4369 = vmatprep.subr.bf16.mxu1 %v7823_v25  ;;  %v7878_v24 = vcombine.low %v414_v12, %v418_v13  ;;  %v7885_v25 = vcombine.high %v421_v18, %v425_v19  ;;  %v7887_v26 = vcombine.high %v422_v20, %v426_v21  ;;  %v477_v13 = vld [vmem:[#allocation5 + $0x9d0] sm:$0xff] }
 0x228   :  { %4155 = vmatpush1.bf16.msra.mxu0 %v7820_v30  ;;  %4370 = vmatpush1.bf16.msra.mxu1 %v7822_v31  ;;  %v434_v30 = vld [vmem:[#allocation5 + $0x878] sm:$0xff]  ;;  %v7884_v31 = vcombine.low %v421_v18, %v425_v19 }
 0x229   :  { %4156 = vmatprep.subr.bf16.mxu0 %v7829_v32  ;;  %4371 = vmatprep.subr.bf16.mxu1 %v7831_v33  ;;  %v7886_v32 = vcombine.low %v422_v20, %v426_v21  ;;  %v7893_v33 = vcombine.high %v429_v27, %v433_v28  ;;  %v7895_v34 = vcombine.high %v430_v29, %v434_v30  ;;  %v485_v21 = vld [vmem:[#allocation5 + $0xa10] sm:$0xff] }
 0x22c   :  { %4157 = vmatpush1.bf16.msra.mxu0 %v7828_v38  ;;  %4372 = vmatpush1.bf16.msra.mxu1 %v7830_v39  ;;  %v438_v38 = vld [vmem:[#allocation5 + $0x898] sm:$0xff] }
 0x22d   :  { %4158 = vmatprep.subr.bf16.mxu0 %v7837_v40  ;;  %4373 = vmatprep.subr.bf16.mxu1 %v7839_v41  ;;  %v442_v39 = vld [vmem:[#allocation5 + $0x8b8] sm:$0xff]  ;;  %v7892_v40 = vcombine.low %v429_v27, %v433_v28  ;;  %v7894_v41 = vcombine.low %v430_v29, %v434_v30  ;;  %v493_v30 = vld [vmem:[#allocation5 + $0xa50] sm:$0xff] }
 0x22e   :  { %v7903_v43 = vcombine.high %v438_v38, %v442_v39  ;;  %v7902_v50 = vcombine.low %v438_v38, %v442_v39  ;;  %v501_v38 = vld [vmem:[#allocation5 + $0xa90] sm:$0xff] }
 0x22f   :  { %v505_v39 = vld [vmem:[#allocation5 + $0xab0] sm:$0xff] }
 0x230   :  { %4159 = vmatpush1.bf16.msra.mxu0 %v7836_v46  ;;  %4374 = vmatpush1.bf16.msra.mxu1 %v7838_v47  ;;  %v9119_v46 = vld [vmem:[#allocation2 + $0x14] ss:$36 sps:$4 sm:$0xff]   ;;  %v446_v47 = vld [vmem:[#allocation5 + $0x8d8] sm:$0xff] }
 0x231   :  { %4160 = vmatprep.subr.bf16.mxu0 %v7845_v48  ;;  %4375 = vmatprep.subr.bf16.mxu1 %v7847_v49  ;;  %v450_v48 = vld [vmem:[#allocation5 + $0x8f8] sm:$0xff]  ;;  %v7900_v49 = vcombine.low %v437_v35, %v441_v36 }
 0x232   :  { %v7911_v52 = vcombine.high %v446_v47, %v450_v48  ;;  %v7910_v58 = vcombine.low %v446_v47, %v450_v48  ;;  %v513_v47 = vld [vmem:[#allocation5 + $0xaf0] sm:$0xff]  ;;  %v510_v48 = vld [vmem:[#allocation5 + $0xad8] sm:$0xff] }
 0x234   :  { %4161 = vmatpush1.bf16.msra.mxu0 %v7844_v54  ;;  %4376 = vmatpush1.bf16.msra.mxu1 %v7846_v55  ;;  %v457_v54 = vld [vmem:[#allocation5 + $0x930] sm:$0xff]  ;;  %v454_v55 = vld [vmem:[#allocation5 + $0x918] sm:$0xff] }
 0x235   :  { %4162 = vmatprep.subr.bf16.mxu0 %v7853_v56  ;;  %4377 = vmatprep.subr.bf16.mxu1 %v7855_v57  ;;  %v458_v56 = vld [vmem:[#allocation5 + $0x938] sm:$0xff]  ;;  %v7908_v57 = vcombine.low %v445_v44, %v449_v45  ;;  %v7917_v59 = vcombine.high %v453_v53, %v457_v54  ;;  %v7965_v44 = vcombine.high %v501_v38, %v505_v39 }
 0x236   :  { %v7919_v60 = vcombine.high %v454_v55, %v458_v56  ;;  %v7918_v2 = vcombine.low %v454_v55, %v458_v56  ;;  %v521_v55 = vld [vmem:[#allocation5 + $0xb30] sm:$0xff]  ;;  %v518_v56 = vld [vmem:[#allocation5 + $0xb18] sm:$0xff] }
 0x238   :  { %4163 = vmatpush1.bf16.msra.mxu0 %v7852_v62  ;;  %4378 = vmatpush1.bf16.msra.mxu1 %v7854_v63  ;;  %v465_v62 = vld [vmem:[#allocation5 + $0x970] sm:$0xff]  ;;  %v462_v63 = vld [vmem:[#allocation5 + $0x958] sm:$0xff] }
 0x239   :  { %4164 = vmatprep.subr.bf16.mxu0 %v7861_v0  ;;  %4379 = vmatprep.subr.bf16.mxu1 %v7863_v1  ;;  %v466_v0 = vld [vmem:[#allocation5 + $0x978] sm:$0xff]  ;;  %v7916_v1 = vcombine.low %v453_v53, %v457_v54  ;;  %v7925_v3 = vcombine.high %v461_v61, %v465_v62  ;;  %v517_v54 = vld [vmem:[#allocation5 + $0xb10] sm:$0xff] }
 0x23a   :  { %v7927_v4 = vcombine.high %v462_v63, %v466_v0  ;;  %v7926_v10 = vcombine.low %v462_v63, %v466_v0  ;;  %v529_v63 = vld [vmem:[#allocation5 + $0xb70] sm:$0xff]  ;;  %v526_v0 = vld [vmem:[#allocation5 + $0xb58] sm:$0xff] }
 0x23c   :  { %4165 = vmatpush1.bf16.msra.mxu0 %v7860_v6  ;;  %4380 = vmatpush1.bf16.msra.mxu1 %v7862_v7  ;;  %v473_v6 = vld [vmem:[#allocation5 + $0x9b0] sm:$0xff]  ;;  %v470_v7 = vld [vmem:[#allocation5 + $0x998] sm:$0xff] }
 0x23d   :  { %4166 = vmatprep.subr.bf16.mxu0 %v7869_v8  ;;  %4381 = vmatprep.subr.bf16.mxu1 %v7871_v9  ;;  %v474_v8 = vld [vmem:[#allocation5 + $0x9b8] sm:$0xff]  ;;  %v7924_v9 = vcombine.low %v461_v61, %v465_v62  ;;  %v7933_v11 = vcombine.high %v469_v5, %v473_v6  ;;  %v525_v62 = vld [vmem:[#allocation5 + $0xb50] sm:$0xff] }
 0x23e   :  { %v7935_v12 = vcombine.high %v470_v7, %v474_v8  ;;  %v7934_v18 = vcombine.low %v470_v7, %v474_v8  ;;  %v537_v7 = vld [vmem:[#allocation5 + $0xbb0] sm:$0xff]  ;;  %v534_v8 = vld [vmem:[#allocation5 + $0xb98] sm:$0xff] }
 0x240   :  { %4167 = vmatpush1.bf16.msra.mxu0 %v7868_v14  ;;  %4382 = vmatpush1.bf16.msra.mxu1 %v7870_v15  ;;  %v481_v14 = vld [vmem:[#allocation5 + $0x9f0] sm:$0xff]  ;;  %v478_v15 = vld [vmem:[#allocation5 + $0x9d8] sm:$0xff] }
 0x241   :  { %4168 = vmatprep.subr.bf16.mxu0 %v7877_v16  ;;  %4383 = vmatprep.subr.bf16.mxu1 %v7879_v17  ;;  %v482_v16 = vld [vmem:[#allocation5 + $0x9f8] sm:$0xff]  ;;  %v7932_v17 = vcombine.low %v469_v5, %v473_v6  ;;  %v7941_v19 = vcombine.high %v477_v13, %v481_v14  ;;  %v533_v6 = vld [vmem:[#allocation5 + $0xb90] sm:$0xff] }
 0x242   :  { %v7943_v20 = vcombine.high %v478_v15, %v482_v16  ;;  %v7942_v27 = vcombine.low %v478_v15, %v482_v16  ;;  %v545_v15 = vld [vmem:[#allocation5 + $0xbf0] sm:$0xff]  ;;  %v542_v16 = vld [vmem:[#allocation5 + $0xbd8] sm:$0xff] }
 0x244   :  { %4169 = vmatpush1.bf16.msra.mxu0 %v7876_v22  ;;  %4384 = vmatpush1.bf16.msra.mxu1 %v7878_v24  ;;  %v489_v22 = vld [vmem:[#allocation5 + $0xa30] sm:$0xff]  ;;  %v486_v24 = vld [vmem:[#allocation5 + $0xa18] sm:$0xff] }
 0x245   :  { %4181 = vmatprep.subr.bf16.mxu0 %v7885_v25  ;;  %4396 = vmatprep.subr.bf16.mxu1 %v7887_v26  ;;  %v490_v25 = vld [vmem:[#allocation5 + $0xa38] sm:$0xff]  ;;  %v7940_v26 = vcombine.low %v477_v13, %v481_v14  ;;  %v7949_v28 = vcombine.high %v485_v21, %v489_v22  ;;  %v541_v14 = vld [vmem:[#allocation5 + $0xbd0] sm:$0xff] }
 0x246   :  { %v7951_v29 = vcombine.high %v486_v24, %v490_v25  ;;  %v7950_v35 = vcombine.low %v486_v24, %v490_v25  ;;  %v553_v24 = vld [vmem:[#allocation5 + $0xc30] sm:$0xff]  ;;  %v550_v25 = vld [vmem:[#allocation5 + $0xc18] sm:$0xff] }
 0x247   :  { %4171 = vmatmul.mubr.bf16.vlgmr.msra.gmra.mrb[4].mxu0 %v9118_v37  ;;  %4386 = vmatmul.mubr.bf16.vlgmr.msra.gmra.mrb[4].mxu1 %v9118_v37 }
 0x248   :  { %4182 = vmatpush1.bf16.msra.mxu0 %v7884_v31  ;;  %4397 = vmatpush1.bf16.msra.mxu1 %v7886_v32  ;;  %v497_v31 = vld [vmem:[#allocation5 + $0xa70] sm:$0xff]  ;;  %v494_v32 = vld [vmem:[#allocation5 + $0xa58] sm:$0xff] }
 0x249   :  { %4183 = vmatprep.subr.bf16.mxu0 %v7893_v33  ;;  %4398 = vmatprep.subr.bf16.mxu1 %v7895_v34  ;;  %v498_v33 = vld [vmem:[#allocation5 + $0xa78] sm:$0xff]  ;;  %v7948_v34 = vcombine.low %v485_v21, %v489_v22  ;;  %v7957_v36 = vcombine.high %v493_v30, %v497_v31  ;;  %v549_v22 = vld [vmem:[#allocation5 + $0xc10] sm:$0xff] }
 0x24a   :  { %4213 = vmatprep.mubr.bf16.mxu0 %v9119_v46  ;;  %4428 = vmatprep.mubr.bf16.mxu1 %v9119_v46  ;;  %v7959_v37 = vcombine.high %v494_v32, %v498_v33  ;;  %v509_v46 = vld [vmem:[#allocation5 + $0xad0] sm:$0xff] }
 0x24c   :  { %4184 = vmatpush1.bf16.msra.mxu0 %v7892_v40  ;;  %4399 = vmatpush1.bf16.msra.mxu1 %v7894_v41  ;;  %v502_v40 = vld [vmem:[#allocation5 + $0xa98] sm:$0xff] }
 0x24d   :  { %4185 = vmatprep.subr.bf16.mxu0 %v7901_v42  ;;  %4400 = vmatprep.subr.bf16.mxu1 %v7903_v43  ;;  %v506_v41 = vld [vmem:[#allocation5 + $0xab8] sm:$0xff]  ;;  %v7956_v42 = vcombine.low %v493_v30, %v497_v31  ;;  %v7958_v43 = vcombine.low %v494_v32, %v498_v33  ;;  %v557_v31 = vld [vmem:[#allocation5 + $0xc50] sm:$0xff] }
 0x24e   :  { %v7967_v45 = vcombine.high %v502_v40, %v506_v41  ;;  %v561_v32 = vld [vmem:[#allocation5 + $0xc70] sm:$0xff]  ;;  %v558_v33 = vld [vmem:[#allocation5 + $0xc58] sm:$0xff] }
 0x250   :  { %4186 = vmatpush1.bf16.msra.mxu0 %v7900_v49  ;;  %4401 = vmatpush1.bf16.msra.mxu1 %v7902_v50  ;;  %v514_v49 = vld [vmem:[#allocation5 + $0xaf8] sm:$0xff]  ;;  %v7964_v50 = vcombine.low %v501_v38, %v505_v39  ;;  %v565_v39 = vld [vmem:[#allocation5 + $0xc90] sm:$0xff] }
 0x251   :  { %4187 = vmatprep.subr.bf16.mxu0 %v7909_v51  ;;  %4402 = vmatprep.subr.bf16.mxu1 %v7911_v52  ;;  %v7966_v51 = vcombine.low %v502_v40, %v506_v41  ;;  %v7973_v52 = vcombine.high %v509_v46, %v513_v47  ;;  %v7975_v53 = vcombine.high %v510_v48, %v514_v49  ;;  %v569_v40 = vld [vmem:[#allocation5 + $0xcb0] sm:$0xff]  ;;  %v9120_v41 = vld [vmem:[#allocation2 + $0x10] ss:$36 sps:$4 sm:$0xff]  }
 0x254   :  { %4188 = vmatpush1.bf16.msra.mxu0 %v7908_v57  ;;  %4403 = vmatpush1.bf16.msra.mxu1 %v7910_v58  ;;  %v522_v57 = vld [vmem:[#allocation5 + $0xb38] sm:$0xff]  ;;  %v7972_v58 = vcombine.low %v509_v46, %v513_v47  ;;  %v8029_v46 = vcombine.high %v565_v39, %v569_v40 }
 0x255   :  { %4189 = vmatprep.subr.bf16.mxu0 %v7917_v59  ;;  %4404 = vmatprep.subr.bf16.mxu1 %v7919_v60  ;;  %v7974_v59 = vcombine.low %v510_v48, %v514_v49  ;;  %v7981_v60 = vcombine.high %v517_v54, %v521_v55  ;;  %v7983_v61 = vcombine.high %v518_v56, %v522_v57  ;;  %v573_v48 = vld [vmem:[#allocation5 + $0xcd0] sm:$0xff] }
 0x256   :  { %v577_v49 = vld [vmem:[#allocation5 + $0xcf0] sm:$0xff] }
 0x258   :  { %4190 = vmatpush1.bf16.msra.mxu0 %v7916_v1  ;;  %4405 = vmatpush1.bf16.msra.mxu1 %v7918_v2  ;;  %v530_v1 = vld [vmem:[#allocation5 + $0xb78] sm:$0xff]  ;;  %v7980_v2 = vcombine.low %v517_v54, %v521_v55  ;;  %v8037_v55 = vcombine.high %v573_v48, %v577_v49 }
 0x259   :  { %4191 = vmatprep.subr.bf16.mxu0 %v7925_v3  ;;  %4406 = vmatprep.subr.bf16.mxu1 %v7927_v4  ;;  %v7982_v3 = vcombine.low %v518_v56, %v522_v57  ;;  %v7989_v4 = vcombine.high %v525_v62, %v529_v63  ;;  %v7991_v5 = vcombine.high %v526_v0, %v530_v1  ;;  %v581_v57 = vld [vmem:[#allocation5 + $0xd10] sm:$0xff] }
 0x25c   :  { %4192 = vmatpush1.bf16.msra.mxu0 %v7924_v9  ;;  %4407 = vmatpush1.bf16.msra.mxu1 %v7926_v10  ;;  %v538_v9 = vld [vmem:[#allocation5 + $0xbb8] sm:$0xff]  ;;  %v7988_v10 = vcombine.low %v525_v62, %v529_v63  ;;  %v9553_v62 = vld [vmem:[#allocation5 + $0xd50] sm:$0xff] }
 0x25d   :  { %4193 = vmatprep.subr.bf16.mxu0 %v7933_v11  ;;  %4408 = vmatprep.subr.bf16.mxu1 %v7935_v12  ;;  %v7990_v11 = vcombine.low %v526_v0, %v530_v1  ;;  %v7997_v12 = vcombine.high %v533_v6, %v537_v7  ;;  %v7999_v13 = vcombine.high %v534_v8, %v538_v9  ;;  %v9555_v63 = vld [vmem:[#allocation5 + $0xd70] sm:$0xff] }
 0x260   :  { %4194 = vmatpush1.bf16.msra.mxu0 %v7932_v17  ;;  %4409 = vmatpush1.bf16.msra.mxu1 %v7934_v18  ;;  %v546_v17 = vld [vmem:[#allocation5 + $0xbf8] sm:$0xff]  ;;  %v7996_v18 = vcombine.low %v533_v6, %v537_v7  ;;  %v9563_v6 = vld [vmem:[#allocation5 + $0xdb0] sm:$0xff] }
 0x261   :  { %4195 = vmatprep.subr.bf16.mxu0 %v7941_v19  ;;  %4410 = vmatprep.subr.bf16.mxu1 %v7943_v20  ;;  %v7998_v19 = vcombine.low %v534_v8, %v538_v9  ;;  %v8005_v20 = vcombine.high %v541_v14, %v545_v15  ;;  %v8007_v21 = vcombine.high %v542_v16, %v546_v17  ;;  %v9565_v7 = vld [vmem:[#allocation5 + $0xd98] sm:$0xff]  ;;  %v9569_v9 = vld [vmem:[#allocation5 + $0xdd0] sm:$0xff] }
 0x262   :  { %v9567_v8 = vld [vmem:[#allocation5 + $0xdb8] sm:$0xff] }
 0x264   :  { %4196 = vmatpush1.bf16.msra.mxu0 %v7940_v26  ;;  %4411 = vmatpush1.bf16.msra.mxu1 %v7942_v27  ;;  %v554_v26 = vld [vmem:[#allocation5 + $0xc38] sm:$0xff]  ;;  %v8004_v27 = vcombine.low %v541_v14, %v545_v15  ;;  %v9577_v14 = vld [vmem:[#allocation5 + $0xe10] sm:$0xff] }
 0x265   :  { %4197 = vmatprep.subr.bf16.mxu0 %v7949_v28  ;;  %4412 = vmatprep.subr.bf16.mxu1 %v7951_v29  ;;  %v8006_v28 = vcombine.low %v542_v16, %v546_v17  ;;  %v8013_v29 = vcombine.high %v549_v22, %v553_v24  ;;  %v8015_v30 = vcombine.high %v550_v25, %v554_v26  ;;  %v9579_v15 = vld [vmem:[#allocation5 + $0xe30] sm:$0xff] }
 0x266   :  { %v8052_v17 = vcombine.low %v9553_v62, %v9555_v63 }
 0x268   :  { %4198 = vmatpush1.bf16.msra.mxu0 %v7948_v34  ;;  %4413 = vmatpush1.bf16.msra.mxu1 %v7950_v35  ;;  %v562_v34 = vld [vmem:[#allocation5 + $0xc78] sm:$0xff]  ;;  %v8012_v35 = vcombine.low %v549_v22, %v553_v24 }
 0x269   :  { %4199 = vmatprep.subr.bf16.mxu0 %v7957_v36  ;;  %4414 = vmatprep.subr.bf16.mxu1 %v7959_v37  ;;  %v8014_v36 = vcombine.low %v550_v25, %v554_v26  ;;  %v8021_v37 = vcombine.high %v557_v31, %v561_v32  ;;  %v8023_v38 = vcombine.high %v558_v33, %v562_v34 }
 0x26c   :  { %4200 = vmatpush1.bf16.msra.mxu0 %v7956_v42  ;;  %4415 = vmatpush1.bf16.msra.mxu1 %v7958_v43  ;;  %v566_v42 = vld [vmem:[#allocation5 + $0xc98] sm:$0xff] }
 0x26d   :  { %4201 = vmatprep.subr.bf16.mxu0 %v7965_v44  ;;  %4416 = vmatprep.subr.bf16.mxu1 %v7967_v45  ;;  %v570_v43 = vld [vmem:[#allocation5 + $0xcb8] sm:$0xff]  ;;  %v8020_v44 = vcombine.low %v557_v31, %v561_v32  ;;  %v8022_v45 = vcombine.low %v558_v33, %v562_v34  ;;  %v8063_v31 = vcombine.high %v9565_v7, %v9567_v8  ;;  %v9613_v34 = vld [vmem:[#allocation5 + $0xe90] sm:$0xff] }
 0x26e   :  { %v8031_v47 = vcombine.high %v566_v42, %v570_v43  ;;  %v8030_v54 = vcombine.low %v566_v42, %v570_v43  ;;  %v9629_v42 = vld [vmem:[#allocation5 + $0xed0] sm:$0xff] }
 0x26f   :  { %v9631_v43 = vld [vmem:[#allocation5 + $0xef0] sm:$0xff] }
 0x270   :  { %4202 = vmatpush1.bf16.msra.mxu0 %v7964_v50  ;;  %4417 = vmatpush1.bf16.msra.mxu1 %v7966_v51  ;;  %v9121_v50 = vld [vmem:[#allocation2 + $0x1c] ss:$36 sps:$4 sm:$0xff]  }
 0x271   :  { %4203 = vmatprep.subr.bf16.mxu0 %v7973_v52  ;;  %4418 = vmatprep.subr.bf16.mxu1 %v7975_v53  ;;  %v574_v51 = vld [vmem:[#allocation5 + $0xcd8] sm:$0xff]  ;;  %v8028_v53 = vcombine.low %v565_v39, %v569_v40  ;;  %v8076_v39 = vcombine.low %v9577_v14, %v9579_v15  ;;  %v8077_v40 = vcombine.high %v9577_v14, %v9579_v15 }
 0x272   :  { %v578_v52 = vld [vmem:[#allocation5 + $0xcf8] sm:$0xff] }
 0x273   :  { %v8039_v56 = vcombine.high %v574_v51, %v578_v52  ;;  %v8038_v0 = vcombine.low %v574_v51, %v578_v52 }
 0x274   :  { %4204 = vmatpush1.bf16.msra.mxu0 %v7972_v58  ;;  %4419 = vmatpush1.bf16.msra.mxu1 %v7974_v59  ;;  %v585_v58 = vld [vmem:[#allocation5 + $0xd30] sm:$0xff]  ;;  %v582_v59 = vld [vmem:[#allocation5 + $0xd18] sm:$0xff] }
 0x275   :  { %4205 = vmatprep.subr.bf16.mxu0 %v7981_v60  ;;  %4420 = vmatprep.subr.bf16.mxu1 %v7983_v61  ;;  %v586_v60 = vld [vmem:[#allocation5 + $0xd38] sm:$0xff]  ;;  %v8036_v61 = vcombine.low %v573_v48, %v577_v49  ;;  %v8045_v1 = vcombine.high %v581_v57, %v585_v58 }
 0x276   :  { %v8046_v16 = vcombine.low %v582_v59, %v586_v60  ;;  %v9641_v48 = vld [vmem:[#allocation5 + $0xef8] sm:$0xff] }
 0x278   :  { %4206 = vmatpush1.bf16.msra.mxu0 %v7980_v2  ;;  %4421 = vmatpush1.bf16.msra.mxu1 %v7982_v3  ;;  %v9557_v2 = vld [vmem:[#allocation5 + $0xd58] sm:$0xff] }
 0x279   :  { %4207 = vmatprep.subr.bf16.mxu0 %v7989_v4  ;;  %4422 = vmatprep.subr.bf16.mxu1 %v7991_v5  ;;  %v9559_v3 = vld [vmem:[#allocation5 + $0xd78] sm:$0xff]  ;;  %v9561_v4 = vld [vmem:[#allocation5 + $0xd90] sm:$0xff]  ;;  %v8047_v5 = vcombine.high %v582_v59, %v586_v60 }
 0x27a   :  { %v8054_v22 = vcombine.low %v9557_v2, %v9559_v3  ;;  %v8055_v24 = vcombine.high %v9557_v2, %v9559_v3  ;;  %v8060_v25 = vcombine.low %v9561_v4, %v9563_v6  ;;  %v8061_v26 = vcombine.high %v9561_v4, %v9563_v6 }
 0x27c   :  { %4208 = vmatpush1.bf16.msra.mxu0 %v7988_v10  ;;  %4423 = vmatpush1.bf16.msra.mxu1 %v7990_v11  ;;  %v9571_v10 = vld [vmem:[#allocation5 + $0xdf0] sm:$0xff]  ;;  %v9573_v11 = vld [vmem:[#allocation5 + $0xdd8] sm:$0xff] }
 0x27d   :  { %4209 = vmatprep.subr.bf16.mxu0 %v7997_v12  ;;  %4424 = vmatprep.subr.bf16.mxu1 %v7999_v13  ;;  %v8044_v12 = vcombine.low %v581_v57, %v585_v58  ;;  %v9575_v13 = vld [vmem:[#allocation5 + $0xdf8] sm:$0xff]  ;;  %v8068_v32 = vcombine.low %v9569_v9, %v9571_v10  ;;  %v8069_v33 = vcombine.high %v9569_v9, %v9571_v10 }
 0x280   :  { %4210 = vmatpush1.bf16.msra.mxu0 %v7996_v18  ;;  %4425 = vmatpush1.bf16.msra.mxu1 %v7998_v19  ;;  %v8053_v18 = vcombine.high %v9553_v62, %v9555_v63  ;;  %v9585_v19 = vld [vmem:[#allocation5 + $0xe18] sm:$0xff] }
 0x281   :  { %4211 = vmatprep.subr.bf16.mxu0 %v8005_v20  ;;  %4426 = vmatprep.subr.bf16.mxu1 %v8007_v21  ;;  %v9587_v20 = vld [vmem:[#allocation5 + $0xe38] sm:$0xff]  ;;  %v9589_v21 = vld [vmem:[#allocation5 + $0xe50] sm:$0xff] }
 0x284   :  { %4212 = vmatpush1.bf16.msra.mxu0 %v8004_v27  ;;  %4427 = vmatpush1.bf16.msra.mxu1 %v8006_v28  ;;  %v9599_v27 = vld [vmem:[#allocation5 + $0xe70] sm:$0xff]  ;;  %v9601_v28 = vld [vmem:[#allocation5 + $0xe58] sm:$0xff] }
 0x285   :  { %4224 = vmatprep.subr.bf16.mxu0 %v8013_v29  ;;  %4439 = vmatprep.subr.bf16.mxu1 %v8015_v30  ;;  %v9603_v29 = vld [vmem:[#allocation5 + $0xe78] sm:$0xff]  ;;  %v8062_v30 = vcombine.low %v9565_v7, %v9567_v8 }
 0x286   :  { %v10137_v14 = vcombine.high %v9601_v28, %v9603_v29 }
 0x287   :  { %4214 = vmatmul.mubr.bf16.vlgmr.msra.gmra.mrb[4].mxu0 %v9120_v41  ;;  %4429 = vmatmul.mubr.bf16.vlgmr.msra.gmra.mrb[4].mxu1 %v9120_v41  ;;  %v9627_v41 = vld [vmem:[#allocation5 + $0xeb8] sm:$0xff] }
 0x288   :  { %4225 = vmatpush1.bf16.msra.mxu0 %v8012_v35  ;;  %4440 = vmatpush1.bf16.msra.mxu1 %v8014_v36  ;;  %v9615_v35 = vld [vmem:[#allocation5 + $0xeb0] sm:$0xff]  ;;  %v9617_v36 = vld [vmem:[#allocation5 + $0xe98] sm:$0xff] }
 0x289   :  { %4226 = vmatprep.subr.bf16.mxu0 %v8021_v37  ;;  %4441 = vmatprep.subr.bf16.mxu1 %v8023_v38  ;;  %v8070_v37 = vcombine.low %v9573_v11, %v9575_v13  ;;  %v8071_v38 = vcombine.high %v9573_v11, %v9575_v13 }
 0x28a   :  { %4256 = vmatprep.mubr.bf16.mxu0 %v9121_v50  ;;  %4471 = vmatprep.mubr.bf16.mxu1 %v9121_v50 }
 0x28c   :  { %4227 = vmatpush1.bf16.msra.mxu0 %v8020_v44  ;;  %4442 = vmatpush1.bf16.msra.mxu1 %v8022_v45  ;;  %v8078_v44 = vcombine.low %v9585_v19, %v9587_v20  ;;  %v8079_v45 = vcombine.high %v9585_v19, %v9587_v20 }
 0x28d   :  { %4228 = vmatprep.subr.bf16.mxu0 %v8029_v46  ;;  %4443 = vmatprep.subr.bf16.mxu1 %v8031_v47  ;;  %v9639_v47 = vld [vmem:[#allocation5 + $0xed8] sm:$0xff] }
 0x290   :  { %4229 = vmatpush1.bf16.msra.mxu0 %v8028_v53  ;;  %4444 = vmatpush1.bf16.msra.mxu1 %v8030_v54 }
 0x291   :  { %4230 = vmatprep.subr.bf16.mxu0 %v8037_v55  ;;  %4445 = vmatprep.subr.bf16.mxu1 %v8039_v56 }
 0x294   :  { %4231 = vmatpush1.bf16.msra.mxu0 %v8036_v61  ;;  %4446 = vmatpush1.bf16.msra.mxu1 %v8038_v0 }
 0x295   :  { %4232 = vmatprep.subr.bf16.mxu0 %v8045_v1  ;;  %4447 = vmatprep.subr.bf16.mxu1 %v8047_v5 }
 0x298   :  { %4233 = vmatpush1.bf16.msra.mxu0 %v8044_v12  ;;  %4448 = vmatpush1.bf16.msra.mxu1 %v8046_v16 }
 0x299   :  { %4234 = vmatprep.subr.bf16.mxu0 %v8053_v18  ;;  %4449 = vmatprep.subr.bf16.mxu1 %v8055_v24 }
 0x29a   :  { %v9643_v49 = vpop.f32.mrb[0].mxu0  ;;  %v9653_v54 = vpop.f32.mrb[0].mxu1 }
 0x29b   :  { %v9655_v55 = vpop.f32.mrb[1].mxu0  ;;  %v4525_v60 = vmul.f32 %v9643_v49, %v9643_v49  ;;  %v4527_v61 = vmul.f32 %v9653_v54, %v9653_v54  ;;  %v9671_v63 = vpop.f32.mrb[1].mxu1 }
 0x29c   :  { %v4526_v62 = vmul.f32 %v9655_v55, %v9655_v55  ;;  %v9673_v0 = vpop.f32.mrb[2].mxu0  ;;  %4235 = vmatpush1.bf16.msra.mxu0 %v8052_v17  ;;  %v4528_v2 = vmul.f32 %v9671_v63, %v9671_v63  ;;  %v9683_v12 = vpop.f32.mrb[2].mxu1  ;;  %4450 = vmatpush1.bf16.msra.mxu1 %v8054_v22 }
 0x29d   :  { %v4533_v3 = vmul.f32 %v9673_v0, %v9673_v0  ;;  %v4541_v5 = vadd.f32 %v9673_v0, %v9643_v49  ;;  %v9685_v16 = vpop.f32.mrb[3].mxu0  ;;  %4236 = vmatprep.subr.bf16.mxu0 %v8061_v26  ;;  %v4535_v17 = vmul.f32 %v9683_v12, %v9683_v12  ;;  %v4555_v18 = vadd.f32 %v9683_v12, %v9653_v54  ;;  %v9695_v1 = vpop.f32.mrb[3].mxu1 }
 0x29e   :  { %v4534_v24 = vmul.f32 %v9685_v16, %v9685_v16  ;;  %v4548_v23 = vadd.f32 %v9685_v16, %v9655_v55  ;;  %4451 = vmatprep.subr.bf16.mxu1 %v8063_v31  ;;  %v4536_v26 = vmul.f32 %v9695_v1, %v9695_v1  ;;  %v4562_v57 = vadd.f32 %v9695_v1, %v9671_v63 }
 0x29f   :  { %v4542_v59 = vrot.slane %v4541_v5, 4  ;;  %v4597_v22 = vadd.f32 %v4533_v3, %v4525_v60  ;;  %v4556_v56 = vrot.slane %v4555_v18, 4  ;;  %v4611_v58 = vadd.f32 %v4535_v17, %v4527_v61 }
 0x2a0   :  { %v4549_v53 = vrot.slane %v4548_v23, 4  ;;  %v4604_v51 = vadd.f32 %v4534_v24, %v4526_v62  ;;  %4237 = vmatpush1.bf16.msra.mxu0 %v8060_v25  ;;  %v4563_v46 = vrot.slane %v4562_v57, 4  ;;  %v4618_v31 = vadd.f32 %v4536_v26, %v4528_v2  ;;  %4452 = vmatpush1.bf16.msra.mxu1 %v8062_v30 }
 0x2a1   :  { %v4543_v50 = vadd.f32 %v4542_v59, %v4541_v5  ;;  %v4598_v52 = vrot.slane %v4597_v22, 4  ;;  %4238 = vmatprep.subr.bf16.mxu0 %v8069_v33  ;;  %v4557_v60 = vadd.f32 %v4556_v56, %v4555_v18  ;;  %v4612_v61 = vrot.slane %v4611_v58, 4  ;;  %4453 = vmatprep.subr.bf16.mxu1 %v8071_v38 }
 0x2a2   :  { %v4550_v3 = vadd.f32 %v4549_v53, %v4548_v23  ;;  %v4605_v62 = vrot.slane %v4604_v51, 4  ;;  %v4564_v25 = vadd.f32 %v4563_v46, %v4562_v57  ;;  %v4619_v59 = vrot.slane %v4618_v31, 4 }
 0x2a3   :  { %v4544_v4 = vrot.slane %v4543_v50, 2  ;;  %v4599_v6 = vadd.f32 %v4598_v52, %v4597_v22  ;;  %v4558_v2 = vrot.slane %v4557_v60, 2  ;;  %v4613_v5 = vadd.f32 %v4612_v61, %v4611_v58 }
 0x2a4   :  { %v4551_v7 = vrot.slane %v4550_v3, 2  ;;  %v4606_v8 = vadd.f32 %v4605_v62, %v4604_v51  ;;  %4239 = vmatpush1.bf16.msra.mxu0 %v8068_v32  ;;  %v4565_v23 = vrot.slane %v4564_v25, 2  ;;  %v4620_v53 = vadd.f32 %v4619_v59, %v4618_v31  ;;  %4454 = vmatpush1.bf16.msra.mxu1 %v8070_v37 }
 0x2a5   :  { %v4545_v30 = vadd.f32 %v4544_v4, %v4543_v50  ;;  %v4600_v33 = vrot.slane %v4599_v6, 2  ;;  %4240 = vmatprep.subr.bf16.mxu0 %v8077_v40  ;;  %v4559_v38 = vadd.f32 %v4558_v2, %v4557_v60  ;;  %v4614_v46 = vrot.slane %v4613_v5, 2  ;;  %4455 = vmatprep.subr.bf16.mxu1 %v8079_v45 }
 0x2a6   :  { %v4552_v52 = vadd.f32 %v4551_v7, %v4550_v3  ;;  %v4607_v51 = vrot.slane %v4606_v8, 2  ;;  %v4566_v32 = vadd.f32 %v4565_v23, %v4564_v25  ;;  %v4621_v50 = vrot.slane %v4620_v53, 2 }
 0x2a7   :  { %v4546_v9 = vrot.slane %v4545_v30, 1  ;;  %v4601_v10 = vadd.f32 %v4600_v33, %v4599_v6  ;;  %v4560_v56 = vrot.slane %v4559_v38, 1  ;;  %v4615_v57 = vadd.f32 %v4614_v46, %v4613_v5  ;;  %v649_v33 = vld [vmem:[#allocation5 + $0xf30] sm:$0xff] }
 0x2a8   :  { %v4553_v11 = vrot.slane %v4552_v52, 1  ;;  %v4608_v13 = vadd.f32 %v4607_v51, %v4606_v8  ;;  %4241 = vmatpush1.bf16.msra.mxu0 %v8076_v39  ;;  %v4567_v58 = vrot.slane %v4566_v32, 1  ;;  %v4622_v17 = vadd.f32 %v4621_v50, %v4620_v53  ;;  %4456 = vmatpush1.bf16.msra.mxu1 %v8078_v44  ;;  %v646_v53 = vld [vmem:[#allocation5 + $0xf18] sm:$0xff] }
 0x2a9   :  { %v4547_v37 = vadd.f32 %v4546_v9, %v4545_v30  ;;  %v4602_v40 = vrot.slane %v4601_v10, 1  ;;  %v10136_v45 = vcombine.high %v9589_v21, %v9599_v27  ;;  %v4561_v18 = vadd.f32 %v4560_v56, %v4559_v38  ;;  %4457 = vmatprep.subr.bf16.mxu1 %v10137_v14  ;;  %v645_v30 = vld [vmem:[#allocation5 + $0xf10] sm:$0xff]  ;;  %v650_v38 = vld [vmem:[#allocation5 + $0xf38] sm:$0xff] }
 0x2aa   :  { %v4616_v24 = vrot.slane %v4615_v57, 1  ;;  %v4554_v22 = vadd.f32 %v4553_v11, %v4552_v52  ;;  %v4609_v26 = vrot.slane %v4608_v13, 1  ;;  %v4568_v31 = vadd.f32 %v4567_v58, %v4566_v32  ;;  %v657_v58 = vld [vmem:[#allocation5 + $0xf70] sm:$0xff] }
 0x2ab   :  { %4242 = vmatprep.subr.bf16.mxu0 %v10136_v45  ;;  %v4603_v15 = vadd.f32 %v4602_v40, %v4601_v10  ;;  %v9737_v39 = vmul.f32 0.0625, %v4547_v37  ;;  %v4623_v60 = vrot.slane %v4622_v17, 1  ;;  %v9739_v19 = vmul.f32 0.0625, %v4561_v18  ;;  %v653_v40 = vld [vmem:[#allocation5 + $0xf50] sm:$0xff]  ;;  %v658_v45 = vld [vmem:[#allocation5 + $0xf78] sm:$0xff] }
 0x2ac   :  { %v4617_v61 = vadd.f32 %v4616_v24, %v4615_v57  ;;  %v4610_v20 = vadd.f32 %v4609_v26, %v4608_v13  ;;  %v9741_v44 = vmul.f32 0.0625, %v4554_v22  ;;  %v10138_v3 = vcombine.low %v9589_v21, %v9599_v27  ;;  %v665_v14 = vld [vmem:[#allocation5 + $0xfb0] sm:$0xff] }
 0x2ad   :  { %v4662_v62 = vmul.f32 0.0625, %v4603_v15  ;;  %v4670_v4 = vmul.f32 %v9737_v39, %v9737_v39  ;;  %v4624_v6 = vadd.f32 %v4623_v60, %v4622_v17  ;;  %v9748_v25 = vmul.f32 0.0625, %v4568_v31  ;;  %v662_v15 = vld [vmem:[#allocation5 + $0xf98] sm:$0xff] }
 0x2ae   :  { %4243 = vmatpush1.bf16.msra.mxu0 %v10138_v3  ;;  %v10139_v59 = vcombine.low %v9601_v28, %v9603_v29  ;;  %v10140_v2 = vcombine.high %v9613_v34, %v9615_v35  ;;  %v4664_v5 = vmul.f32 0.0625, %v4617_v61  ;;  %v4672_v21 = vmul.f32 %v9739_v19, %v9739_v19  ;;  %v666_v31 = vld [vmem:[#allocation5 + $0xfb8] sm:$0xff] }
 0x2af   :  { %v4663_v27 = vmul.f32 0.0625, %v4610_v20  ;;  %v4671_v7 = vmul.f32 %v9741_v44, %v9741_v44  ;;  %v10141_v8 = vcombine.high %v9617_v36, %v9627_v41  ;;  %v4678_v28 = vsub.f32 %v4662_v62, %v4670_v4 }
 0x2b0   :  { %4458 = vmatpush1.bf16.msra.mxu1 %v10139_v59  ;;  %4244 = vmatprep.subr.bf16.mxu0 %v10140_v2  ;;  %v4665_v29 = vmul.f32 0.0625, %v4624_v6  ;;  %v4673_v23 = vmul.f32 %v9748_v25, %v9748_v25  ;;  %v4680_v46 = vsub.f32 %v4664_v5, %v4672_v21  ;;  %v10142_v51 = vcombine.low %v9613_v34, %v9615_v35  ;;  %v669_v59 = vld [vmem:[#allocation5 + $0xfd0] sm:$0xff]  ;;  %v670_v5 = vld [vmem:[#allocation5 + $0xfd8] sm:$0xff] }
 0x2b1   :  { %4459 = vmatprep.subr.bf16.mxu1 %v10141_v8  ;;  %v4679_v52 = vsub.f32 %v4663_v27, %v4671_v7  ;;  %v8100_v9 = vcombine.low %v9629_v42, %v9631_v43  ;;  %v4686_v10 = vmax.f32 %v4678_v28, 0.0  ;;  %v10143_v50 = vcombine.low %v9617_v36, %v9627_v41  ;;  %v654_v41 = vld [vmem:[#allocation5 + $0xf58] sm:$0xff]  ;;  %v673_v2 = vld [vmem:[#allocation5 + $0xff0] sm:$0xff] }
 0x2b2   :  { %4245 = vmatpush1.bf16.msra.mxu0 %v10142_v51  ;;  %v4681_v32 = vsub.f32 %v4665_v29, %v4673_v23  ;;  %v10144_v56 = vcombine.high %v9629_v42, %v9631_v43  ;;  %v8102_v57 = vcombine.low %v9639_v47, %v9641_v48  ;;  %v8109_v11 = vcombine.high %v645_v30, %v649_v33  ;;  %v674_v21 = vld [vmem:[#allocation5 + $0xff8] sm:$0xff]  ;;  %v677_v29 = vld [vmem:[#allocation5 + $0x1010] sm:$0xff] }
 0x2b3   :  { %v4688_v13 = vmax.f32 %v4680_v46, 0.0  ;;  %v4687_v34 = vmax.f32 %v4679_v52, 0.0  ;;  %v10145_v35 = vcombine.high %v9639_v47, %v9641_v48  ;;  %v8111_v37 = vcombine.high %v646_v53, %v650_v38  ;;  %v661_v48 = vld [vmem:[#allocation5 + $0xf90] sm:$0xff]  ;;  %v682_v46 = vld [vmem:[#allocation5 + $0x1038] sm:$0xff] }
 0x2b4   :  { %4460 = vmatpush1.bf16.msra.mxu1 %v10143_v50  ;;  %4246 = vmatprep.subr.bf16.mxu0 %v10144_v56  ;;  %v4695_v17 = vadd.f32 1e-05, %v4686_v10  ;;  %v4689_v36 = vmax.f32 %v4681_v32, 0.0  ;;  %v8108_v43 = vcombine.low %v645_v30, %v649_v33  ;;  %v8110_v24 = vcombine.low %v646_v53, %v650_v38  ;;  %v681_v23 = vld [vmem:[#allocation5 + $0x1030] sm:$0xff]  ;;  %v678_v38 = vld [vmem:[#allocation5 + $0x1018] sm:$0xff] }
 0x2b5   :  { %4461 = vmatprep.subr.bf16.mxu1 %v10145_v35  ;;  %v4697_v18 = vadd.f32 1e-05, %v4688_v13  ;;  %v4696_v42 = vadd.f32 1e-05, %v4687_v34  ;;  %v8117_v26 = vcombine.high %v653_v40, %v657_v58  ;;  %v8119_v47 = vcombine.high %v654_v41, %v658_v45  ;;  %v685_v13 = vld [vmem:[#allocation5 + $0x1050] sm:$0xff] }
 0x2b6   :  { %4247 = vmatpush1.bf16.msra.mxu0 %v8100_v9  ;;  %9089 = vrsqrt.f32 %v4695_v17  ;;  %v4698_v22 = vadd.f32 1e-05, %v4689_v36  ;;  %v9372_v60 = vmov 1966171168   ;;  %v4726_v20 = vlaneseq  ;;  %v689_v34 = vld [vmem:[#allocation5 + $0x1070] sm:$0xff] }
 0x2b7   :  { %4248 = vmatprep.subr.bf16.mxu0 %v8109_v11  ;;  %9091 = vrsqrt.f32 %v4697_v18  ;;  %v4724_v61 = vunpack.c.l.s4 %v9372_v60  ;;  %v8116_v3 = vcombine.low %v653_v40, %v657_v58  ;;  %v8118_v62 = vcombine.low %v654_v41, %v658_v45  ;;  %v690_v40 = vld [vmem:[#allocation5 + $0x1078] sm:$0xff]  ;;  %v701_v60 = vld [vmem:[#allocation5 + $0x10d0] sm:$0xff] }
 0x2b8   :  { %4462 = vmatpush1.bf16.msra.mxu1 %v8102_v57  ;;  %9093 = vrsqrt.f32 %v4696_v42  ;;  %v8125_v4 = vcombine.high %v661_v48, %v665_v14  ;;  %v8127_v6 = vcombine.high %v662_v15, %v666_v31  ;;  %v9781_v7 = vshrl.u32 %v4726_v20, 7  ;;  %v693_v42 = vld [vmem:[#allocation5 + $0x1090] sm:$0xff] }
 0x2b9   :  { %4463 = vmatprep.subr.bf16.mxu1 %v8111_v37  ;;  %9095 = vrsqrt.f32 %v4698_v22  ;;  %v4725_v27 = vunpack.c.0.s8 %v4724_v61  ;;  %v8124_v8 = vcombine.low %v661_v48, %v665_v14  ;;  %v8126_v30 = vcombine.low %v662_v15, %v666_v31  ;;  %v686_v37 = vld [vmem:[#allocation5 + $0x1058] sm:$0xff]  ;;  %v9122_v22 = vld [vmem:[#allocation2 + $0x18] ss:$36 sps:$4 sm:$0xff]  }
 0x2ba   :  { %4249 = vmatpush1.bf16.msra.mxu0 %v8108_v43  ;;  %v8133_v33 = vcombine.high %v669_v59, %v673_v2  ;;  %v8135_v28 = vcombine.high %v670_v5, %v674_v21  ;;  %v8132_v9 = vcombine.low %v669_v59, %v673_v2  ;;  %v8134_v32 = vcombine.low %v670_v5, %v674_v21  ;;  %v697_v43 = vld [vmem:[#allocation5 + $0x10b0] sm:$0xff] }
 0x2bb   :  { %4250 = vmatprep.subr.bf16.mxu0 %v8117_v26  ;;  %v9784_v51 = vsub.s32 %v4725_v27, %v9781_v7  ;;  %v8141_v50 = vcombine.high %v677_v29, %v681_v23  ;;  %v8143_v11 = vcombine.high %v678_v38, %v682_v46  ;;  %v8140_v17 = vcombine.low %v677_v29, %v681_v23  ;;  %v694_v26 = vld [vmem:[#allocation5 + $0x1098] sm:$0xff]  ;;  %v705_v61 = vld [vmem:[#allocation5 + $0x10f0] sm:$0xff] }
 0x2bc   :  { %4464 = vmatpush1.bf16.msra.mxu1 %v8110_v24  ;;  %v8142_v41 = vcombine.low %v678_v38, %v682_v46  ;;  %v8149_v45 = vcombine.high %v685_v13, %v689_v34  ;;  %v8151_v18 = vcombine.high %v686_v37, %v690_v40  ;;  %v8148_v48 = vcombine.low %v685_v13, %v689_v34  ;;  %v709_v5 = vld [vmem:[#allocation5 + $0x1110] sm:$0xff]  ;;  %v710_v27 = vld [vmem:[#allocation5 + $0x1118] sm:$0xff] }
 0x2bd   :  { %4465 = vmatprep.subr.bf16.mxu1 %v8119_v47  ;;  %v698_v47 = vld [vmem:[#allocation5 + $0x10b8] sm:$0xff]  ;;  %v8150_v14 = vcombine.low %v686_v37, %v690_v40  ;;  %v8157_v15 = vcombine.high %v693_v42, %v697_v43  ;;  %v10146_v20 = vmov 0   ;;  %v8165_v59 = vcombine.high %v701_v60, %v705_v61  ;;  %v713_v21 = vld [vmem:[#allocation5 + $0x1130] sm:$0xff] }
 0x2be   :  { %4251 = vmatpush1.bf16.msra.mxu0 %v8116_v3  ;;  %v8159_v31 = vcombine.high %v694_v26, %v698_v47  ;;  %v702_v3 = vld [vmem:[#allocation5 + $0x10d8] sm:$0xff]  ;;  %v717_v23 = vld [vmem:[#allocation5 + $0x1150] sm:$0xff] }
 0x2bf   :  { %4252 = vmatprep.subr.bf16.mxu0 %v8125_v4  ;;  %v8156_v4 = vcombine.low %v693_v42, %v697_v43  ;;  %v718_v38 = vld [vmem:[#allocation5 + $0x1158] sm:$0xff]  ;;  %v733_v40 = vld [vmem:[#allocation5 + $0x11d0] sm:$0xff] }
 0x2c0   :  { %4466 = vmatpush1.bf16.msra.mxu1 %v8118_v62  ;;  %v9090_v53 = vpop.eup %9089  ;;  %v706_v62 = vld [vmem:[#allocation5 + $0x10f8] sm:$0xff] }
 0x2c1   :  { %4467 = vmatprep.subr.bf16.mxu1 %v8127_v6  ;;  %v9092_v52 = vpop.eup %9091  ;;  %v8158_v6 = vcombine.low %v694_v26, %v698_v47  ;;  %v8167_v2 = vcombine.high %v702_v3, %v706_v62  ;;  %v722_v46 = vld [vmem:[#allocation5 + $0x1178] sm:$0xff] }
 0x2c2   :  { %4253 = vmatpush1.bf16.msra.mxu0 %v8124_v8  ;;  %v9094_v10 = vpop.eup %9093  ;;  %v714_v8 = vld [vmem:[#allocation5 + $0x1138] sm:$0xff]  ;;  %v8182_v34 = vcombine.low %v718_v38, %v722_v46 }
 0x2c3   :  { %4254 = vmatprep.subr.bf16.mxu0 %v8133_v33  ;;  %v9096_v56 = vpop.eup %9095  ;;  %v4719_v57 = vcombine.low %v9090_v53, %v9094_v10  ;;  %v8166_v33 = vcombine.low %v702_v3, %v706_v62  ;;  %v8175_v29 = vcombine.high %v710_v27, %v714_v8  ;;  %v721_v53 = vld [vmem:[#allocation5 + $0x1170] sm:$0xff]  ;;  %v8680_v3 = vld [vmem:[#allocation10 + $0x2c] ss:$16 sps:$4 sm:$0xff]  }
 0x2c4   :  { %4468 = vmatpush1.bf16.msra.mxu1 %v8126_v30  ;;  %v4720_v35 = vcombine.low %v9092_v52, %v9096_v56  ;;  %v8164_v30 = vcombine.low %v701_v60, %v705_v61  ;;  %v8172_v52 = vcombine.low %v709_v5, %v713_v21  ;;  %v8181_v10 = vcombine.high %v717_v23, %v721_v53  ;;  %v729_v56 = vld [vmem:[#allocation5 + $0x11b0] sm:$0xff]  ;;  %v8672_v60 = vld [vmem:[#allocation10 + $0x8] ss:$16 sps:$4 sm:$0xff]  }
 0x2c5   :  { %4469 = vmatprep.subr.bf16.mxu1 %v8135_v28  ;;  %v9787_v58 = vrot.slane %v4719_v57, %v9784_v51  ;;  %v8173_v28 = vcombine.high %v709_v5, %v713_v21  ;;  %v726_v57 = vld [vmem:[#allocation5 + $0x1198] sm:$0xff]  ;;  %v8180_v13 = vcombine.low %v717_v23, %v721_v53  ;;  %v8677_v61 = vld [vmem:[#allocation10 + $0x24] ss:$16 sps:$4 sm:$0xff]   ;;  %v8675_v62 = vld [vmem:[#allocation10 + $0x20] ss:$16 sps:$4 sm:$0xff]  }
 0x2c6   :  { %4255 = vmatpush1.bf16.msra.mxu0 %v8132_v9  ;;  %v9790_v36 = vrot.slane %v4720_v35, %v9784_v51  ;;  %v8174_v9 = vcombine.low %v710_v27, %v714_v8  ;;  %v8684_v5 = vld [vmem:[#allocation10 + $0x48] ss:$16 sps:$4 sm:$0xff]   ;;  %v8689_v21 = vld [vmem:[#allocation10 + $0x64] ss:$16 sps:$4 sm:$0xff]   ;;  %v8692_v27 = vld [vmem:[#allocation10 + $0x6c] ss:$16 sps:$4 sm:$0xff]  }
 0x2c7   :  { %4267 = vmatprep.subr.bf16.mxu0 %v8141_v50  ;;  %v725_v50 = vld [vmem:[#allocation5 + $0x1190] sm:$0xff]  ;;  %v8696_v23 = vld [vmem:[#allocation10 + $0x88] ss:$16 sps:$4 sm:$0xff]  }
 0x2c8   :  { %4470 = vmatpush1.bf16.msra.mxu1 %v8134_v32  ;;  %v4751_v24 = vcombine.low %v9787_v58, %v9790_v36  ;;  %v8183_v32 = vcombine.high %v718_v38, %v722_v46  ;;  %v8189_v35 = vcombine.high %v725_v50, %v729_v56  ;;  %v8687_v8 = vld [vmem:[#allocation10 + $0x60] ss:$16 sps:$4 sm:$0xff]   ;;  %v8701_v53 = vld [vmem:[#allocation10 + $0xa4] ss:$16 sps:$4 sm:$0xff]   ;;  %v8704_v38 = vld [vmem:[#allocation10 + $0xac] ss:$16 sps:$4 sm:$0xff]  }
 0x2c9   :  { %4482 = vmatprep.subr.bf16.mxu1 %v8143_v11  ;;  %4257 = vmatmul.mubr.bf16.vlgmr.msra.gmra.mrb[4].mxu0 %v9122_v22  ;;  %v730_v11 = vld [vmem:[#allocation5 + $0x11b8] sm:$0xff]  ;;  %v8699_v46 = vld [vmem:[#allocation10 + $0xa0] ss:$16 sps:$4 sm:$0xff]   ;;  %v4794_v58 = vsub.s32 5, %v9781_v7  ;;  %v4798_v36 = vsub.s32 6, %v9781_v7 }
 0x2ca   :  { %4268 = vmatpush1.bf16.msra.mxu0 %v8140_v17  ;;  %4299 = vmatprep.mubr.bf16.mxu0 %v10146_v20  ;;  %v8191_v37 = vcombine.high %v726_v57, %v730_v11  ;;  %v737_v17 = vld [vmem:[#allocation5 + $0x11f0] sm:$0xff]  ;;  %v8190_v42 = vcombine.low %v726_v57, %v730_v11  ;;  %v8716_v57 = vld [vmem:[#allocation10 + $0xec] ss:$16 sps:$4 sm:$0xff]  }
 0x2cb   :  { %4472 = vmatmul.mubr.bf16.vlgmr.msra.gmra.mrb[4].mxu1 %v9122_v22  ;;  %4269 = vmatprep.subr.bf16.mxu0 %v8149_v45  ;;  %v738_v45 = vld [vmem:[#allocation5 + $0x11f8] sm:$0xff]  ;;  %v8197_v43 = vcombine.high %v733_v40, %v737_v17  ;;  %v8196_v26 = vcombine.low %v733_v40, %v737_v17  ;;  %v8711_v11 = vld [vmem:[#allocation10 + $0xe0] ss:$16 sps:$4 sm:$0xff]   ;;  %v8725_v17 = vld [vmem:[#allocation10 + $0x124] ss:$16 sps:$4 sm:$0xff]  }
 0x2cc   :  { %4483 = vmatpush1.bf16.msra.mxu1 %v8142_v41  ;;  %4514 = vmatprep.mubr.bf16.mxu1 %v10146_v20  ;;  %v734_v41 = vld [vmem:[#allocation5 + $0x11d8] sm:$0xff] }
 0x2cd   :  { %4484 = vmatprep.subr.bf16.mxu1 %v8151_v18  ;;  %v8188_v18 = vcombine.low %v725_v50, %v729_v56  ;;  %v8199_v22 = vcombine.high %v734_v41, %v738_v45  ;;  %v8198_v47 = vcombine.low %v734_v41, %v738_v45  ;;  %v8708_v50 = vld [vmem:[#allocation10 + $0xc8] ss:$16 sps:$4 sm:$0xff]   ;;  %v8713_v56 = vld [vmem:[#allocation10 + $0xe4] ss:$16 sps:$4 sm:$0xff]   ;;  %v8728_v41 = vld [vmem:[#allocation10 + $0x12c] ss:$16 sps:$4 sm:$0xff]  }
 0x2ce   :  { %4270 = vmatpush1.bf16.msra.mxu0 %v8148_v48  ;;  %v9123_v48 = vld [vmem:[#allocation2 + $0x20] ss:$36 sps:$4 sm:$0xff]   ;;  %v8723_v45 = vld [vmem:[#allocation10 + $0x120] ss:$16 sps:$4 sm:$0xff]  }
 0x2cf   :  { %4271 = vmatprep.subr.bf16.mxu0 %v8157_v15  ;;  %v8674_v15 = vld [vmem:[#allocation10 + $0xc] ss:$16 sps:$4 sm:$0xff]   ;;  %v8720_v40 = vld [vmem:[#allocation10 + $0x108] ss:$16 sps:$4 sm:$0xff]  }
 0x2d0   :  { %4485 = vmatpush1.bf16.msra.mxu1 %v8150_v14  ;;  %v8671_v14 = vld [vmem:[#allocation10 + $0x4] ss:$16 sps:$4 sm:$0xff]  }
 0x2d1   :  { %4486 = vmatprep.subr.bf16.mxu1 %v8159_v31  ;;  %v8669_v31 = vld [vmem:[#allocation10] ss:$16 sps:$4 sm:$0xff]  }
 0x2d2   :  { %4272 = vmatpush1.bf16.msra.mxu0 %v8156_v4  ;;  %v8678_v4 = vld [vmem:[#allocation10 + $0x28] ss:$16 sps:$4 sm:$0xff]  }
 0x2d3   :  { %4273 = vmatprep.subr.bf16.mxu0 %v8165_v59  ;;  %v8686_v59 = vld [vmem:[#allocation10 + $0x4c] ss:$16 sps:$4 sm:$0xff]  }
 0x2d4   :  { %4487 = vmatpush1.bf16.msra.mxu1 %v8158_v6  ;;  %v8683_v6 = vld [vmem:[#allocation10 + $0x44] ss:$16 sps:$4 sm:$0xff]  }
 0x2d5   :  { %4488 = vmatprep.subr.bf16.mxu1 %v8167_v2  ;;  %v8681_v2 = vld [vmem:[#allocation10 + $0x40] ss:$16 sps:$4 sm:$0xff]  }
 0x2d6   :  { %4274 = vmatpush1.bf16.msra.mxu0 %v8164_v30  ;;  %v8690_v30 = vld [vmem:[#allocation10 + $0x68] ss:$16 sps:$4 sm:$0xff]  }
 0x2d7   :  { %4275 = vmatprep.subr.bf16.mxu0 %v8173_v28  ;;  %v8698_v28 = vld [vmem:[#allocation10 + $0x8c] ss:$16 sps:$4 sm:$0xff]  }
 0x2d8   :  { %4489 = vmatpush1.bf16.msra.mxu1 %v8166_v33  ;;  %v8695_v33 = vld [vmem:[#allocation10 + $0x84] ss:$16 sps:$4 sm:$0xff]  }
 0x2d9   :  { %4490 = vmatprep.subr.bf16.mxu1 %v8175_v29  ;;  %v8693_v29 = vld [vmem:[#allocation10 + $0x80] ss:$16 sps:$4 sm:$0xff]  }
 0x2da   :  { %4276 = vmatpush1.bf16.msra.mxu0 %v8172_v52  ;;  %v8702_v52 = vld [vmem:[#allocation10 + $0xa8] ss:$16 sps:$4 sm:$0xff]  }
 0x2db   :  { %4277 = vmatprep.subr.bf16.mxu0 %v8181_v10  ;;  %v8710_v10 = vld [vmem:[#allocation10 + $0xcc] ss:$16 sps:$4 sm:$0xff]  }
 0x2dc   :  { %4491 = vmatpush1.bf16.msra.mxu1 %v8174_v9  ;;  %v8707_v9 = vld [vmem:[#allocation10 + $0xc4] ss:$16 sps:$4 sm:$0xff]  }
 0x2dd   :  { %4492 = vmatprep.subr.bf16.mxu1 %v8183_v32  ;;  %v8705_v32 = vld [vmem:[#allocation10 + $0xc0] ss:$16 sps:$4 sm:$0xff]  }
 0x2de   :  { %4278 = vmatpush1.bf16.msra.mxu0 %v8180_v13  ;;  %v8714_v13 = vld [vmem:[#allocation10 + $0xe8] ss:$16 sps:$4 sm:$0xff]  }
 0x2df   :  { %4279 = vmatprep.subr.bf16.mxu0 %v8189_v35  ;;  %v8722_v35 = vld [vmem:[#allocation10 + $0x10c] ss:$16 sps:$4 sm:$0xff]  }
 0x2e0   :  { %4493 = vmatpush1.bf16.msra.mxu1 %v8182_v34  ;;  %v8719_v34 = vld [vmem:[#allocation10 + $0x104] ss:$16 sps:$4 sm:$0xff]  }
 0x2e1   :  { %4494 = vmatprep.subr.bf16.mxu1 %v8191_v37  ;;  %v8717_v37 = vld [vmem:[#allocation10 + $0x100] ss:$16 sps:$4 sm:$0xff]  }
 0x2e2   :  { %4280 = vmatpush1.bf16.msra.mxu0 %v8188_v18  ;;  %v8726_v18 = vld [vmem:[#allocation10 + $0x128] ss:$16 sps:$4 sm:$0xff]  }
 0x2e3   :  { %4281 = vmatprep.subr.bf16.mxu0 %v8197_v43  ;;  %v8734_v43 = vld [vmem:[#allocation10 + $0x14c] ss:$16 sps:$4 sm:$0xff]  }
 0x2e4   :  { %4495 = vmatpush1.bf16.msra.mxu1 %v8190_v42  ;;  %v8731_v42 = vld [vmem:[#allocation10 + $0x144] ss:$16 sps:$4 sm:$0xff]  }
 0x2e5   :  { %4496 = vmatprep.subr.bf16.mxu1 %v8199_v22  ;;  %v8729_v22 = vld [vmem:[#allocation10 + $0x140] ss:$16 sps:$4 sm:$0xff]  }
 0x2e6   :  { %4282 = vmatpush1.bf16.msra.mxu0 %v8196_v26  ;;  %v8732_v26 = vld [vmem:[#allocation10 + $0x148] ss:$16 sps:$4 sm:$0xff]  }
 0x2e7   :  { %6512 = vmatprep.subr.bf16.mxu0 %v8671_v14  ;;  %v8735_v14 = vld [vmem:[#allocation10 + $0x160] ss:$16 sps:$4 sm:$0xff]  }
 0x2e8   :  { %4497 = vmatpush1.bf16.msra.mxu1 %v8198_v47  ;;  %v8737_v47 = vld [vmem:[#allocation10 + $0x164] ss:$16 sps:$4 sm:$0xff]  }
 0x2e9   :  { %4300 = vmatmul.mubr.bf16.vlgmr.msra.gmra.mrb[4].mxu0 %v9123_v48  ;;  %6684 = vmatprep.subr.bf16.mxu1 %v8674_v15  ;;  %v8738_v15 = vld [vmem:[#allocation10 + $0x168] ss:$16 sps:$4 sm:$0xff]  }
 0x2ea   :  { %6513 = vmatpush1.bf16.msra.mxu0 %v8669_v31  ;;  %v8743_v31 = vld [vmem:[#allocation10 + $0x184] ss:$16 sps:$4 sm:$0xff]  }
 0x2eb   :  { %4515 = vmatmul.mubr.bf16.vlgmr.msra.gmra.mrb[4].mxu1 %v9123_v48  ;;  %6514 = vmatprep.subr.bf16.mxu0 %v8677_v61  ;;  %v8740_v48 = vld [vmem:[#allocation10 + $0x16c] ss:$16 sps:$4 sm:$0xff]   ;;  %v8741_v61 = vld [vmem:[#allocation10 + $0x180] ss:$16 sps:$4 sm:$0xff]  }
 0x2ec   :  { %6685 = vmatpush1.bf16.msra.mxu1 %v8672_v60  ;;  %v8746_v60 = vld [vmem:[#allocation10 + $0x18c] ss:$16 sps:$4 sm:$0xff]  }
 0x2ed   :  { %6686 = vmatprep.subr.bf16.mxu1 %v8680_v3  ;;  %v8744_v3 = vld [vmem:[#allocation10 + $0x188] ss:$16 sps:$4 sm:$0xff]  }
 0x2ee   :  { %6515 = vmatpush1.bf16.msra.mxu0 %v8675_v62  ;;  %v8749_v62 = vld [vmem:[#allocation10 + $0x1a4] ss:$16 sps:$4 sm:$0xff]  }
 0x2ef   :  { %6516 = vmatprep.subr.bf16.mxu0 %v8683_v6  ;;  %v8747_v6 = vld [vmem:[#allocation10 + $0x1a0] ss:$16 sps:$4 sm:$0xff]  }
 0x2f0   :  { %6687 = vmatpush1.bf16.msra.mxu1 %v8678_v4  ;;  %v8752_v4 = vld [vmem:[#allocation10 + $0x1ac] ss:$16 sps:$4 sm:$0xff]  }
 0x2f1   :  { %6688 = vmatprep.subr.bf16.mxu1 %v8686_v59  ;;  %v8750_v59 = vld [vmem:[#allocation10 + $0x1a8] ss:$16 sps:$4 sm:$0xff]  }
 0x2f2   :  { %6517 = vmatpush1.bf16.msra.mxu0 %v8681_v2  ;;  %v8755_v2 = vld [vmem:[#allocation10 + $0x1c4] ss:$16 sps:$4 sm:$0xff]  }
 0x2f3   :  { %6518 = vmatprep.subr.bf16.mxu0 %v8689_v21  ;;  %v8753_v21 = vld [vmem:[#allocation10 + $0x1c0] ss:$16 sps:$4 sm:$0xff]  }
 0x2f4   :  { %6689 = vmatpush1.bf16.msra.mxu1 %v8684_v5  ;;  %v8758_v5 = vld [vmem:[#allocation10 + $0x1cc] ss:$16 sps:$4 sm:$0xff]  }
 0x2f5   :  { %6690 = vmatprep.subr.bf16.mxu1 %v8692_v27  ;;  %v8756_v27 = vld [vmem:[#allocation10 + $0x1c8] ss:$16 sps:$4 sm:$0xff]  }
 0x2f6   :  { %6519 = vmatpush1.bf16.msra.mxu0 %v8687_v8  ;;  %v8759_v8 = vld [vmem:[#allocation10 + $0x1e0] ss:$16 sps:$4 sm:$0xff]  }
 0x2f7   :  { %6520 = vmatprep.subr.bf16.mxu0 %v8695_v33  ;;  %v8762_v33 = vld [vmem:[#allocation10 + $0x1e8] ss:$16 sps:$4 sm:$0xff]  }
 0x2f8   :  { %6691 = vmatpush1.bf16.msra.mxu1 %v8690_v30  ;;  %v8761_v30 = vld [vmem:[#allocation10 + $0x1e4] ss:$16 sps:$4 sm:$0xff]  }
 0x2f9   :  { %6692 = vmatprep.subr.bf16.mxu1 %v8698_v28  ;;  %v8764_v28 = vld [vmem:[#allocation10 + $0x1ec] ss:$16 sps:$4 sm:$0xff]  }
 0x2fa   :  { %6521 = vmatpush1.bf16.msra.mxu0 %v8693_v29  ;;  %v8767_v29 = vld [vmem:[#allocation10 + $0x204] ss:$16 sps:$4 sm:$0xff]  }
 0x2fb   :  { %6522 = vmatprep.subr.bf16.mxu0 %v8701_v53 }
 0x2fc   :  { %6693 = vmatpush1.bf16.msra.mxu1 %v8696_v23  ;;  %v8770_v23 = vld [vmem:[#allocation10 + $0x20c] ss:$16 sps:$4 sm:$0xff]  }
 0x2fd   :  { %6694 = vmatprep.subr.bf16.mxu1 %v8704_v38 }
 0x2fe   :  { %6523 = vmatpush1.bf16.msra.mxu0 %v8699_v46 }
 0x2ff   :  { %6524 = vmatprep.subr.bf16.mxu0 %v8707_v9 }
 0x300   :  { %6695 = vmatpush1.bf16.msra.mxu1 %v8702_v52 }
 0x301   :  { %6696 = vmatprep.subr.bf16.mxu1 %v8710_v10 }
 0x302   :  { %6525 = vmatpush1.bf16.msra.mxu0 %v8705_v32 }
 0x303   :  { %6526 = vmatprep.subr.bf16.mxu0 %v8713_v56 }
 0x304   :  { %6697 = vmatpush1.bf16.msra.mxu1 %v8708_v50 }
 0x305   :  { %6698 = vmatprep.subr.bf16.mxu1 %v8716_v57 }
 0x306   :  { %6527 = vmatpush1.bf16.msra.mxu0 %v8711_v11 }
 0x307   :  { %6528 = vmatprep.subr.bf16.mxu0 %v8719_v34 }
 0x308   :  { %6699 = vmatpush1.bf16.msra.mxu1 %v8714_v13 }
 0x309   :  { %6700 = vmatprep.subr.bf16.mxu1 %v8722_v35 }
 0x30a   :  { %6529 = vmatpush1.bf16.msra.mxu0 %v8717_v37 }
 0x30b   :  { %6530 = vmatprep.subr.bf16.mxu0 %v8725_v17 }
 0x30c   :  { %6701 = vmatpush1.bf16.msra.mxu1 %v8720_v40 }
 0x30d   :  { %6702 = vmatprep.subr.bf16.mxu1 %v8728_v41 }
 0x30e   :  { %6531 = vmatpush1.bf16.msra.mxu0 %v8723_v45 }
 0x30f   :  { %6532 = vmatprep.subr.bf16.mxu0 %v8731_v42 }
 0x310   :  { %6703 = vmatpush1.bf16.msra.mxu1 %v8726_v18 }
 0x311   :  { %6704 = vmatprep.subr.bf16.mxu1 %v8734_v43 }
 0x312   :  { %6533 = vmatpush1.bf16.msra.mxu0 %v8729_v22 }
 0x313   :  { %6534 = vmatprep.subr.bf16.mxu0 %v8737_v47 }
 0x314   :  { %6705 = vmatpush1.bf16.msra.mxu1 %v8732_v26 }
 0x315   :  { %6706 = vmatprep.subr.bf16.mxu1 %v8740_v48 }
 0x316   :  { %6535 = vmatpush1.bf16.msra.mxu0 %v8735_v14 }
 0x317   :  { %6536 = vmatprep.subr.bf16.mxu0 %v8743_v31 }
 0x318   :  { %6707 = vmatpush1.bf16.msra.mxu1 %v8738_v15 }
 0x319   :  { %6708 = vmatprep.subr.bf16.mxu1 %v8746_v60 }
 0x31a   :  { %6537 = vmatpush1.bf16.msra.mxu0 %v8741_v61 }
 0x31b   :  { %6538 = vmatprep.subr.bf16.mxu0 %v8749_v62 }
 0x31c   :  { %6709 = vmatpush1.bf16.msra.mxu1 %v8744_v3 }
 0x31d   :  { %6710 = vmatprep.subr.bf16.mxu1 %v8752_v4 }
 0x31e   :  { %6539 = vmatpush1.bf16.msra.mxu0 %v8747_v6 }
 0x31f   :  { %6540 = vmatprep.subr.bf16.mxu0 %v8755_v2 }
 0x320   :  { %6711 = vmatpush1.bf16.msra.mxu1 %v8750_v59 }
 0x321   :  { %6712 = vmatprep.subr.bf16.mxu1 %v8758_v5 }
 0x322   :  { %6541 = vmatpush1.bf16.msra.mxu0 %v8753_v21 }
 0x323   :  { %6542 = vmatprep.subr.bf16.mxu0 %v8761_v30 }
 0x324   :  { %6713 = vmatpush1.bf16.msra.mxu1 %v8756_v27 }
 0x325   :  { %6714 = vmatprep.subr.bf16.mxu1 %v8764_v28 }
 0x326   :  { %6543 = vmatpush1.bf16.msra.mxu0 %v8759_v8 }
 0x327   :  { %6555 = vmatprep.subr.bf16.mxu0 %v8767_v29 }
 0x328   :  { %6715 = vmatpush1.bf16.msra.mxu1 %v8762_v33 }
 0x329   :  { %6727 = vmatprep.subr.bf16.mxu1 %v8770_v23 }
 0x3bc   :  { %v9796_v53 = vpop.f32.mrb[4].mxu0 }
 0x3bd   :  { %v9800_v46 = vpop.f32.mrb[5].mxu0  ;;  %v4529_v52 = vmul.f32 %v9796_v53, %v9796_v53 }
 0x3be   :  { %v9798_v38 = vpop.f32.mrb[4].mxu1  ;;  %v9808_v32 = vpop.f32.mrb[6].mxu0  ;;  %v4530_v50 = vmul.f32 %v9800_v46, %v9800_v46 }
 0x3bf   :  { %v4531_v9 = vmul.f32 %v9798_v38, %v9798_v38  ;;  %v9806_v10 = vpop.f32.mrb[5].mxu1  ;;  %v4537_v57 = vmul.f32 %v9808_v32, %v9808_v32  ;;  %v4569_v11 = vadd.f32 %v9808_v32, %v9796_v53  ;;  %v9820_v34 = vpop.f32.mrb[7].mxu0 }
 0x3c0   :  { %v4532_v56 = vmul.f32 %v9806_v10, %v9806_v10  ;;  %v9818_v13 = vpop.f32.mrb[6].mxu1  ;;  %v4538_v40 = vmul.f32 %v9820_v34, %v9820_v34  ;;  %v4576_v17 = vadd.f32 %v9820_v34, %v9800_v46 }
 0x3c1   :  { %v4539_v35 = vmul.f32 %v9818_v13, %v9818_v13  ;;  %v4583_v37 = vadd.f32 %v9818_v13, %v9798_v38  ;;  %v9830_v41 = vpop.f32.mrb[7].mxu1  ;;  %v4570_v45 = vrot.slane %v4569_v11, 4  ;;  %v4625_v18 = vadd.f32 %v4537_v57, %v4529_v52 }
 0x3c2   :  { %v4540_v42 = vmul.f32 %v9830_v41, %v9830_v41  ;;  %v4590_v43 = vadd.f32 %v9830_v41, %v9806_v10  ;;  %v4577_v47 = vrot.slane %v4576_v17, 4  ;;  %v4632_v48 = vadd.f32 %v4538_v40, %v4530_v50 }
 0x3c3   :  { %v4584_v22 = vrot.slane %v4583_v37, 4  ;;  %v4639_v26 = vadd.f32 %v4539_v35, %v4531_v9  ;;  %v4571_v14 = vadd.f32 %v4570_v45, %v4569_v11  ;;  %v4626_v15 = vrot.slane %v4625_v18, 4 }
 0x3c4   :  { %v4591_v31 = vrot.slane %v4590_v43, 4  ;;  %v4646_v60 = vadd.f32 %v4540_v42, %v4532_v56  ;;  %v4578_v62 = vadd.f32 %v4577_v47, %v4576_v17  ;;  %v4633_v4 = vrot.slane %v4632_v48, 4 }
 0x3c5   :  { %v4585_v61 = vadd.f32 %v4584_v22, %v4583_v37  ;;  %v4640_v3 = vrot.slane %v4639_v26, 4  ;;  %v4572_v6 = vrot.slane %v4571_v14, 2  ;;  %v4627_v59 = vadd.f32 %v4626_v15, %v4625_v18 }
 0x3c6   :  { %v4592_v2 = vadd.f32 %v4591_v31, %v4590_v43  ;;  %v4647_v5 = vrot.slane %v4646_v60, 4  ;;  %v4579_v8 = vrot.slane %v4578_v62, 2  ;;  %v4634_v30 = vadd.f32 %v4633_v4, %v4632_v48 }
 0x3c7   :  { %v4586_v21 = vrot.slane %v4585_v61, 2  ;;  %v4641_v27 = vadd.f32 %v4640_v3, %v4639_v26  ;;  %v4573_v33 = vadd.f32 %v4572_v6, %v4571_v14  ;;  %v4628_v28 = vrot.slane %v4627_v59, 2 }
 0x3c8   :  { %v4593_v29 = vrot.slane %v4592_v2, 2  ;;  %v4648_v23 = vadd.f32 %v4647_v5, %v4646_v60  ;;  %v4580_v50 = vadd.f32 %v4579_v8, %v4578_v62  ;;  %v4635_v56 = vrot.slane %v4634_v30, 2 }
 0x3c9   :  { %v4587_v52 = vadd.f32 %v4586_v21, %v4585_v61  ;;  %v4642_v9 = vrot.slane %v4641_v27, 2  ;;  %v4574_v57 = vrot.slane %v4573_v33, 1  ;;  %v4629_v11 = vadd.f32 %v4628_v28, %v4627_v59 }
 0x3ca   :  { %v4594_v35 = vadd.f32 %v4593_v29, %v4592_v2  ;;  %v4649_v37 = vrot.slane %v4648_v23, 2  ;;  %v4581_v45 = vrot.slane %v4580_v50, 1  ;;  %v4636_v18 = vadd.f32 %v4635_v56, %v4634_v30 }
 0x3cb   :  { %v4588_v40 = vrot.slane %v4587_v52, 1  ;;  %v4643_v17 = vadd.f32 %v4642_v9, %v4641_v27  ;;  %v4575_v42 = vadd.f32 %v4574_v57, %v4573_v33  ;;  %v4630_v43 = vrot.slane %v4629_v11, 1 }
 0x3cc   :  { %v4595_v22 = vrot.slane %v4594_v35, 1  ;;  %v4650_v26 = vadd.f32 %v4649_v37, %v4648_v23  ;;  %v4582_v14 = vadd.f32 %v4581_v45, %v4580_v50  ;;  %v4637_v15 = vrot.slane %v4636_v18, 1 }
 0x3cd   :  { %v4589_v47 = vadd.f32 %v4588_v40, %v4587_v52  ;;  %v4644_v48 = vrot.slane %v4643_v17, 1  ;;  %v4631_v31 = vadd.f32 %v4630_v43, %v4629_v11  ;;  %v9836_v60 = vmul.f32 0.0625, %v4575_v42 }
 0x3ce   :  { %v4596_v61 = vadd.f32 %v4595_v22, %v4594_v35  ;;  %v4651_v3 = vrot.slane %v4650_v26, 1  ;;  %v4638_v6 = vadd.f32 %v4637_v15, %v4636_v18  ;;  %v4659_v59 = vmul.f32 0.0625, %v4582_v14 }
 0x3cf   :  { %v4645_v62 = vadd.f32 %v4644_v48, %v4643_v17  ;;  %v9838_v4 = vmul.f32 0.0625, %v4589_v47  ;;  %v4666_v2 = vmul.f32 0.0625, %v4631_v31  ;;  %v4674_v5 = vmul.f32 %v9836_v60, %v9836_v60 }
 0x3d0   :  { %v4652_v21 = vadd.f32 %v4651_v3, %v4650_v26  ;;  %v4661_v27 = vmul.f32 0.0625, %v4596_v61  ;;  %v4667_v33 = vmul.f32 0.0625, %v4638_v6  ;;  %v4675_v28 = vmul.f32 %v4659_v59, %v4659_v59 }
 0x3d1   :  { %v4668_v8 = vmul.f32 0.0625, %v4645_v62  ;;  %v4676_v30 = vmul.f32 %v9838_v4, %v9838_v4  ;;  %v4682_v29 = vsub.f32 %v4666_v2, %v4674_v5  ;;  %v4759_v61 = vrot.slane %v4751_v24, %v9784_v51  ;;  %v4694_v62 = vld [vmem:[#allocation7] sm:$0xff] }
 0x3d2   :  { %v4669_v23 = vmul.f32 0.0625, %v4652_v21  ;;  %v4677_v52 = vmul.f32 %v4661_v27, %v4661_v27  ;;  %v4683_v50 = vsub.f32 %v4667_v33, %v4675_v28  ;;  %v9852_v6 = vsub.s32 0, %v9781_v7 }
 0x3d3   :  { %v4684_v9 = vsub.f32 %v4668_v8, %v4676_v30  ;;  %v4690_v56 = vmax.f32 %v4682_v29, 0.0  ;;  %v9855_v5 = vsub.s32 1, %v9781_v7  ;;  %v9858_v21 = vsub.s32 2, %v9781_v7 }
 0x3d4   :  { %v4685_v57 = vsub.f32 %v4669_v23, %v4677_v52  ;;  %v4691_v35 = vmax.f32 %v4683_v50, 0.0  ;;  %v9861_v8 = vsub.s32 3, %v9781_v7  ;;  %v4790_v30 = vsub.s32 4, %v9781_v7 }
 0x3d5   :  { %v4692_v11 = vmax.f32 %v4684_v9, 0.0  ;;  %v4699_v37 = vadd.f32 1e-05, %v4690_v56  ;;  %v4802_v24 = vsub.s32 7, %v9781_v7 }
 0x3d6   :  { %v4693_v40 = vmax.f32 %v4685_v57, 0.0  ;;  %v4700_v45 = vadd.f32 1e-05, %v4691_v35 }
 0x3d7   :  { %v4701_v17 = vadd.f32 1e-05, %v4692_v11  ;;  %9097 = vrsqrt.f32 %v4699_v37 }
 0x3d8   :  { %v4702_v18 = vadd.f32 1e-05, %v4693_v40 }
 0x3d9   :  { %9099 = vrsqrt.f32 %v4701_v17 }
 0x3da   :  { %9101 = vrsqrt.f32 %v4700_v45 }
 0x3db   :  { %9103 = vrsqrt.f32 %v4702_v18 }
 0x3e1   :  { %v9098_v42 = vpop.eup %9097 }
 0x3e3   :  { %v9100_v43 = vpop.eup %9099 }
 0x3e4   :  { %v9102_v22 = vpop.eup %9101 }
 0x3e5   :  { %v9104_v26 = vpop.eup %9103  ;;  %v4721_v47 = vcombine.low %v9098_v42, %v9102_v22 }
 0x3e6   :  { %v4722_v48 = vcombine.low %v9100_v43, %v9104_v26 }
 0x3e7   :  { %v4743_v14 = vrot.slane %v4721_v47, %v9784_v51 }
 0x3e8   :  { %v4750_v15 = vrot.slane %v4722_v48, %v9784_v51 }
 0x3ea   :  { %v4752_v31 = vcombine.low %v4743_v14, %v4750_v15 }
 0x3ec   :  { %v4766_v3 = vrot.slane %v4752_v31, %v9784_v51 }
 0x3ee   :  { %v4767_v2 = vcombine.low %v4759_v61, %v4766_v3 }
 0x3f0   :  { %v4769_v33 = vmul.f32 %v4767_v2, %v4694_v62 }
 0x3f2   :  { %v4775_v28 = vrot.slane %v4769_v33, %v9852_v6  ;;  %v4779_v29 = vrot.slane %v4769_v33, %v9855_v5  ;;  %v4783_v23 = vrot.slane %v4769_v33, %v9858_v21  ;;  %v4787_v52 = vrot.slane %v4769_v33, %v9861_v8 }
 0x3f3   :  { %v4791_v9 = vrot.slane %v4769_v33, %v4790_v30  ;;  %v4795_v50 = vrot.slane %v4769_v33, %v4794_v58  ;;  %v4799_v56 = vrot.slane %v4769_v33, %v4798_v36  ;;  %v4803_v57 = vrot.slane %v4769_v33, %v4802_v24 }
 0x3f4   :  { %v4812_v11 = vmul.f32 %v4775_v28, %v9737_v39  ;;  %v4813_v35 = vmul.f32 %v4779_v29, %v9741_v44  ;;  %v4814_v37 = vmul.f32 %v4783_v23, %v9739_v19  ;;  %v4815_v7 = vmul.f32 %v4787_v52, %v9748_v25 }
 0x3f5   :  { %v4816_v40 = vmul.f32 %v4791_v9, %v9836_v60  ;;  %v4817_v17 = vmul.f32 %v4795_v50, %v4659_v59  ;;  %v4818_v45 = vmul.f32 %v4799_v56, %v9838_v4  ;;  %v4819_v18 = vmul.f32 %v4803_v57, %v4661_v27 }
 0x3f6   :  { %v4828_v42 = vcombine.low %v4812_v11, %v4813_v35  ;;  %v4829_v43 = vcombine.low %v4814_v37, %v4815_v7  ;;  %v4894_v22 = vmul.f32 %v4803_v57, %v9830_v41  ;;  %v4880_v26 = vmul.f32 %v4779_v29, %v9655_v55 }
 0x3f7   :  { %v4830_v47 = vcombine.low %v4816_v40, %v4817_v17  ;;  %v4831_v39 = vcombine.low %v4818_v45, %v4819_v18  ;;  %v4888_v44 = vmul.f32 %v4779_v29, %v9685_v16  ;;  %v4879_v19 = vmul.f32 %v4775_v28, %v9643_v49 }
 0x3f8   :  { %v4838_v25 = vrot.slane %v4828_v42, %v9784_v51  ;;  %v4845_v60 = vrot.slane %v4829_v43, %v9784_v51  ;;  %v4887_v59 = vmul.f32 %v4775_v28, %v9673_v0  ;;  %v4882_v4 = vmul.f32 %v4787_v52, %v9671_v63 }
 0x3f9   :  { %v4852_v27 = vrot.slane %v4830_v47, %v9784_v51  ;;  %v4859_v41 = vrot.slane %v4831_v39, %v9784_v51  ;;  %v4890_v55 = vmul.f32 %v4787_v52, %v9695_v1  ;;  %v4881_v48 = vmul.f32 %v4783_v23, %v9653_v54 }
 0x3fa   :  { %v4860_v14 = vcombine.low %v4838_v25, %v4845_v60  ;;  %v4889_v16 = vmul.f32 %v4783_v23, %v9683_v12  ;;  %v4884_v49 = vmul.f32 %v4795_v50, %v9800_v46  ;;  %v4892_v15 = vmul.f32 %v4795_v50, %v9820_v34  ;;  %v4770_v12 = vld [vmem:[#allocation8] sm:$0xff] }
 0x3fb   :  { %v4861_v31 = vcombine.low %v4852_v27, %v4859_v41  ;;  %v4883_v0 = vmul.f32 %v4791_v9, %v9796_v53  ;;  %v4891_v63 = vmul.f32 %v4791_v9, %v9808_v32  ;;  %v4886_v61 = vmul.f32 %v4803_v57, %v9806_v10  ;;  %v8776_v25 = vld [vmem:[#allocation10 + $0x22c] ss:$16 sps:$4 sm:$0xff]  }
 0x3fc   :  { %v4868_v3 = vrot.slane %v4860_v14, %v9784_v51  ;;  %v4885_v1 = vmul.f32 %v4799_v56, %v9798_v38  ;;  %v4893_v54 = vmul.f32 %v4799_v56, %v9818_v13 }
 0x3fd   :  { %v4875_v62 = vrot.slane %v4861_v31, %v9784_v51 }
 0x3ff   :  { %v4876_v2 = vcombine.low %v4868_v3, %v4875_v62  ;;  %v8782_v3 = vld [vmem:[#allocation10 + $0x24c] ss:$16 sps:$4 sm:$0xff]  }
 0x401   :  { %v4878_v46 = vsub.f32 %v4770_v12, %v4876_v2  ;;  %v8777_v2 = vld [vmem:[#allocation10 + $0x240] ss:$16 sps:$4 sm:$0xff]  }
 0x403   :  { %v4927_v33 = vrot.slane %v4878_v46, %v4802_v24  ;;  %v4903_v34 = vrot.slane %v4878_v46, %v9855_v5  ;;  %v4899_v53 = vrot.slane %v4878_v46, %v9852_v6  ;;  %v4911_v32 = vrot.slane %v4878_v46, %v9861_v8 }
 0x404   :  { %v4907_v10 = vrot.slane %v4878_v46, %v9858_v21  ;;  %v4919_v28 = vrot.slane %v4878_v46, %v4794_v58  ;;  %v4915_v29 = vrot.slane %v4878_v46, %v4790_v30  ;;  %v4923_v23 = vrot.slane %v4878_v46, %v4798_v36  ;;  %v8765_v58 = vld [vmem:[#allocation10 + $0x200] ss:$16 sps:$4 sm:$0xff]   ;;  %v8768_v30 = vld [vmem:[#allocation10 + $0x208] ss:$16 sps:$4 sm:$0xff]  }
 0x405   :  { %v4951_v38 = vadd.f32 %v4927_v33, %v4894_v22  ;;  %v4937_v52 = vadd.f32 %v4903_v34, %v4880_v26  ;;  %v4945_v13 = vadd.f32 %v4903_v34, %v4888_v44  ;;  %v4936_v9 = vadd.f32 %v4899_v53, %v4879_v19  ;;  %v8773_v19 = vld [vmem:[#allocation10 + $0x224] ss:$16 sps:$4 sm:$0xff]   ;;  %v8780_v46 = vld [vmem:[#allocation10 + $0x248] ss:$16 sps:$4 sm:$0xff]   ;;  %v8788_v34 = vld [vmem:[#allocation10 + $0x26c] ss:$16 sps:$4 sm:$0xff]  }
 0x406   :  { %v4944_v50 = vadd.f32 %v4899_v53, %v4887_v59  ;;  %v4939_v56 = vadd.f32 %v4911_v32, %v4882_v4  ;;  %v4947_v57 = vadd.f32 %v4911_v32, %v4890_v55  ;;  %v4938_v11 = vadd.f32 %v4907_v10, %v4881_v48  ;;  %v8783_v53 = vld [vmem:[#allocation10 + $0x260] ss:$16 sps:$4 sm:$0xff]   ;;  %v8786_v32 = vld [vmem:[#allocation10 + $0x268] ss:$16 sps:$4 sm:$0xff]  }
 0x407   :  { %v4953_v24 = vmax.f32 %v4937_v52, 0.0  ;;  %v4961_v35 = vmax.f32 %v4945_v13, 0.0  ;;  %v4952_v37 = vmax.f32 %v4936_v9, 0.0  ;;  %v4946_v7 = vadd.f32 %v4907_v10, %v4889_v16  ;;  %v8771_v16 = vld [vmem:[#allocation10 + $0x220] ss:$16 sps:$4 sm:$0xff]  }
 0x408   :  { %v4960_v40 = vmax.f32 %v4944_v50, 0.0  ;;  %v4955_v17 = vmax.f32 %v4939_v56, 0.0  ;;  %v4963_v45 = vmax.f32 %v4947_v57, 0.0  ;;  %v4954_v18 = vmax.f32 %v4938_v11, 0.0  ;;  %v8791_v10 = vld [vmem:[#allocation10 + $0x284] ss:$16 sps:$4 sm:$0xff]  }
 0x409   :  { %v4969_v42 = vpack.c.bf16 %v4961_v35, %v4953_v24  ;;  %v4962_v36 = vmax.f32 %v4946_v7, 0.0  ;;  %v4941_v43 = vadd.f32 %v4919_v28, %v4884_v49  ;;  %v4949_v22 = vadd.f32 %v4919_v28, %v4892_v15  ;;  %v8774_v49 = vld [vmem:[#allocation10 + $0x228] ss:$16 sps:$4 sm:$0xff]   ;;  %v8794_v28 = vld [vmem:[#allocation10 + $0x28c] ss:$16 sps:$4 sm:$0xff]  }
 0x40a   :  { %v4968_v26 = vpack.c.bf16 %v4960_v40, %v4952_v37  ;;  %v4971_v47 = vpack.c.bf16 %v4963_v45, %v4955_v17  ;;  %v4940_v39 = vadd.f32 %v4915_v29, %v4883_v0  ;;  %v4948_v44 = vadd.f32 %v4915_v29, %v4891_v63  ;;  %v8779_v63 = vld [vmem:[#allocation10 + $0x244] ss:$16 sps:$4 sm:$0xff]   ;;  %v8789_v29 = vld [vmem:[#allocation10 + $0x280] ss:$16 sps:$4 sm:$0xff]   ;;  %v8800_v52 = vld [vmem:[#allocation10 + $0x2ac] ss:$16 sps:$4 sm:$0xff]  }
 0x40b   :  { %6544 = vmatprep.mubr.bf16.mxu0 %v4969_v42  ;;  %6716 = vmatprep.mubr.bf16.mxu1 %v4969_v42  ;;  %v9903_v60 = vpack.c.bf16 %v4962_v36, %v4954_v18  ;;  %v4957_v59 = vmax.f32 %v4941_v43, 0.0  ;;  %v4965_v4 = vmax.f32 %v4949_v22, 0.0  ;;  %v4943_v27 = vadd.f32 %v4927_v33, %v4886_v61  ;;  %v8785_v33 = vld [vmem:[#allocation10 + $0x264] ss:$16 sps:$4 sm:$0xff]   ;;  %v8795_v13 = vld [vmem:[#allocation10 + $0x2a0] ss:$16 sps:$4 sm:$0xff]  }
 0x40c   :  { %6545 = vmatmul.mubr.bf16.vlgmr.msra.gmra.mrb[8].mxu0 %v4968_v26  ;;  %6717 = vmatmul.mubr.bf16.vlgmr.msra.gmra.mrb[8].mxu1 %v4968_v26  ;;  %v4956_v41 = vmax.f32 %v4940_v39, 0.0  ;;  %v4964_v55 = vmax.f32 %v4948_v44, 0.0  ;;  %v4942_v48 = vadd.f32 %v4923_v23, %v4885_v1  ;;  %v4950_v14 = vadd.f32 %v4923_v23, %v4893_v54  ;;  %v8792_v23 = vld [vmem:[#allocation10 + $0x288] ss:$16 sps:$4 sm:$0xff]   ;;  %v8803_v50 = vld [vmem:[#allocation10 + $0x2c4] ss:$16 sps:$4 sm:$0xff]  }
 0x40d   :  { %6556 = vmatpush1.bf16.msra.mxu0 %v8765_v58  ;;  %6728 = vmatpush1.bf16.msra.mxu1 %v8768_v30  ;;  %v9905_v15 = vpack.c.bf16 %v4965_v4, %v4957_v59  ;;  %v4959_v31 = vmax.f32 %v4943_v27, 0.0  ;;  %v4967_v0 = vmax.f32 %v4951_v38, 0.0  ;;  %v8797_v38 = vld [vmem:[#allocation10 + $0x2a4] ss:$16 sps:$4 sm:$0xff]   ;;  %v8798_v9 = vld [vmem:[#allocation10 + $0x2a8] ss:$16 sps:$4 sm:$0xff]  }
 0x40e   :  { %6587 = vmatprep.mubr.bf16.mxu0 %v4971_v47  ;;  %6759 = vmatprep.mubr.bf16.mxu1 %v4971_v47  ;;  %v9907_v62 = vpack.c.bf16 %v4964_v55, %v4956_v41  ;;  %v4958_v61 = vmax.f32 %v4942_v48, 0.0  ;;  %v4966_v12 = vmax.f32 %v4950_v14, 0.0  ;;  %v8806_v56 = vld [vmem:[#allocation10 + $0x2cc] ss:$16 sps:$4 sm:$0xff]   ;;  %v8801_v57 = vld [vmem:[#allocation10 + $0x2c0] ss:$16 sps:$4 sm:$0xff]  }
 0x40f   :  { %6557 = vmatprep.subr.bf16.mxu0 %v8773_v19  ;;  %6729 = vmatprep.subr.bf16.mxu1 %v8776_v25  ;;  %v9909_v1 = vpack.c.bf16 %v4967_v0, %v4959_v31  ;;  %v8804_v11 = vld [vmem:[#allocation10 + $0x2c8] ss:$16 sps:$4 sm:$0xff]   ;;  %v8809_v24 = vld [vmem:[#allocation10 + $0x2e4] ss:$16 sps:$4 sm:$0xff]   ;;  %v8812_v35 = vld [vmem:[#allocation10 + $0x2ec] ss:$16 sps:$4 sm:$0xff]  }
 0x410   :  { %v9911_v54 = vpack.c.bf16 %v4966_v12, %v4958_v61  ;;  %v8807_v37 = vld [vmem:[#allocation10 + $0x2e0] ss:$16 sps:$4 sm:$0xff]   ;;  %v8810_v7 = vld [vmem:[#allocation10 + $0x2e8] ss:$16 sps:$4 sm:$0xff]   ;;  %v8815_v40 = vld [vmem:[#allocation10 + $0x304] ss:$16 sps:$4 sm:$0xff]  }
 0x411   :  { %6558 = vmatpush1.bf16.msra.mxu0 %v8771_v16  ;;  %6730 = vmatpush1.bf16.msra.mxu1 %v8774_v49  ;;  %v8818_v17 = vld [vmem:[#allocation10 + $0x30c] ss:$16 sps:$4 sm:$0xff]   ;;  %v8813_v45 = vld [vmem:[#allocation10 + $0x300] ss:$16 sps:$4 sm:$0xff]   ;;  %v8816_v18 = vld [vmem:[#allocation10 + $0x308] ss:$16 sps:$4 sm:$0xff]  }
 0x412   :  { %6559 = vmatprep.subr.bf16.mxu0 %v8779_v63  ;;  %6731 = vmatprep.subr.bf16.mxu1 %v8782_v3  ;;  %v8821_v42 = vld [vmem:[#allocation10 + $0x324] ss:$16 sps:$4 sm:$0xff]   ;;  %v8824_v58 = vld [vmem:[#allocation10 + $0x32c] ss:$16 sps:$4 sm:$0xff]   ;;  %v8819_v30 = vld [vmem:[#allocation10 + $0x320] ss:$16 sps:$4 sm:$0xff]  }
 0x413   :  { %v8822_v36 = vld [vmem:[#allocation10 + $0x328] ss:$16 sps:$4 sm:$0xff]   ;;  %v8827_v43 = vld [vmem:[#allocation10 + $0x344] ss:$16 sps:$4 sm:$0xff]   ;;  %v8830_v22 = vld [vmem:[#allocation10 + $0x34c] ss:$16 sps:$4 sm:$0xff]  }
 0x414   :  { %v8825_v26 = vld [vmem:[#allocation10 + $0x340] ss:$16 sps:$4 sm:$0xff]   ;;  %v8828_v47 = vld [vmem:[#allocation10 + $0x348] ss:$16 sps:$4 sm:$0xff]   ;;  %v8833_v39 = vld [vmem:[#allocation10 + $0x364] ss:$16 sps:$4 sm:$0xff]  }
 0x415   :  { %6560 = vmatpush1.bf16.msra.mxu0 %v8777_v2  ;;  %6732 = vmatpush1.bf16.msra.mxu1 %v8780_v46  ;;  %v8836_v44 = vld [vmem:[#allocation10 + $0x36c] ss:$16 sps:$4 sm:$0xff]   ;;  %v8831_v19 = vld [vmem:[#allocation10 + $0x360] ss:$16 sps:$4 sm:$0xff]   ;;  %v8834_v25 = vld [vmem:[#allocation10 + $0x368] ss:$16 sps:$4 sm:$0xff]  }
 0x416   :  { %6561 = vmatprep.subr.bf16.mxu0 %v8785_v33  ;;  %6733 = vmatprep.subr.bf16.mxu1 %v8788_v34  ;;  %v8839_v59 = vld [vmem:[#allocation10 + $0x384] ss:$16 sps:$4 sm:$0xff]   ;;  %v8842_v4 = vld [vmem:[#allocation10 + $0x38c] ss:$16 sps:$4 sm:$0xff]   ;;  %v8837_v27 = vld [vmem:[#allocation10 + $0x380] ss:$16 sps:$4 sm:$0xff]  }
 0x417   :  { %v8840_v41 = vld [vmem:[#allocation10 + $0x388] ss:$16 sps:$4 sm:$0xff]   ;;  %v8845_v55 = vld [vmem:[#allocation10 + $0x3a4] ss:$16 sps:$4 sm:$0xff]   ;;  %v8848_v48 = vld [vmem:[#allocation10 + $0x3ac] ss:$16 sps:$4 sm:$0xff]  }
 0x418   :  { %v8843_v14 = vld [vmem:[#allocation10 + $0x3a0] ss:$16 sps:$4 sm:$0xff]   ;;  %v8846_v16 = vld [vmem:[#allocation10 + $0x3a8] ss:$16 sps:$4 sm:$0xff]   ;;  %v8851_v49 = vld [vmem:[#allocation10 + $0x3c4] ss:$16 sps:$4 sm:$0xff]  }
 0x419   :  { %6562 = vmatpush1.bf16.msra.mxu0 %v8783_v53  ;;  %6734 = vmatpush1.bf16.msra.mxu1 %v8786_v32  ;;  %v8854_v31 = vld [vmem:[#allocation10 + $0x3cc] ss:$16 sps:$4 sm:$0xff]   ;;  %v8849_v0 = vld [vmem:[#allocation10 + $0x3c0] ss:$16 sps:$4 sm:$0xff]   ;;  %v8852_v63 = vld [vmem:[#allocation10 + $0x3c8] ss:$16 sps:$4 sm:$0xff]  }
 0x41a   :  { %6563 = vmatprep.subr.bf16.mxu0 %v8791_v10  ;;  %6735 = vmatprep.subr.bf16.mxu1 %v8794_v28  ;;  %v8857_v3 = vld [vmem:[#allocation10 + $0x3e4] ss:$16 sps:$4 sm:$0xff]   ;;  %v8860_v61 = vld [vmem:[#allocation10 + $0x3ec] ss:$16 sps:$4 sm:$0xff]   ;;  %v8855_v12 = vld [vmem:[#allocation10 + $0x3e0] ss:$16 sps:$4 sm:$0xff]  }
 0x41b   :  { %v8858_v2 = vld [vmem:[#allocation10 + $0x3e8] ss:$16 sps:$4 sm:$0xff]   ;;  %v8863_v46 = vld [vmem:[#allocation10 + $0x404] ss:$16 sps:$4 sm:$0xff]   ;;  %v8866_v33 = vld [vmem:[#allocation10 + $0x40c] ss:$16 sps:$4 sm:$0xff]  }
 0x41c   :  { %v8861_v34 = vld [vmem:[#allocation10 + $0x400] ss:$16 sps:$4 sm:$0xff]   ;;  %v8864_v53 = vld [vmem:[#allocation10 + $0x408] ss:$16 sps:$4 sm:$0xff]   ;;  %v8869_v32 = vld [vmem:[#allocation10 + $0x424] ss:$16 sps:$4 sm:$0xff]  }
 0x41d   :  { %6564 = vmatpush1.bf16.msra.mxu0 %v8789_v29  ;;  %6736 = vmatpush1.bf16.msra.mxu1 %v8792_v23  ;;  %v8872_v10 = vld [vmem:[#allocation10 + $0x42c] ss:$16 sps:$4 sm:$0xff]   ;;  %v8867_v28 = vld [vmem:[#allocation10 + $0x420] ss:$16 sps:$4 sm:$0xff]   ;;  %v8870_v29 = vld [vmem:[#allocation10 + $0x428] ss:$16 sps:$4 sm:$0xff]  }
 0x41e   :  { %6565 = vmatprep.subr.bf16.mxu0 %v8797_v38  ;;  %6737 = vmatprep.subr.bf16.mxu1 %v8800_v52  ;;  %v8875_v23 = vld [vmem:[#allocation10 + $0x444] ss:$16 sps:$4 sm:$0xff]   ;;  %v8878_v38 = vld [vmem:[#allocation10 + $0x44c] ss:$16 sps:$4 sm:$0xff]   ;;  %v8873_v52 = vld [vmem:[#allocation10 + $0x440] ss:$16 sps:$4 sm:$0xff]  }
 0x421   :  { %6566 = vmatpush1.bf16.msra.mxu0 %v8795_v13  ;;  %6738 = vmatpush1.bf16.msra.mxu1 %v8798_v9  ;;  %v8876_v13 = vld [vmem:[#allocation10 + $0x448] ss:$16 sps:$4 sm:$0xff]   ;;  %v8881_v9 = vld [vmem:[#allocation10 + $0x464] ss:$16 sps:$4 sm:$0xff]  }
 0x422   :  { %6567 = vmatprep.subr.bf16.mxu0 %v8803_v50  ;;  %6739 = vmatprep.subr.bf16.mxu1 %v8806_v56  ;;  %v8879_v50 = vld [vmem:[#allocation10 + $0x460] ss:$16 sps:$4 sm:$0xff]   ;;  %v8882_v56 = vld [vmem:[#allocation10 + $0x468] ss:$16 sps:$4 sm:$0xff]  }
 0x425   :  { %6568 = vmatpush1.bf16.msra.mxu0 %v8801_v57  ;;  %6740 = vmatpush1.bf16.msra.mxu1 %v8804_v11  ;;  %v8887_v57 = vld [vmem:[#allocation10 + $0x484] ss:$16 sps:$4 sm:$0xff]   ;;  %v8885_v11 = vld [vmem:[#allocation10 + $0x480] ss:$16 sps:$4 sm:$0xff]  }
 0x426   :  { %6569 = vmatprep.subr.bf16.mxu0 %v8809_v24  ;;  %6741 = vmatprep.subr.bf16.mxu1 %v8812_v35  ;;  %v8888_v24 = vld [vmem:[#allocation10 + $0x488] ss:$16 sps:$4 sm:$0xff]   ;;  %v8893_v35 = vld [vmem:[#allocation10 + $0x4a4] ss:$16 sps:$4 sm:$0xff]  }
 0x429   :  { %6570 = vmatpush1.bf16.msra.mxu0 %v8807_v37  ;;  %6742 = vmatpush1.bf16.msra.mxu1 %v8810_v7  ;;  %v8896_v37 = vld [vmem:[#allocation10 + $0x4ac] ss:$16 sps:$4 sm:$0xff]   ;;  %v8891_v7 = vld [vmem:[#allocation10 + $0x4a0] ss:$16 sps:$4 sm:$0xff]  }
 0x42a   :  { %6571 = vmatprep.subr.bf16.mxu0 %v8815_v40  ;;  %6743 = vmatprep.subr.bf16.mxu1 %v8818_v17  ;;  %v8894_v40 = vld [vmem:[#allocation10 + $0x4a8] ss:$16 sps:$4 sm:$0xff]   ;;  %v8899_v17 = vld [vmem:[#allocation10 + $0x4c4] ss:$16 sps:$4 sm:$0xff]  }
 0x42d   :  { %6572 = vmatpush1.bf16.msra.mxu0 %v8813_v45  ;;  %6744 = vmatpush1.bf16.msra.mxu1 %v8816_v18  ;;  %v8902_v45 = vld [vmem:[#allocation10 + $0x4cc] ss:$16 sps:$4 sm:$0xff]   ;;  %v8897_v18 = vld [vmem:[#allocation10 + $0x4c0] ss:$16 sps:$4 sm:$0xff]  }
 0x42e   :  { %6573 = vmatprep.subr.bf16.mxu0 %v8821_v42  ;;  %6745 = vmatprep.subr.bf16.mxu1 %v8824_v58  ;;  %v8900_v42 = vld [vmem:[#allocation10 + $0x4c8] ss:$16 sps:$4 sm:$0xff]   ;;  %v8905_v58 = vld [vmem:[#allocation10 + $0x4e4] ss:$16 sps:$4 sm:$0xff]  }
 0x431   :  { %6574 = vmatpush1.bf16.msra.mxu0 %v8819_v30  ;;  %6746 = vmatpush1.bf16.msra.mxu1 %v8822_v36  ;;  %v8908_v30 = vld [vmem:[#allocation10 + $0x4ec] ss:$16 sps:$4 sm:$0xff]   ;;  %v8903_v36 = vld [vmem:[#allocation10 + $0x4e0] ss:$16 sps:$4 sm:$0xff]  }
 0x432   :  { %6575 = vmatprep.subr.bf16.mxu0 %v8827_v43  ;;  %6747 = vmatprep.subr.bf16.mxu1 %v8830_v22  ;;  %v8906_v43 = vld [vmem:[#allocation10 + $0x4e8] ss:$16 sps:$4 sm:$0xff]   ;;  %v8911_v22 = vld [vmem:[#allocation10 + $0x504] ss:$16 sps:$4 sm:$0xff]  }
 0x435   :  { %6576 = vmatpush1.bf16.msra.mxu0 %v8825_v26  ;;  %6748 = vmatpush1.bf16.msra.mxu1 %v8828_v47  ;;  %v8914_v26 = vld [vmem:[#allocation10 + $0x50c] ss:$16 sps:$4 sm:$0xff]   ;;  %v8909_v47 = vld [vmem:[#allocation10 + $0x500] ss:$16 sps:$4 sm:$0xff]  }
 0x436   :  { %6577 = vmatprep.subr.bf16.mxu0 %v8833_v39  ;;  %6749 = vmatprep.subr.bf16.mxu1 %v8836_v44  ;;  %v8912_v39 = vld [vmem:[#allocation10 + $0x508] ss:$16 sps:$4 sm:$0xff]   ;;  %v8917_v44 = vld [vmem:[#allocation10 + $0x524] ss:$16 sps:$4 sm:$0xff]  }
 0x439   :  { %6578 = vmatpush1.bf16.msra.mxu0 %v8831_v19  ;;  %6750 = vmatpush1.bf16.msra.mxu1 %v8834_v25  ;;  %v8920_v19 = vld [vmem:[#allocation10 + $0x52c] ss:$16 sps:$4 sm:$0xff]   ;;  %v8915_v25 = vld [vmem:[#allocation10 + $0x520] ss:$16 sps:$4 sm:$0xff]  }
 0x43a   :  { %6579 = vmatprep.subr.bf16.mxu0 %v8839_v59  ;;  %6751 = vmatprep.subr.bf16.mxu1 %v8842_v4  ;;  %v8918_v59 = vld [vmem:[#allocation10 + $0x528] ss:$16 sps:$4 sm:$0xff]   ;;  %v8923_v4 = vld [vmem:[#allocation10 + $0x544] ss:$16 sps:$4 sm:$0xff]  }
 0x43d   :  { %6580 = vmatpush1.bf16.msra.mxu0 %v8837_v27  ;;  %6752 = vmatpush1.bf16.msra.mxu1 %v8840_v41  ;;  %v8926_v27 = vld [vmem:[#allocation10 + $0x54c] ss:$16 sps:$4 sm:$0xff]   ;;  %v8921_v41 = vld [vmem:[#allocation10 + $0x540] ss:$16 sps:$4 sm:$0xff]  }
 0x43e   :  { %6581 = vmatprep.subr.bf16.mxu0 %v8845_v55  ;;  %6753 = vmatprep.subr.bf16.mxu1 %v8848_v48  ;;  %v8924_v55 = vld [vmem:[#allocation10 + $0x548] ss:$16 sps:$4 sm:$0xff]   ;;  %v8929_v48 = vld [vmem:[#allocation10 + $0x564] ss:$16 sps:$4 sm:$0xff]  }
 0x441   :  { %6582 = vmatpush1.bf16.msra.mxu0 %v8843_v14  ;;  %6754 = vmatpush1.bf16.msra.mxu1 %v8846_v16  ;;  %v8932_v14 = vld [vmem:[#allocation10 + $0x56c] ss:$16 sps:$4 sm:$0xff]   ;;  %v8927_v16 = vld [vmem:[#allocation10 + $0x560] ss:$16 sps:$4 sm:$0xff]  }
 0x442   :  { %6583 = vmatprep.subr.bf16.mxu0 %v8851_v49  ;;  %6755 = vmatprep.subr.bf16.mxu1 %v8854_v31  ;;  %v8930_v49 = vld [vmem:[#allocation10 + $0x568] ss:$16 sps:$4 sm:$0xff]   ;;  %v8935_v31 = vld [vmem:[#allocation10 + $0x584] ss:$16 sps:$4 sm:$0xff]  }
 0x445   :  { %6584 = vmatpush1.bf16.msra.mxu0 %v8849_v0  ;;  %6756 = vmatpush1.bf16.msra.mxu1 %v8852_v63  ;;  %v8938_v0 = vld [vmem:[#allocation10 + $0x58c] ss:$16 sps:$4 sm:$0xff]   ;;  %v8933_v63 = vld [vmem:[#allocation10 + $0x580] ss:$16 sps:$4 sm:$0xff]  }
 0x446   :  { %6585 = vmatprep.subr.bf16.mxu0 %v8857_v3  ;;  %6757 = vmatprep.subr.bf16.mxu1 %v8860_v61  ;;  %v8936_v3 = vld [vmem:[#allocation10 + $0x588] ss:$16 sps:$4 sm:$0xff]   ;;  %v8941_v61 = vld [vmem:[#allocation10 + $0x5a4] ss:$16 sps:$4 sm:$0xff]  }
 0x449   :  { %6586 = vmatpush1.bf16.msra.mxu0 %v8855_v12  ;;  %6758 = vmatpush1.bf16.msra.mxu1 %v8858_v2  ;;  %v8944_v12 = vld [vmem:[#allocation10 + $0x5ac] ss:$16 sps:$4 sm:$0xff]   ;;  %v8939_v2 = vld [vmem:[#allocation10 + $0x5a0] ss:$16 sps:$4 sm:$0xff]  }
 0x44a   :  { %6598 = vmatprep.subr.bf16.mxu0 %v8863_v46  ;;  %6770 = vmatprep.subr.bf16.mxu1 %v8866_v33  ;;  %v8942_v46 = vld [vmem:[#allocation10 + $0x5a8] ss:$16 sps:$4 sm:$0xff]   ;;  %v8947_v33 = vld [vmem:[#allocation10 + $0x5c4] ss:$16 sps:$4 sm:$0xff]  }
 0x44c   :  { %6588 = vmatmul.mubr.bf16.vlgmr.msra.gmra.mrb[8].mxu0 %v9903_v60  ;;  %6760 = vmatmul.mubr.bf16.vlgmr.msra.gmra.mrb[8].mxu1 %v9903_v60  ;;  %v8884_v60 = vld [vmem:[#allocation10 + $0x46c] ss:$16 sps:$4 sm:$0xff]  }
 0x44d   :  { %6599 = vmatpush1.bf16.msra.mxu0 %v8861_v34  ;;  %6630 = vmatprep.mubr.bf16.mxu0 %v9905_v15  ;;  %v8950_v34 = vld [vmem:[#allocation10 + $0x5cc] ss:$16 sps:$4 sm:$0xff]  }
 0x44e   :  { %6771 = vmatpush1.bf16.msra.mxu1 %v8864_v53  ;;  %6802 = vmatprep.mubr.bf16.mxu1 %v9905_v15  ;;  %v8890_v15 = vld [vmem:[#allocation10 + $0x48c] ss:$16 sps:$4 sm:$0xff]   ;;  %v8945_v53 = vld [vmem:[#allocation10 + $0x5c0] ss:$16 sps:$4 sm:$0xff]  }
 0x44f   :  { %6600 = vmatprep.subr.bf16.mxu0 %v8869_v32  ;;  %6772 = vmatprep.subr.bf16.mxu1 %v8872_v10  ;;  %v8948_v32 = vld [vmem:[#allocation10 + $0x5c8] ss:$16 sps:$4 sm:$0xff]   ;;  %v8953_v10 = vld [vmem:[#allocation10 + $0x5e4] ss:$16 sps:$4 sm:$0xff]  }
 0x451   :  { %6601 = vmatpush1.bf16.msra.mxu0 %v8867_v28  ;;  %v8956_v28 = vld [vmem:[#allocation10 + $0x5ec] ss:$16 sps:$4 sm:$0xff]  }
 0x452   :  { %6773 = vmatpush1.bf16.msra.mxu1 %v8870_v29  ;;  %6602 = vmatprep.subr.bf16.mxu0 %v8875_v23  ;;  %v8951_v29 = vld [vmem:[#allocation10 + $0x5e0] ss:$16 sps:$4 sm:$0xff]   ;;  %v8954_v23 = vld [vmem:[#allocation10 + $0x5e8] ss:$16 sps:$4 sm:$0xff]  }
 0x453   :  { %6774 = vmatprep.subr.bf16.mxu1 %v8878_v38  ;;  %v8959_v38 = vld [vmem:[#allocation10 + $0x604] ss:$16 sps:$4 sm:$0xff]  }
 0x455   :  { %6603 = vmatpush1.bf16.msra.mxu0 %v8873_v52  ;;  %v8962_v52 = vld [vmem:[#allocation10 + $0x60c] ss:$16 sps:$4 sm:$0xff]  }
 0x456   :  { %6775 = vmatpush1.bf16.msra.mxu1 %v8876_v13  ;;  %6604 = vmatprep.subr.bf16.mxu0 %v8881_v9  ;;  %v8957_v13 = vld [vmem:[#allocation10 + $0x600] ss:$16 sps:$4 sm:$0xff]   ;;  %v8960_v9 = vld [vmem:[#allocation10 + $0x608] ss:$16 sps:$4 sm:$0xff]  }
 0x457   :  { %6776 = vmatprep.subr.bf16.mxu1 %v8884_v60  ;;  %v8965_v60 = vld [vmem:[#allocation10 + $0x624] ss:$16 sps:$4 sm:$0xff]  }
 0x459   :  { %6605 = vmatpush1.bf16.msra.mxu0 %v8879_v50  ;;  %v8968_v50 = vld [vmem:[#allocation10 + $0x62c] ss:$16 sps:$4 sm:$0xff]  }
 0x45a   :  { %6777 = vmatpush1.bf16.msra.mxu1 %v8882_v56  ;;  %6606 = vmatprep.subr.bf16.mxu0 %v8887_v57  ;;  %v8963_v56 = vld [vmem:[#allocation10 + $0x620] ss:$16 sps:$4 sm:$0xff]   ;;  %v8966_v57 = vld [vmem:[#allocation10 + $0x628] ss:$16 sps:$4 sm:$0xff]  }
 0x45b   :  { %6778 = vmatprep.subr.bf16.mxu1 %v8890_v15  ;;  %v8971_v15 = vld [vmem:[#allocation10 + $0x644] ss:$16 sps:$4 sm:$0xff]  }
 0x45d   :  { %6607 = vmatpush1.bf16.msra.mxu0 %v8885_v11  ;;  %v8974_v11 = vld [vmem:[#allocation10 + $0x64c] ss:$16 sps:$4 sm:$0xff]  }
 0x45e   :  { %6779 = vmatpush1.bf16.msra.mxu1 %v8888_v24  ;;  %6608 = vmatprep.subr.bf16.mxu0 %v8893_v35  ;;  %v8969_v24 = vld [vmem:[#allocation10 + $0x640] ss:$16 sps:$4 sm:$0xff]   ;;  %v8972_v35 = vld [vmem:[#allocation10 + $0x648] ss:$16 sps:$4 sm:$0xff]  }
 0x45f   :  { %6780 = vmatprep.subr.bf16.mxu1 %v8896_v37  ;;  %v8977_v37 = vld [vmem:[#allocation10 + $0x664] ss:$16 sps:$4 sm:$0xff]  }
 0x461   :  { %6609 = vmatpush1.bf16.msra.mxu0 %v8891_v7  ;;  %v8975_v7 = vld [vmem:[#allocation10 + $0x660] ss:$16 sps:$4 sm:$0xff]  }
 0x462   :  { %6781 = vmatpush1.bf16.msra.mxu1 %v8894_v40  ;;  %6610 = vmatprep.subr.bf16.mxu0 %v8899_v17  ;;  %v8978_v40 = vld [vmem:[#allocation10 + $0x668] ss:$16 sps:$4 sm:$0xff]   ;;  %v8983_v17 = vld [vmem:[#allocation10 + $0x684] ss:$16 sps:$4 sm:$0xff]  }
 0x463   :  { %6782 = vmatprep.subr.bf16.mxu1 %v8902_v45  ;;  %v8986_v45 = vld [vmem:[#allocation10 + $0x68c] ss:$16 sps:$4 sm:$0xff]  }
 0x465   :  { %6611 = vmatpush1.bf16.msra.mxu0 %v8897_v18  ;;  %v8984_v18 = vld [vmem:[#allocation10 + $0x688] ss:$16 sps:$4 sm:$0xff]  }
 0x466   :  { %6783 = vmatpush1.bf16.msra.mxu1 %v8900_v42  ;;  %6612 = vmatprep.subr.bf16.mxu0 %v8905_v58  ;;  %v8989_v42 = vld [vmem:[#allocation10 + $0x6a4] ss:$16 sps:$4 sm:$0xff]   ;;  %v8992_v58 = vld [vmem:[#allocation10 + $0x6ac] ss:$16 sps:$4 sm:$0xff]  }
 0x467   :  { %6784 = vmatprep.subr.bf16.mxu1 %v8908_v30  ;;  %v8987_v30 = vld [vmem:[#allocation10 + $0x6a0] ss:$16 sps:$4 sm:$0xff]  }
 0x469   :  { %6613 = vmatpush1.bf16.msra.mxu0 %v8903_v36  ;;  %v8990_v36 = vld [vmem:[#allocation10 + $0x6a8] ss:$16 sps:$4 sm:$0xff]  }
 0x46a   :  { %6785 = vmatpush1.bf16.msra.mxu1 %v8906_v43  ;;  %6614 = vmatprep.subr.bf16.mxu0 %v8911_v22  ;;  %v8995_v43 = vld [vmem:[#allocation10 + $0x6c4] ss:$16 sps:$4 sm:$0xff]   ;;  %v8998_v22 = vld [vmem:[#allocation10 + $0x6cc] ss:$16 sps:$4 sm:$0xff]  }
 0x46b   :  { %6786 = vmatprep.subr.bf16.mxu1 %v8914_v26  ;;  %v8993_v26 = vld [vmem:[#allocation10 + $0x6c0] ss:$16 sps:$4 sm:$0xff]  }
 0x46d   :  { %6615 = vmatpush1.bf16.msra.mxu0 %v8909_v47  ;;  %v8996_v47 = vld [vmem:[#allocation10 + $0x6c8] ss:$16 sps:$4 sm:$0xff]  }
 0x46e   :  { %6787 = vmatpush1.bf16.msra.mxu1 %v8912_v39  ;;  %6616 = vmatprep.subr.bf16.mxu0 %v8917_v44  ;;  %v9001_v39 = vld [vmem:[#allocation10 + $0x6e4] ss:$16 sps:$4 sm:$0xff]   ;;  %v9004_v44 = vld [vmem:[#allocation10 + $0x6ec] ss:$16 sps:$4 sm:$0xff]  }
 0x46f   :  { %6788 = vmatprep.subr.bf16.mxu1 %v8920_v19  ;;  %v8999_v19 = vld [vmem:[#allocation10 + $0x6e0] ss:$16 sps:$4 sm:$0xff]  }
 0x471   :  { %6617 = vmatpush1.bf16.msra.mxu0 %v8915_v25  ;;  %v9002_v25 = vld [vmem:[#allocation10 + $0x6e8] ss:$16 sps:$4 sm:$0xff]  }
 0x472   :  { %6789 = vmatpush1.bf16.msra.mxu1 %v8918_v59  ;;  %6618 = vmatprep.subr.bf16.mxu0 %v8923_v4  ;;  %v9007_v59 = vld [vmem:[#allocation10 + $0x704] ss:$16 sps:$4 sm:$0xff]   ;;  %v9010_v4 = vld [vmem:[#allocation10 + $0x70c] ss:$16 sps:$4 sm:$0xff]  }
 0x473   :  { %6790 = vmatprep.subr.bf16.mxu1 %v8926_v27  ;;  %v9005_v27 = vld [vmem:[#allocation10 + $0x700] ss:$16 sps:$4 sm:$0xff]  }
 0x475   :  { %6619 = vmatpush1.bf16.msra.mxu0 %v8921_v41  ;;  %v9008_v41 = vld [vmem:[#allocation10 + $0x708] ss:$16 sps:$4 sm:$0xff]  }
 0x476   :  { %6791 = vmatpush1.bf16.msra.mxu1 %v8924_v55  ;;  %6620 = vmatprep.subr.bf16.mxu0 %v8929_v48  ;;  %v9013_v55 = vld [vmem:[#allocation10 + $0x724] ss:$16 sps:$4 sm:$0xff]   ;;  %v9016_v48 = vld [vmem:[#allocation10 + $0x72c] ss:$16 sps:$4 sm:$0xff]  }
 0x477   :  { %6792 = vmatprep.subr.bf16.mxu1 %v8932_v14  ;;  %v9011_v14 = vld [vmem:[#allocation10 + $0x720] ss:$16 sps:$4 sm:$0xff]  }
 0x479   :  { %6621 = vmatpush1.bf16.msra.mxu0 %v8927_v16  ;;  %v9014_v16 = vld [vmem:[#allocation10 + $0x728] ss:$16 sps:$4 sm:$0xff]  }
 0x47a   :  { %6793 = vmatpush1.bf16.msra.mxu1 %v8930_v49  ;;  %6622 = vmatprep.subr.bf16.mxu0 %v8935_v31  ;;  %v9019_v49 = vld [vmem:[#allocation10 + $0x744] ss:$16 sps:$4 sm:$0xff]   ;;  %v9022_v31 = vld [vmem:[#allocation10 + $0x74c] ss:$16 sps:$4 sm:$0xff]  }
 0x47b   :  { %6794 = vmatprep.subr.bf16.mxu1 %v8938_v0  ;;  %v9017_v0 = vld [vmem:[#allocation10 + $0x740] ss:$16 sps:$4 sm:$0xff]  }
 0x47d   :  { %6623 = vmatpush1.bf16.msra.mxu0 %v8933_v63  ;;  %v9020_v63 = vld [vmem:[#allocation10 + $0x748] ss:$16 sps:$4 sm:$0xff]  }
 0x47e   :  { %6795 = vmatpush1.bf16.msra.mxu1 %v8936_v3  ;;  %6624 = vmatprep.subr.bf16.mxu0 %v8941_v61  ;;  %v9025_v3 = vld [vmem:[#allocation10 + $0x764] ss:$16 sps:$4 sm:$0xff]   ;;  %v9028_v61 = vld [vmem:[#allocation10 + $0x76c] ss:$16 sps:$4 sm:$0xff]  }
 0x47f   :  { %6796 = vmatprep.subr.bf16.mxu1 %v8944_v12  ;;  %v9023_v12 = vld [vmem:[#allocation10 + $0x760] ss:$16 sps:$4 sm:$0xff]  }
 0x481   :  { %6625 = vmatpush1.bf16.msra.mxu0 %v8939_v2  ;;  %v9026_v2 = vld [vmem:[#allocation10 + $0x768] ss:$16 sps:$4 sm:$0xff]  }
 0x482   :  { %6797 = vmatpush1.bf16.msra.mxu1 %v8942_v46  ;;  %6626 = vmatprep.subr.bf16.mxu0 %v8947_v33  ;;  %v9031_v46 = vld [vmem:[#allocation10 + $0x784] ss:$16 sps:$4 sm:$0xff]   ;;  %v9034_v33 = vld [vmem:[#allocation10 + $0x78c] ss:$16 sps:$4 sm:$0xff]  }
 0x483   :  { %6798 = vmatprep.subr.bf16.mxu1 %v8950_v34  ;;  %v9029_v34 = vld [vmem:[#allocation10 + $0x780] ss:$16 sps:$4 sm:$0xff]  }
 0x485   :  { %6627 = vmatpush1.bf16.msra.mxu0 %v8945_v53  ;;  %v9032_v53 = vld [vmem:[#allocation10 + $0x788] ss:$16 sps:$4 sm:$0xff]  }
 0x486   :  { %6799 = vmatpush1.bf16.msra.mxu1 %v8948_v32  ;;  %6628 = vmatprep.subr.bf16.mxu0 %v8953_v10  ;;  %v9037_v32 = vld [vmem:[#allocation10 + $0x7a4] ss:$16 sps:$4 sm:$0xff]   ;;  %v9040_v10 = vld [vmem:[#allocation10 + $0x7ac] ss:$16 sps:$4 sm:$0xff]  }
 0x487   :  { %6800 = vmatprep.subr.bf16.mxu1 %v8956_v28  ;;  %v9035_v28 = vld [vmem:[#allocation10 + $0x7a0] ss:$16 sps:$4 sm:$0xff]  }
 0x489   :  { %6629 = vmatpush1.bf16.msra.mxu0 %v8951_v29  ;;  %v9038_v29 = vld [vmem:[#allocation10 + $0x7a8] ss:$16 sps:$4 sm:$0xff]  }
 0x48a   :  { %6801 = vmatpush1.bf16.msra.mxu1 %v8954_v23  ;;  %6641 = vmatprep.subr.bf16.mxu0 %v8959_v38  ;;  %v9043_v23 = vld [vmem:[#allocation10 + $0x7c4] ss:$16 sps:$4 sm:$0xff]   ;;  %v9046_v38 = vld [vmem:[#allocation10 + $0x7cc] ss:$16 sps:$4 sm:$0xff]  }
 0x48b   :  { %6813 = vmatprep.subr.bf16.mxu1 %v8962_v52  ;;  %v9041_v52 = vld [vmem:[#allocation10 + $0x7c0] ss:$16 sps:$4 sm:$0xff]  }
 0x48c   :  { %6631 = vmatmul.mubr.bf16.vlgmr.msra.gmra.mrb[8].mxu0 %v9907_v62 }
 0x48d   :  { %6803 = vmatmul.mubr.bf16.vlgmr.msra.gmra.mrb[8].mxu1 %v9907_v62  ;;  %6642 = vmatpush1.bf16.msra.mxu0 %v8957_v13  ;;  %v8980_v62 = vld [vmem:[#allocation10 + $0x66c] ss:$16 sps:$4 sm:$0xff]   ;;  %v9044_v13 = vld [vmem:[#allocation10 + $0x7c8] ss:$16 sps:$4 sm:$0xff]  }
 0x48e   :  { %6673 = vmatprep.mubr.bf16.mxu0 %v9909_v1  ;;  %6814 = vmatpush1.bf16.msra.mxu1 %v8960_v9  ;;  %v9049_v9 = vld [vmem:[#allocation10 + $0x7e4] ss:$16 sps:$4 sm:$0xff]  }
 0x48f   :  { %6845 = vmatprep.mubr.bf16.mxu1 %v9909_v1  ;;  %6643 = vmatprep.subr.bf16.mxu0 %v8965_v60  ;;  %v8981_v1 = vld [vmem:[#allocation10 + $0x680] ss:$16 sps:$4 sm:$0xff]   ;;  %v9052_v60 = vld [vmem:[#allocation10 + $0x7ec] ss:$16 sps:$4 sm:$0xff]  }
 0x490   :  { %6815 = vmatprep.subr.bf16.mxu1 %v8968_v50  ;;  %v9047_v50 = vld [vmem:[#allocation10 + $0x7e0] ss:$16 sps:$4 sm:$0xff]  }
 0x491   :  { %6644 = vmatpush1.bf16.msra.mxu0 %v8963_v56  ;;  %v9050_v56 = vld [vmem:[#allocation10 + $0x7e8] ss:$16 sps:$4 sm:$0xff]  }
 0x492   :  { %6816 = vmatpush1.bf16.msra.mxu1 %v8966_v57  ;;  %6645 = vmatprep.subr.bf16.mxu0 %v8971_v15  ;;  %v9053_v57 = vld [vmem:[%s10128_s7 + $0x40] sm:$0xff]  }
 0x493   :  { %6817 = vmatprep.subr.bf16.mxu1 %v8974_v11  ;;  %v9054_v15 = vld [vmem:[%s10128_s7 + $0xc0] sm:$0xff]  }
 0x494   :  { %v9055_v11 = vld [vmem:[%s10128_s7] sm:$0xff]  }
 0x495   :  { %6646 = vmatpush1.bf16.msra.mxu0 %v8969_v24  ;;  %v9056_v24 = vld [vmem:[%s10128_s7 + $0x80] sm:$0xff]  }
 0x496   :  { %6818 = vmatpush1.bf16.msra.mxu1 %v8972_v35  ;;  %6647 = vmatprep.subr.bf16.mxu0 %v8977_v37  ;;  %v9058_v35 = vld [vmem:[%s10128_s7 + $0xc8] sm:$0xff]  }
 0x497   :  { %6819 = vmatprep.subr.bf16.mxu1 %v8980_v62  ;;  %v9059_v37 = vld [vmem:[%s10128_s7 + $0x8] sm:$0xff]  }
 0x498   :  { %v9060_v62 = vld [vmem:[%s10128_s7 + $0x88] sm:$0xff]  }
 0x499   :  { %6648 = vmatpush1.bf16.msra.mxu0 %v8975_v7  ;;  %v9061_v7 = vld [vmem:[%s10128_s7 + $0x50] sm:$0xff]  }
 0x49a   :  { %6820 = vmatpush1.bf16.msra.mxu1 %v8978_v40  ;;  %6649 = vmatprep.subr.bf16.mxu0 %v8983_v17  ;;  %v9062_v40 = vld [vmem:[%s10128_s7 + $0xd0] sm:$0xff]  }
 0x49b   :  { %6821 = vmatprep.subr.bf16.mxu1 %v8986_v45  ;;  %v9063_v17 = vld [vmem:[%s10128_s7 + $0x10] sm:$0xff]  }
 0x49c   :  { %v9064_v45 = vld [vmem:[%s10128_s7 + $0x90] sm:$0xff]  }
 0x49d   :  { %6650 = vmatpush1.bf16.msra.mxu0 %v8981_v1  ;;  %v9065_v1 = vld [vmem:[%s10128_s7 + $0x58] sm:$0xff]  }
 0x49e   :  { %6822 = vmatpush1.bf16.msra.mxu1 %v8984_v18  ;;  %6651 = vmatprep.subr.bf16.mxu0 %v8989_v42  ;;  %v9066_v18 = vld [vmem:[%s10128_s7 + $0xd8] sm:$0xff]  }
 0x49f   :  { %6823 = vmatprep.subr.bf16.mxu1 %v8992_v58  ;;  %v9067_v42 = vld [vmem:[%s10128_s7 + $0x18] sm:$0xff]  }
 0x4a0   :  { %v9068_v58 = vld [vmem:[%s10128_s7 + $0x98] sm:$0xff]  }
 0x4a1   :  { %6652 = vmatpush1.bf16.msra.mxu0 %v8987_v30  ;;  %v9069_v30 = vld [vmem:[%s10128_s7 + $0x60] sm:$0xff]  }
 0x4a2   :  { %6824 = vmatpush1.bf16.msra.mxu1 %v8990_v36  ;;  %6653 = vmatprep.subr.bf16.mxu0 %v8995_v43  ;;  %v9070_v36 = vld [vmem:[%s10128_s7 + $0xe0] sm:$0xff]  }
 0x4a3   :  { %6825 = vmatprep.subr.bf16.mxu1 %v8998_v22  ;;  %v9071_v43 = vld [vmem:[%s10128_s7 + $0x20] sm:$0xff]  }
 0x4a4   :  { %v9072_v22 = vld [vmem:[%s10128_s7 + $0xa0] sm:$0xff]  }
 0x4a5   :  { %6654 = vmatpush1.bf16.msra.mxu0 %v8993_v26  ;;  %v9073_v26 = vld [vmem:[%s10128_s7 + $0x68] sm:$0xff]  }
 0x4a6   :  { %6826 = vmatpush1.bf16.msra.mxu1 %v8996_v47  ;;  %6655 = vmatprep.subr.bf16.mxu0 %v9001_v39  ;;  %v9074_v47 = vld [vmem:[%s10128_s7 + $0xe8] sm:$0xff]  }
 0x4a7   :  { %6827 = vmatprep.subr.bf16.mxu1 %v9004_v44  ;;  %v9075_v39 = vld [vmem:[%s10128_s7 + $0x28] sm:$0xff]  }
 0x4a8   :  { %v9076_v44 = vld [vmem:[%s10128_s7 + $0xa8] sm:$0xff]  }
 0x4a9   :  { %6656 = vmatpush1.bf16.msra.mxu0 %v8999_v19  ;;  %v9077_v19 = vld [vmem:[%s10128_s7 + $0x70] sm:$0xff]  }
 0x4aa   :  { %6828 = vmatpush1.bf16.msra.mxu1 %v9002_v25  ;;  %6657 = vmatprep.subr.bf16.mxu0 %v9007_v59  ;;  %v9078_v25 = vld [vmem:[%s10128_s7 + $0xf0] sm:$0xff]  }
 0x4ab   :  { %6829 = vmatprep.subr.bf16.mxu1 %v9010_v4  ;;  %v9079_v59 = vld [vmem:[%s10128_s7 + $0x30] sm:$0xff]  }
 0x4ac   :  { %v9080_v4 = vld [vmem:[%s10128_s7 + $0xb0] sm:$0xff]  }
 0x4ad   :  { %6658 = vmatpush1.bf16.msra.mxu0 %v9005_v27  ;;  %v9081_v27 = vld [vmem:[%s10128_s7 + $0x78] sm:$0xff]  }
 0x4ae   :  { %6830 = vmatpush1.bf16.msra.mxu1 %v9008_v41  ;;  %6659 = vmatprep.subr.bf16.mxu0 %v9013_v55  ;;  %v9082_v41 = vld [vmem:[%s10128_s7 + $0xf8] sm:$0xff]  }
 0x4af   :  { %6831 = vmatprep.subr.bf16.mxu1 %v9016_v48  ;;  %v9083_v55 = vld [vmem:[%s10128_s7 + $0x38] sm:$0xff]  }
 0x4b0   :  { %v9084_v48 = vld [vmem:[%s10128_s7 + $0xb8] sm:$0xff]  }
 0x4b1   :  { %6660 = vmatpush1.bf16.msra.mxu0 %v9011_v14 }
 0x4b2   :  { %6832 = vmatpush1.bf16.msra.mxu1 %v9014_v16  ;;  %6661 = vmatprep.subr.bf16.mxu0 %v9019_v49 }
 0x4b3   :  { %6833 = vmatprep.subr.bf16.mxu1 %v9022_v31 }
 0x4b5   :  { %6662 = vmatpush1.bf16.msra.mxu0 %v9017_v0 }
 0x4b6   :  { %6834 = vmatpush1.bf16.msra.mxu1 %v9020_v63  ;;  %6663 = vmatprep.subr.bf16.mxu0 %v9025_v3 }
 0x4b7   :  { %6835 = vmatprep.subr.bf16.mxu1 %v9028_v61 }
 0x4b9   :  { %6664 = vmatpush1.bf16.msra.mxu0 %v9023_v12 }
 0x4ba   :  { %6836 = vmatpush1.bf16.msra.mxu1 %v9026_v2  ;;  %6665 = vmatprep.subr.bf16.mxu0 %v9031_v46 }
 0x4bb   :  { %6837 = vmatprep.subr.bf16.mxu1 %v9034_v33 }
 0x4bd   :  { %6666 = vmatpush1.bf16.msra.mxu0 %v9029_v34 }
 0x4be   :  { %6838 = vmatpush1.bf16.msra.mxu1 %v9032_v53  ;;  %6667 = vmatprep.subr.bf16.mxu0 %v9037_v32 }
 0x4bf   :  { %6839 = vmatprep.subr.bf16.mxu1 %v9040_v10 }
 0x4c1   :  { %6668 = vmatpush1.bf16.msra.mxu0 %v9035_v28 }
 0x4c2   :  { %6840 = vmatpush1.bf16.msra.mxu1 %v9038_v29  ;;  %6669 = vmatprep.subr.bf16.mxu0 %v9043_v23 }
 0x4c3   :  { %6841 = vmatprep.subr.bf16.mxu1 %v9046_v38 }
 0x4c5   :  { %6670 = vmatpush1.bf16.msra.mxu0 %v9041_v52 }
 0x4c6   :  { %6842 = vmatpush1.bf16.msra.mxu1 %v9044_v13  ;;  %6671 = vmatprep.subr.bf16.mxu0 %v9049_v9 }
 0x4c7   :  { %6843 = vmatprep.subr.bf16.mxu1 %v9052_v60 }
 0x4c9   :  { %6672 = vmatpush1.bf16.msra.mxu0 %v9047_v50 }
 0x4ca   :  { %6844 = vmatpush1.bf16.msra.mxu1 %v9050_v56  ;;  %8493 = vmatprep.subr.bf16.mxu0 %v9053_v57 }
 0x4cb   :  { %8515 = vmatprep.subr.bf16.mxu1 %v9054_v15 }
 0x4cc   :  { %6674 = vmatmul.mubr.bf16.vlgmr.msra.gmra.mrb[8].mxu0 %v9911_v54 }
 0x4cd   :  { %6846 = vmatmul.mubr.bf16.vlgmr.msra.gmra.mrb[8].mxu1 %v9911_v54  ;;  %8494 = vmatpush3.bf16.msra.mxu0 %v9055_v11  ;;  %v9057_v54 = vld [vmem:[%s10128_s7 + $0x48] sm:$0xff]   ;;  %s9373_s7 = smov 64  }
 0x4ce   :  { %8516 = vmatpush3.bf16.msra.mxu1 %v9056_v24  ;;  %8495 = vmatprep.subr.bf16.mxu0 %v9057_v54 }
 0x4cf   :  { %8517 = vmatprep.subr.bf16.mxu1 %v9058_v35 }
 0x4d1   :  { %8496 = vmatpush3.bf16.msra.mxu0 %v9059_v37 }
 0x4d2   :  { %8518 = vmatpush3.bf16.msra.mxu1 %v9060_v62  ;;  %8497 = vmatprep.subr.bf16.mxu0 %v9061_v7 }
 0x4d3   :  { %8519 = vmatprep.subr.bf16.mxu1 %v9062_v40 }
 0x4d5   :  { %8498 = vmatpush3.bf16.msra.mxu0 %v9063_v17 }
 0x4d6   :  { %8520 = vmatpush3.bf16.msra.mxu1 %v9064_v45  ;;  %8499 = vmatprep.subr.bf16.mxu0 %v9065_v1 }
 0x4d7   :  { %8521 = vmatprep.subr.bf16.mxu1 %v9066_v18 }
 0x4d9   :  { %8500 = vmatpush3.bf16.msra.mxu0 %v9067_v42 }
 0x4da   :  { %8522 = vmatpush3.bf16.msra.mxu1 %v9068_v58  ;;  %8501 = vmatprep.subr.bf16.mxu0 %v9069_v30 }
 0x4db   :  { %8523 = vmatprep.subr.bf16.mxu1 %v9070_v36 }
 0x4dd   :  { %8502 = vmatpush3.bf16.msra.mxu0 %v9071_v43 }
 0x4de   :  { %8524 = vmatpush3.bf16.msra.mxu1 %v9072_v22  ;;  %8503 = vmatprep.subr.bf16.mxu0 %v9073_v26 }
 0x4df   :  { %8525 = vmatprep.subr.bf16.mxu1 %v9074_v47 }
 0x4e1   :  { %8504 = vmatpush3.bf16.msra.mxu0 %v9075_v39 }
 0x4e2   :  { %8526 = vmatpush3.bf16.msra.mxu1 %v9076_v44  ;;  %8505 = vmatprep.subr.bf16.mxu0 %v9077_v19 }
 0x4e3   :  { %8527 = vmatprep.subr.bf16.mxu1 %v9078_v25 }
 0x4e5   :  { %8506 = vmatpush3.bf16.msra.mxu0 %v9079_v59 }
 0x4e6   :  { %8528 = vmatpush3.bf16.msra.mxu1 %v9080_v4  ;;  %8507 = vmatprep.subr.bf16.mxu0 %v9081_v27 }
 0x4e7   :  { %8529 = vmatprep.subr.bf16.mxu1 %v9082_v41 }
 0x4e9   :  { %8508 = vmatpush3.bf16.msra.mxu0 %v9083_v55 }
 0x4ea   :  { %8530 = vmatpush3.bf16.msra.mxu1 %v9084_v48 }
 0x59f   :  { %v10019_v14 = vpop.f32.mrb[8].mxu0 }
 0x5a0   :  { %v10021_v16 = vpop.f32.mrb[8].mxu1  ;;  %v10023_v49 = vpop.f32.mrb[9].mxu0  ;;  %v6856_v31 = vmul.f32 %v10019_v14, %v10019_v14 }
 0x5a1   :  { %v6858_v0 = vmul.f32 %v10021_v16, %v10021_v16  ;;  %v10029_v63 = vpop.f32.mrb[9].mxu1  ;;  %v10031_v3 = vpop.f32.mrb[10].mxu0  ;;  %v6857_v61 = vmul.f32 %v10023_v49, %v10023_v49 }
 0x5a2   :  { %v6859_v12 = vmul.f32 %v10029_v63, %v10029_v63  ;;  %v6860_v2 = vmul.f32 %v10031_v3, %v10031_v3  ;;  %v6864_v46 = vadd.f32 %v10031_v3, %v10019_v14  ;;  %v10041_v33 = vpop.f32.mrb[10].mxu1  ;;  %v10043_v34 = vpop.f32.mrb[11].mxu0 }
 0x5a3   :  { %v6862_v53 = vmul.f32 %v10041_v33, %v10041_v33  ;;  %v6878_v32 = vadd.f32 %v10041_v33, %v10021_v16  ;;  %v6861_v10 = vmul.f32 %v10043_v34, %v10043_v34  ;;  %v6871_v28 = vadd.f32 %v10043_v34, %v10023_v49  ;;  %v10053_v29 = vpop.f32.mrb[11].mxu1 }
 0x5a4   :  { %v6865_v23 = vrot.slane %v6864_v46, 4  ;;  %v6892_v38 = vadd.f32 %v6860_v2, %v6856_v31  ;;  %v6863_v52 = vmul.f32 %v10053_v29, %v10053_v29  ;;  %v6885_v13 = vadd.f32 %v10053_v29, %v10029_v63 }
 0x5a5   :  { %v6879_v9 = vrot.slane %v6878_v32, 4  ;;  %v6906_v60 = vadd.f32 %v6862_v53, %v6858_v0  ;;  %v6872_v50 = vrot.slane %v6871_v28, 4  ;;  %v6899_v56 = vadd.f32 %v6861_v10, %v6857_v61 }
 0x5a6   :  { %v6866_v57 = vadd.f32 %v6865_v23, %v6864_v46  ;;  %v6893_v15 = vrot.slane %v6892_v38, 4  ;;  %v6886_v11 = vrot.slane %v6885_v13, 4  ;;  %v6913_v24 = vadd.f32 %v6863_v52, %v6859_v12 }
 0x5a7   :  { %v6880_v54 = vadd.f32 %v6879_v9, %v6878_v32  ;;  %v6907_v35 = vrot.slane %v6906_v60, 4  ;;  %v6873_v37 = vadd.f32 %v6872_v50, %v6871_v28  ;;  %v6900_v62 = vrot.slane %v6899_v56, 4 }
 0x5a8   :  { %v6867_v7 = vrot.slane %v6866_v57, 2  ;;  %v6894_v40 = vadd.f32 %v6893_v15, %v6892_v38  ;;  %v6887_v17 = vadd.f32 %v6886_v11, %v6885_v13  ;;  %v6914_v45 = vrot.slane %v6913_v24, 4 }
 0x5a9   :  { %v6881_v1 = vrot.slane %v6880_v54, 2  ;;  %v6908_v18 = vadd.f32 %v6907_v35, %v6906_v60  ;;  %v6874_v42 = vrot.slane %v6873_v37, 2  ;;  %v6901_v58 = vadd.f32 %v6900_v62, %v6899_v56 }
 0x5aa   :  { %v6868_v30 = vadd.f32 %v6867_v7, %v6866_v57  ;;  %v6895_v36 = vrot.slane %v6894_v40, 2  ;;  %v6888_v43 = vrot.slane %v6887_v17, 2  ;;  %v6915_v22 = vadd.f32 %v6914_v45, %v6913_v24 }
 0x5ab   :  { %v6882_v26 = vadd.f32 %v6881_v1, %v6880_v54  ;;  %v6909_v47 = vrot.slane %v6908_v18, 2  ;;  %v6875_v39 = vadd.f32 %v6874_v42, %v6873_v37  ;;  %v6902_v44 = vrot.slane %v6901_v58, 2 }
 0x5ac   :  { %v6869_v19 = vrot.slane %v6868_v30, 1  ;;  %v6896_v25 = vadd.f32 %v6895_v36, %v6894_v40  ;;  %v6889_v59 = vadd.f32 %v6888_v43, %v6887_v17  ;;  %v6916_v4 = vrot.slane %v6915_v22, 2 }
 0x5ad   :  { %v6883_v27 = vrot.slane %v6882_v26, 1  ;;  %v6910_v41 = vadd.f32 %v6909_v47, %v6908_v18  ;;  %v6876_v55 = vrot.slane %v6875_v39, 1  ;;  %v6903_v48 = vadd.f32 %v6902_v44, %v6901_v58 }
 0x5ae   :  { %v6870_v31 = vadd.f32 %v6869_v19, %v6868_v30  ;;  %v6897_v0 = vrot.slane %v6896_v25, 1  ;;  %v6890_v61 = vrot.slane %v6889_v59, 1  ;;  %v6917_v12 = vadd.f32 %v6916_v4, %v6915_v22 }
 0x5af   :  { %v6884_v2 = vadd.f32 %v6883_v27, %v6882_v26  ;;  %v6911_v46 = vrot.slane %v6910_v41, 1  ;;  %v6877_v53 = vadd.f32 %v6876_v55, %v6875_v39  ;;  %v6904_v32 = vrot.slane %v6903_v48, 1 }
 0x5b0   :  { %v6898_v10 = vadd.f32 %v6897_v0, %v6896_v25  ;;  %v6920_v28 = vmul.f32 0.0625, %v6870_v31  ;;  %v6891_v23 = vadd.f32 %v6890_v61, %v6889_v59  ;;  %v6918_v38 = vrot.slane %v6917_v12, 1 }
 0x5b1   :  { %v6912_v52 = vadd.f32 %v6911_v46, %v6910_v41  ;;  %v6922_v13 = vmul.f32 0.0625, %v6884_v2  ;;  %v6905_v9 = vadd.f32 %v6904_v32, %v6903_v48  ;;  %v6921_v60 = vmul.f32 0.0625, %v6877_v53  ;;  %v6940_v41 = vld [vmem:[#allocation11] sm:$0xf] }
 0x5b2   :  { %v6924_v50 = vmul.f32 0.0625, %v6898_v10  ;;  %v6928_v56 = vmul.f32 %v6920_v28, %v6920_v28  ;;  %v6919_v57 = vadd.f32 %v6918_v38, %v6917_v12  ;;  %v6923_v15 = vmul.f32 0.0625, %v6891_v23 }
 0x5b3   :  { %v6926_v11 = vmul.f32 0.0625, %v6912_v52  ;;  %v6930_v24 = vmul.f32 %v6922_v13, %v6922_v13  ;;  %v6925_v54 = vmul.f32 0.0625, %v6905_v9  ;;  %v6929_v35 = vmul.f32 %v6921_v60, %v6921_v60 }
 0x5b4   :  { %v6932_v37 = vsub.f32 %v6924_v50, %v6928_v56  ;;  %v6927_v62 = vmul.f32 0.0625, %v6919_v57  ;;  %v6931_v7 = vmul.f32 %v6923_v15, %v6923_v15 }
 0x5b5   :  { %v6934_v40 = vsub.f32 %v6926_v11, %v6930_v24  ;;  %v6933_v17 = vsub.f32 %v6925_v54, %v6929_v35 }
 0x5b6   :  { %v6936_v45 = vmax.f32 %v6932_v37, 0.0  ;;  %v6935_v1 = vsub.f32 %v6927_v62, %v6931_v7 }
 0x5b7   :  { %v6938_v18 = vmax.f32 %v6934_v40, 0.0  ;;  %v6937_v42 = vmax.f32 %v6933_v17, 0.0 }
 0x5b8   :  { %v6941_v58 = vadd.f32 1e-05, %v6936_v45  ;;  %v6939_v30 = vmax.f32 %v6935_v1, 0.0 }
 0x5b9   :  { %v6943_v36 = vadd.f32 1e-05, %v6938_v18  ;;  %v6942_v43 = vadd.f32 1e-05, %v6937_v42 }
 0x5ba   :  { %9105 = vrsqrt.f32 %v6941_v58  ;;  %v6944_v22 = vadd.f32 1e-05, %v6939_v30 }
 0x5bb   :  { %9107 = vrsqrt.f32 %v6943_v36 }
 0x5bc   :  { %9109 = vrsqrt.f32 %v6942_v43 }
 0x5bd   :  { %9111 = vrsqrt.f32 %v6944_v22 }
 0x5c4   :  { %v9106_v26 = vpop.eup %9105 }
 0x5c5   :  { %v9108_v47 = vpop.eup %9107 }
 0x5c6   :  { %v9110_v39 = vpop.eup %9109 }
 0x5c7   :  { %v9112_v44 = vpop.eup %9111  ;;  %v6953_v19 = vcombine.low %v9106_v26, %v9110_v39 }
 0x5c8   :  { %v6954_v25 = vcombine.low %v9108_v47, %v9112_v44 }
 0x5c9   :  { %v6961_v59 = vrot.slane %v6953_v19, %v9784_v51 }
 0x5ca   :  { %v6968_v4 = vrot.slane %v6954_v25, %v9784_v51 }
 0x5cc   :  { %v6969_v27 = vcombine.low %v6961_v59, %v6968_v4 }
 0x5ce   :  { %v6976_v55 = vrot.slane %v6969_v27, %v9784_v51 }
 0x5d0   :  { %v6978_v48 = vmul.f32 %v6976_v55, %v6940_v41 }
 0x5d2   :  { %v6984_v31 = vrot.slane %v6978_v48, %v9852_v6  ;;  %v6988_v0 = vrot.slane %v6978_v48, %v9855_v5  ;;  %v6992_v61 = vrot.slane %v6978_v48, %v9858_v21  ;;  %v6996_v12 = vrot.slane %v6978_v48, %v9861_v8 }
 0x5d4   :  { %v7001_v2 = vmul.f32 %v6984_v31, %v6920_v28  ;;  %v7002_v46 = vmul.f32 %v6988_v0, %v6921_v60  ;;  %v7003_v53 = vmul.f32 %v6992_v61, %v6922_v13  ;;  %v7004_v32 = vmul.f32 %v6996_v12, %v6923_v15 }
 0x5d5   :  { %v7042_v10 = vmul.f32 %v6996_v12, %v10053_v29  ;;  %v7036_v23 = vmul.f32 %v6988_v0, %v10023_v49  ;;  %v7040_v38 = vmul.f32 %v6988_v0, %v10043_v34  ;;  %v7038_v52 = vmul.f32 %v6996_v12, %v10029_v63  ;;  %v6979_v49 = vld [vmem:[#allocation13] sm:$0xf] }
 0x5d6   :  { %v7009_v9 = vcombine.low %v7001_v2, %v7002_v46  ;;  %v7010_v50 = vcombine.low %v7003_v53, %v7004_v32  ;;  %v7035_v56 = vmul.f32 %v6984_v31, %v10019_v14  ;;  %v7039_v57 = vmul.f32 %v6984_v31, %v10031_v3 }
 0x5d7   :  { %v7037_v11 = vmul.f32 %v6992_v61, %v10021_v16  ;;  %v7041_v28 = vmul.f32 %v6992_v61, %v10041_v33 }
 0x5d8   :  { %v7017_v13 = vrot.slane %v7009_v9, %v9784_v51  ;;  %v7024_v29 = vrot.slane %v7010_v50, %v9784_v51 }
 0x5da   :  { %v7025_v60 = vcombine.low %v7017_v13, %v7024_v29  ;;  %v9087_v13 = vld [vmem:[%s10131_s10 + $0x10] sm:$0xff]   ;;  %v9088_v29 = vld [vmem:[%s10131_s10 + $0x18] sm:$0xff]  }
 0x5dc   :  { %v7032_v34 = vrot.slane %v7025_v60, %v9784_v51 }
 0x5de   :  { %v7034_v15 = vsub.f32 %v6979_v49, %v7032_v34 }
 0x5e0   :  { %v7059_v63 = vrot.slane %v7034_v15, %v9861_v8  ;;  %v7051_v24 = vrot.slane %v7034_v15, %v9855_v5  ;;  %v7047_v14 = vrot.slane %v7034_v15, %v9852_v6  ;;  %v7055_v3 = vrot.slane %v7034_v15, %v9858_v21 }
 0x5e2   :  { %v7071_v16 = vadd.f32 %v7059_v63, %v7042_v10  ;;  %v7065_v54 = vadd.f32 %v7051_v24, %v7036_v23  ;;  %v7069_v33 = vadd.f32 %v7051_v24, %v7040_v38  ;;  %v7067_v35 = vadd.f32 %v7059_v63, %v7038_v52 }
 0x5e3   :  { %v7064_v37 = vadd.f32 %v7047_v14, %v7035_v56  ;;  %v7068_v62 = vadd.f32 %v7047_v14, %v7039_v57  ;;  %v7066_v7 = vadd.f32 %v7055_v3, %v7037_v11  ;;  %v7070_v40 = vadd.f32 %v7055_v3, %v7041_v28  ;;  %v9085_v11 = vld [vmem:[%s10131_s10] sm:$0xff]   ;;  %v9086_v28 = vld [vmem:[%s10131_s10 + $0x8] sm:$0xff]  }
 0x5e4   :  { %v7073_v17 = vmax.f32 %v7065_v54, 0.0  ;;  %v7077_v45 = vmax.f32 %v7069_v33, 0.0  ;;  %v7075_v1 = vmax.f32 %v7067_v35, 0.0  ;;  %v7079_v18 = vmax.f32 %v7071_v16, 0.0  ;;  %v7450_v16 = vld [vmem:[#allocation14] sm:$0x1] }
 0x5e5   :  { %v7072_v42 = vmax.f32 %v7064_v37, 0.0  ;;  %v7076_v8 = vmax.f32 %v7068_v62, 0.0  ;;  %v7074_v58 = vmax.f32 %v7066_v7, 0.0  ;;  %v7078_v5 = vmax.f32 %v7070_v40, 0.0  ;;  %v7472_v35 = vld [vmem:[#allocation16] sm:$0x1] }
 0x5e6   :  { %v7081_v30 = vpack.c.bf16 %v7077_v45, %v7073_v17  ;;  %v7083_v36 = vpack.c.bf16 %v7079_v18, %v7075_v1  ;;  %v9374_v3 = vmov 0.0  }
 0x5e7   :  { %v7080_v43 = vpack.c.bf16 %v7076_v8, %v7072_v42  ;;  %v7082_v21 = vpack.c.bf16 %v7078_v5, %v7074_v58  ;;  %8539 = vmatprep.subr.bf16.mxu0 %v9374_v3 }
 0x5e8   :  { %7372 = vmatprep.mubr.bf16.mxu0 %v7081_v30  ;;  %7413 = vmatprep.mubr.bf16.mxu1 %v7083_v36 }
 0x5e9   :  { %7373 = vmatmul.mubr.bf16.vlgmr.msra.gmra.mrb[12].mxu0 %v7080_v43  ;;  %7414 = vmatmul.mubr.bf16.vlgmr.msra.gmra.mrb[12].mxu1 %v7082_v21 }
 0x5ea   :  { %8541 = vmatprep.mubr.msk.bf16.mxu0 %vm9375_vm1, %v9374_v3 }
 0x6bc   :  { %v8509_v22 = vpop.f32.mrb[12].mxu0  ;;  %v8531_v26 = vpop.f32.mrb[12].mxu1 }
 0x6bd   :  { %v8510_v47 = vpop.f32.mrb[13].mxu0  ;;  %v8532_v39 = vpop.f32.mrb[13].mxu1 }
 0x6be   :  { %v8511_v44 = vadd.f32 %v8510_v47, %v8509_v22  ;;  %v8533_v19 = vadd.f32 %v8532_v39, %v8531_v26  ;;  %v8512_v25 = vpop.f32.mrb[14].mxu0  ;;  %v8534_v59 = vpop.f32.mrb[14].mxu1 }
 0x6bf   :  { %v8513_v4 = vpop.f32.mrb[15].mxu0  ;;  %v8535_v27 = vpop.f32.mrb[15].mxu1 }
 0x6c0   :  { %v7416_v41 = vadd.f32 %v8533_v19, %v8511_v44  ;;  %v8514_v55 = vadd.f32 %v8513_v4, %v8512_v25  ;;  %v8536_v48 = vadd.f32 %v8535_v27, %v8534_v59 }
 0x6c2   :  { %v7419_v31 = vadd.f32 %v8536_v48, %v8514_v55  ;;  %v7422_v0 = vmul.f32 %v7416_v41, %v7416_v41 }
 0x6c4   :  { %7426 = vrot.lane.b32.xlu0 %v7422_v0, %s9373_s7  ;;  %v7423_v61 = vmul.f32 %v7419_v31, %v7419_v31 }
 0x6c8   :  { %7428 = vrot.lane.b32.xlu0 %v7423_v61, %s9373_s7 }
 0x6e6   :  { %7532 = vxpose.xlu0.c.b16.start [1/4] (short) (narrow) %v9085_v11, 16 }
 0x6ea   :  { %7533 = vxpose.xlu0.c.b16.cont [2/4] (short) (narrow) %v9086_v28, 16 }
 0x6ee   :  { %7534 = vxpose.xlu0.c.b16.cont [3/4] (short) (narrow) %v9087_v13, 16 }
 0x6f2   :  { %7535 = vxpose.xlu0.c.b16.end [4/4] (short) (narrow) %v9088_v29, 16 }
 0x6fb   :  { %8655 = vset.pattern.permute.xlu0 %v10146_v20  ;;  %v7502_v20 = vld [vmem:[%s10132_s11] sm:$0xff]  ;;  %s9376_s11 = smov [#allocation17]  }
 0x6fc   :  { %s7602_s25 = sshll.u32 %s9376_s11, 4  ;;  %s7603_s25 = int_to_ptr.vmem [resolvable:$true] %s7602_s25 }
 0x6fd   :  { %s9322_s8 = scalar_lea.vmem %s7603_s25, 128  ;;  %p9327_p3 = scmp.lt.s32.totalorder %s7603_s25, %s7603_s25 }
 0x6fe   :  { %p9323_p2 = scmp.ne.s32.totalorder %s7603_s25, %s9322_s8  ;;  %p9328_p4 = scmp.lt.s32.totalorder %s9322_s8, %s9322_s8 }
 0x700   :  { %p9329_p5 = por %p9328_p4, %p9327_p3 }
 0x702   :  { %p9330_p6 = pnand %p9329_p5, %p9323_p2 }
 0x736   :  { %v7427_v12 = vpop.permute.xlu0 %7426 }
 0x737   :  { %v7433_v46 = vsel %vm7432_vm0, %v7416_v41, %v7427_v12 }
 0x73a   :  { %v7429_v2 = vpop.permute.xlu0 %7428 }
 0x73b   :  { %v7434_v53 = vsel %vm7432_vm0, %v7419_v31, %v7429_v2 }
 0x73c   :  { %v7435_v32 = vadd.f32 %v7434_v53, %v7433_v46 }
 0x73e   :  { %v7436_v10 = vrot.slane %v7435_v32, 4 }
 0x740   :  { %v7437_v23 = vadd.f32 %v7436_v10, %v7435_v32 }
 0x742   :  { %v7438_v38 = vrot.slane %v7437_v23, 2 }
 0x744   :  { %v7439_v52 = vadd.f32 %v7438_v38, %v7437_v23 }
 0x746   :  { %v7440_v9 = vrot.slane %v7439_v52, 1 }
 0x748   :  { %v7441_v50 = vadd.f32 %v7440_v9, %v7439_v52 }
 0x74a   :  { %v7442_v56 = vmul.f32 0.0625, %v7441_v50 }
 0x74c   :  { %v7443_v57 = vmul.f32 %v7442_v56, %v7442_v56  ;;  %v7540_v5 = vpop.trf.xlu0 }
 0x74e   :  { %7445 = vrot.lane.b32.xlu1 %v7443_v57, %s9373_s7 }
 0x7c0   :  { %v7446_v60 = vpop.permute.xlu1 %7445 }
 0x7c1   :  { %v7448_v49 = vsub.f32 %v7442_v56, %v7446_v60 }
 0x7c3   :  { %v7449_v34 = vmax.f32 %v7448_v49, 0.0 }
 0x7c5   :  { %v7451_v15 = vadd.f32 1e-05, %v7449_v34 }
 0x7c7   :  { %9113 = vrsqrt.f32 %v7451_v15 }
 0x7d1   :  { %v9114_v63 = vpop.eup %9113 }
 0x7d2   :  { %v7460_v24 = vrot.slane %v9114_v63, %v9784_v51 }
 0x7d4   :  { %v7467_v14 = vrot.slane %v7460_v24, %v9784_v51 }
 0x7d6   :  { %7468 = vrot.lane.b32.xlu1 %v7467_v14, %s9373_s7 }
 0x7da   :  { %7505 = vperm.xlu1 %8654, %v7502_v20  }
 0x848   :  { %v7469_v54 = vpop.permute.xlu1 %7468 }
 0x849   :  { %v7471_v33 = vmul.f32 %v7469_v54, %v7450_v16 }
 0x84b   :  { %v7473_v37 = vmul.f32 %v7471_v33, %v7442_v56  ;;  %v7479_v62 = vrot.slane %v7471_v33, %v9852_v6 }
 0x84d   :  { %v7474_v7 = vsub.f32 %v7472_v35, %v7473_v37  ;;  %v7481_v51 = vmul.f32 %v7479_v62, %v7416_v41  ;;  %v7482_v40 = vmul.f32 %v7479_v62, %v7419_v31 }
 0x84f   :  { %v7487_v17 = vrot.slane %v7474_v7, %v9852_v6 }
 0x851   :  { %v7489_v45 = vadd.f32 %v7487_v17, %v7481_v51  ;;  %v7490_v1 = vadd.f32 %v7487_v17, %v7482_v40 }
 0x853   :  { %v7491_v18 = vmax.f32 %v7489_v45, 0.0  ;;  %v7492_v42 = vmax.f32 %v7490_v1, 0.0 }
 0x855   :  { %v7493_v8 = vpack.c.bf16 %v7492_v42, %v7491_v18 }
 0x857   :  { %v7552_v58 = vsel %vm7432_vm0, %v7493_v8, 0 }
 0x858   :  { %8540 = vmatpush3.bf16.xpose.msra.mxu0 %v7552_v58 }
 0x859   :  { %v7506_v30 = vpop.permute.xlu1 %7505 }
 0x85f   :  { %8542 = vmatmul.mubr.msk.bf16.vlgmr.msra.gmra.mrb[16].mxu0 %vm7432_vm0, %v7540_v5 }
 0x932   :  { %v7588_v36 = vpop.f32.mrb[16].mxu0 }
 0x933   :  { %v7589_v43 = vadd.f32 %v7588_v36, %v7506_v30  ;;  %v8543_v21 = vpop.f32.mrb[17].mxu0 }
 0x934   :  { %v7591_v6 = vpop.f32.mrb[18].mxu0 }
 0x935   :  { %v8544_v22 = vpop.f32.mrb[19].mxu0  ;;  %7595 = vst.msk [vmem:[#allocation17] sm:$0xff] %vm7594_vm2, %v7589_v43 }
 0x936   :  { %9333 = shalt.err (!%p9330_p6)
}
 0x937   :  { %s9334_s2 = scalar_lea.hbm %s10133_s12, 128 }
 0x938   :  { %p9335_p7 = scmp.ne.s32.totalorder %s10133_s12, %s9334_s2  ;;  %p9338_p8 = scmp.lt.u32.totalorder %s9334_s2, %s10133_s12 }
 0x93a   :  { %p9340_p9 = pnand %p9338_p8, %p9335_p7 }
 0x93c   :  { %9343 = shalt.err (!%p9340_p9)
}
 0x93d   :  { %7605 = dma.vmem_to_hbm [thread:$0]  %s7603_s25, 128, %s10133_s12, [#allocation4]  }
 0x93e   :  { %9354 = dma.done.wait [#allocation4], 128  }
 0x93f   :  { %9355 = vsyncadd [#allocation4], 4294967168 }
 0x940   :  { %7609 = vsyncpa [#allocation3], 1 }
 0x941   :  { %7610 = vsyncpa [#allocation6], 1 }
 0x942   :  { %7611 = vsyncpa [#allocation9], 1 }
 0x943   :  { %7612 = vsyncpa [#allocation12], 1 }
 0x944   :  { %7613 = vsyncpa [#allocation15], 1 }
 0x945   :  { %7614 = vsyncpa [#allocation4], 1 }

</bundles_post_ra>
